<compile_context>
chip_gen: v5e
topology: v5e:2x2
jax: 0.10.0
libtpu: 0.0.40
codegen_flags: <defaults>
</compile_context>

<pallas_src>
import functools

import jax
import jax.numpy as jnp
from jax import lax
from jax.experimental import pallas as pl
from jax.experimental.pallas import tpu as pltpu


def _pc_forward_kernel(dims, lr, max_its, min_energy, *refs):
    """refs = [x_f32, x_bf16, Wcat_0..Wcat_L, bcat_0..bcat_L, Wg_1..Wg_L,
               out, s_1..s_{L-1} scratch, stop_flag]."""
    L = len(dims) - 1
    f32, bf16 = jnp.float32, jnp.bfloat16

    xf_ref, xb_ref = refs[0], refs[1]
    pos = 2
    wcat = refs[pos:pos + L + 1]; pos += L + 1
    bcat = refs[pos:pos + L + 1]; pos += L + 1
    wg = refs[pos:pos + L]; pos += L
    out_ref = refs[pos]; pos += 1
    s_scr = refs[pos:pos + L - 1]; pos += L - 1
    stop_ref = refs[pos]

    B = xf_ref.shape[0]
    invN = [1.0 / float(B * d) for d in dims]      # mse 'mean' scaling
    inv2 = [2.0 * v for v in invN]

    def s_ref(k):                      # storage of s_k, 1 <= k <= L (s_L -> out_ref)
        return out_ref if k == L else s_scr[k - 1]

    def state(k):                      # f32 value of s_k, 0 <= k <= L (s_0 = x fixed)
        return xf_ref[...] if k == 0 else s_ref(k)[...]

    def mm(lhs_bf16, rhs):             # bf16 operands, f32 accumulation (1-pass MXU)
        return jnp.dot(lhs_bf16, rhs, preferred_element_type=f32)

    def sumsq(r):
        return jnp.sum(r * r)

    stop_ref[0] = jnp.int32(0)

    # ------------- forward state init:  s_{j+1} = f_j(s_j) -------------------
    # Wcat_j columns [0, d_{j+1}) hold Wf_j^T; bcat_j holds bf_j first.
    vb = xb_ref[...]
    for j in range(L):
        v = mm(vb, wcat[j][:, 0:dims[j + 1]]) + bcat[j][:, 0:dims[j + 1]]
        s_ref(j + 1)[...] = v
        if j + 1 < L:
            vb = v.astype(bf16)

    # ------------- iteration 0:  rf == 0 exactly (forward init) --------------
    if max_its >= 1:
        energy_terms = []
        rb_prev = None                                  # rb_{m-2}
        for m in range(1, L + 1):
            lhs = state(m).astype(bf16)
            if m < L:                                   # wb slice of the fused weight
                lo = dims[m + 1]
                wsl = wcat[m][:, lo:lo + dims[m - 1]]
                bsl = bcat[m][:, lo:lo + dims[m - 1]]
            else:
                wsl = wcat[m][...]
                bsl = bcat[m][...]
            rb_cur = mm(lhs, wsl) + bsl - state(m - 1)  # rb_{m-1}
            if max_its > 1:                             # decision dead if last it
                energy_terms.append(sumsq(rb_cur) * invN[m - 1])
            if m >= 2:                                  # update interior s_k, k = m-1
                k = m - 1
                # 2/N scale is pre-folded into Wg; wb block = first d_{k-1} rows
                gsum = mm(rb_prev.astype(bf16), wg[k - 1][0:dims[k - 1], :])
                g = gsum - inv2[k] * rb_cur
                s_ref(k)[...] = state(k) - lr * g
            rb_prev = rb_cur
        gsum = mm(rb_prev.astype(bf16), wg[L - 1][...])          # k = L
        s_ref(L)[...] = state(L) - lr * gsum
        if max_its > 1:
            energy = sum(energy_terms)
            stop_ref[0] = (energy < min_energy).astype(jnp.int32)

    # ------------- iterations 1 .. max_its-1, gated on the break flag --------
    def run_iteration(compute_energy):
        # 2-layer sliding window of residuals; s_k is written back immediately after
        # the fused fwd matmul at index k+1 (residuals already hold the old values).
        energy_terms = []
        # fused fwd at index 0 (only an f-part exists): rf_0
        rf_m1 = mm(xb_ref[...], wcat[0][...]) + bcat[0][...] - state(1)
        if compute_energy:
            energy_terms.append(sumsq(rf_m1) * invN[1])
        rf_m2 = None                                    # rf_{m-2}
        rb_m2 = None                                    # rb_{m-2}
        for m in range(1, L + 1):
            lhs = state(m).astype(bf16)                 # single cast per state/iter
            if m < L:
                P = mm(lhs, wcat[m][...]) + bcat[m][...]
                pred_f = P[:, 0:dims[m + 1]]
                pred_b = P[:, dims[m + 1]:dims[m + 1] + dims[m - 1]]
            else:
                pred_f = None
                pred_b = mm(lhs, wcat[m][...]) + bcat[m][...]
            rb_m1 = pred_b - state(m - 1)                          # rb_{m-1}
            rf_m = (pred_f - state(m + 1)) if m < L else None      # rf_m
            if compute_energy:
                energy_terms.append(sumsq(rb_m1) * invN[m - 1])
                if m < L:
                    energy_terms.append(sumsq(rf_m) * invN[m + 1])
            if m >= 2:                                  # update s_k, k = m-1
                k = m - 1
                lhs_g = jnp.concatenate([rb_m2, rf_m1], axis=1).astype(bf16)
                gsum = mm(lhs_g, wg[k - 1][...])        # K-concat sums both terms
                g = gsum - inv2[k] * (rf_m2 + rb_m1)
                s_ref(k)[...] = state(k) - lr * g
            rf_m2, rb_m2 = rf_m1, rb_m1
            rf_m1 = rf_m
        gsum = mm(rb_m2.astype(bf16), wg[L - 1][...])              # k = L
        g = gsum - inv2[L] * rf_m2
        s_ref(L)[...] = state(L) - lr * g
        if compute_energy:
            energy = sum(energy_terms)
            # bf16-residual energy: break threshold is fuzzier than an f32 reference
            stop_ref[0] = (energy < min_energy).astype(jnp.int32)

    n_gated = max_its - 1
    if 0 < n_gated <= 4:                # small max_its: unroll, skip dead energy calc
        for it in range(1, max_its):
            @pl.when(stop_ref[0] == 0)
            def _(compute_energy=(it < max_its - 1)):
                run_iteration(compute_energy)
    elif n_gated > 4:                   # large max_its: rolled loop bounds code size
        def body(_, carry):
            @pl.when(stop_ref[0] == 0)
            def _():
                run_iteration(True)
            return carry
        lax.fori_loop(1, max_its, body, jnp.int32(0), unroll=False)


def pc_model_forward(x, layer_params, *, lr=1e-3, max_its=1, min_energy=0.1):
    """Pallas-backed PCModel.forward(x=x) in eval mode.

    layer_params: list of (wf, bf, wb, bb) with PyTorch Linear layouts:
      wf: (dims[j+1], dims[j])  bf: (1, dims[j+1])
      wb: (dims[j], dims[j+1])  bb: (1, dims[j])
    """
    B, d0 = x.shape
    dims = [d0] + [p[0].shape[0] for p in layer_params]
    L = len(dims) - 1
    assert L >= 1
    N = [B * d for d in dims]
    f32, bf16 = jnp.float32, jnp.bfloat16

    # Fused forward weights: one matmul per state s_m covers f_module_m and
    # b_module_{m-1} via a lane-concatenated [Wf_m^T | Wb_{m-1}^T]; biases likewise.
    wcat, bcat = [], []
    for m in range(L + 1):
        wparts, bparts = [], []
        if m < L:
            wf, bf_, _, _ = layer_params[m]
            wparts.append(jnp.asarray(wf).T.astype(bf16))                 # (d_m, d_{m+1})
            bparts.append(jnp.asarray(bf_).reshape(1, -1).astype(f32))
        if m > 0:
            _, _, wb, bb = layer_params[m - 1]
            wparts.append(jnp.asarray(wb).T.astype(bf16))                 # (d_m, d_{m-1})
            bparts.append(jnp.asarray(bb).reshape(1, -1).astype(f32))
        wcat.append(wparts[0] if len(wparts) == 1 else jnp.concatenate(wparts, axis=1))
        bcat.append(bparts[0] if len(bparts) == 1 else jnp.concatenate(bparts, axis=1))

    # Fused gradient weights: stack [2/N_{k-1}*Wb_{k-1} ; 2/N_{k+1}*Wf_k] along the
    # contraction axis; multiplying the lane-concatenated residual sums both terms.
    wg = []
    for k in range(1, L + 1):
        _, _, wb, _ = layer_params[k - 1]
        blocks = [(jnp.asarray(wb) * (2.0 / N[k - 1])).astype(bf16)]      # (d_{k-1}, d_k)
        if k < L:
            wf, _, _, _ = layer_params[k]
            blocks.append((jnp.asarray(wf) * (2.0 / N[k + 1])).astype(bf16))  # (d_{k+1}, d_k)
        wg.append(blocks[0] if len(blocks) == 1 else jnp.concatenate(blocks, axis=0))

    flat = [jnp.asarray(x).astype(f32), jnp.asarray(x).astype(bf16)] + wcat + bcat + wg

    # VMEM footprint + advisory cost for XLA scheduling.
    in_bytes = sum(int(a.size) * a.dtype.itemsize for a in flat)
    out_bytes = B * dims[-1] * 4
    scratch_bytes = sum(B * dims[k] * 4 for k in range(1, L)) + 4
    footprint = in_bytes + out_bytes + scratch_bytes
    vmem_limit = int(min(100 * 1024 * 1024, max(32 * 1024 * 1024, 2 * footprint)))

    def mmf(m_, k_, n_):
        return 2 * m_ * k_ * n_
    flops = sum(mmf(B, dims[j], dims[j + 1]) for j in range(L))            # init
    flops += sum(mmf(B, dims[m], dims[m - 1]) for m in range(1, L + 1))    # it-0 rb
    flops += sum(mmf(B, dims[k - 1], dims[k]) for k in range(1, L + 1))    # it-0 grad
    per_it = sum(mmf(B, dims[m], (dims[m + 1] if m < L else 0) +
                     (dims[m - 1] if m > 0 else 0)) for m in range(L + 1))
    per_it += sum(mmf(B, dims[k - 1] + (dims[k + 1] if k < L else 0), dims[k])
                  for k in range(1, L + 1))
    flops += max(0, max_its - 1) * per_it

    kernel = functools.partial(_pc_forward_kernel, tuple(dims),
                               float(lr), int(max_its), float(min_energy))

    # TODO(synk): for batches that exceed VMEM, add a batch grid with
    # dimension_semantics=("parallel",) (v7x dual-TC) plus a two-phase cross-tile
    # energy reduction so the whole-batch `energy < min_energy` break stays exact.
    # TODO(synk): for very wide/deep nets on v7x (64 MiB VMEM), stream per-layer
    # fused weights with memory_space=pl.ANY + double-buffered pltpu.make_async_copy
    # instead of keeping every weight resident.
    return pl.pallas_call(
        kernel,
        out_shape=jax.ShapeDtypeStruct((B, dims[-1]), f32),
        in_specs=[pl.BlockSpec(memory_space=pltpu.MemorySpace.VMEM)] * len(flat),
        out_specs=pl.BlockSpec(memory_space=pltpu.MemorySpace.VMEM),
        scratch_shapes=([pltpu.VMEM((B, dims[k]), f32) for k in range(1, L)]
                        + [pltpu.SMEM((1,), jnp.int32)]),
        compiler_params=pltpu.CompilerParams(vmem_limit_bytes=vmem_limit),
        cost_estimate=pl.CostEstimate(flops=int(flops), transcendentals=0,
                                      bytes_accessed=int(in_bytes + out_bytes)),
    )(*flat)


# ---------------- pure-JAX reference (autograd) for validation ---------------
def reference_forward(x, layer_params, *, lr, max_its, min_energy):
    L = len(layer_params)

    def f_mod(j, v):
        wf, bf, _, _ = layer_params[j]
        return v @ wf.T + bf

    def b_mod(j, v):
        _, _, wb, bb = layer_params[j]
        return v @ wb.T + bb

    s = [x]
    for j in range(L):
        s.append(f_mod(j, s[j]))

    def energy_fn(inner, s0):
        states = (s0,) + tuple(inner)
        e = 0.0
        for j in range(L):
            e = e + jnp.mean((f_mod(j, states[j]) - states[j + 1]) ** 2)
            e = e + jnp.mean((b_mod(j, states[j + 1]) - states[j]) ** 2)
        return e

    for _ in range(max_its):
        e, grads = jax.value_and_grad(energy_fn)(tuple(s[1:]), s[0])
        s = [s[0]] + [sk - lr * g for sk, g in zip(s[1:], grads)]
        if float(e) < min_energy:
            break
    return s[-1]


if __name__ == "__main__":
    B = 8
    dims = (128, 256, 128)        # lane-dense: feature dims are multiples of 128
    lr, max_its, min_energy = 1e-3, 3, 0.1

    key = jax.random.PRNGKey(0)
    n_layers = len(dims) - 1
    keys = jax.random.split(key, 1 + 4 * n_layers)
    x = jax.random.normal(keys[0], (B, dims[0]), jnp.float32)

    layer_params = []
    ki = 1
    for j in range(n_layers):
        din, dout = dims[j], dims[j + 1]
        sf = 1.0 / (din ** 0.5)       # f_module: Linear(din -> dout)
        wf = jax.random.uniform(keys[ki], (dout, din), jnp.float32, -sf, sf); ki += 1
        bf = jax.random.uniform(keys[ki], (1, dout), jnp.float32, -sf, sf); ki += 1
        sb = 1.0 / (dout ** 0.5)      # b_module: Linear(dout -> din)
        wb = jax.random.uniform(keys[ki], (din, dout), jnp.float32, -sb, sb); ki += 1
        bb = jax.random.uniform(keys[ki], (1, din), jnp.float32, -sb, sb); ki += 1
        layer_params.append((wf, bf, wb, bb))

    out = pc_model_forward(x, layer_params, lr=lr, max_its=max_its,
                           min_energy=min_energy)
    out = jax.block_until_ready(out)

    ref = reference_forward(x, layer_params, lr=lr, max_its=max_its,
                            min_energy=min_energy)
    ref = jax.block_until_ready(ref)

    assert out.shape == ref.shape, (out.shape, ref.shape)
    max_err = float(jnp.max(jnp.abs(out - ref)))
    assert jnp.allclose(out, ref, rtol=2e-2, atol=1e-2), max_err
    print("KERNEL_OK")
</pallas_src>

<mosaic_0001>
module attributes {stable_mosaic.version = 11 : i64} {
  func.func @_pc_forward_kernel(%arg0: memref<8x128xf32, #tpu.memory_space<vmem>>, %arg1: memref<8x128xbf16, #tpu.memory_space<vmem>>, %arg2: memref<128x256xbf16, #tpu.memory_space<vmem>>, %arg3: memref<256x256xbf16, #tpu.memory_space<vmem>>, %arg4: memref<128x256xbf16, #tpu.memory_space<vmem>>, %arg5: memref<1x256xf32, #tpu.memory_space<vmem>>, %arg6: memref<1x256xf32, #tpu.memory_space<vmem>>, %arg7: memref<1x256xf32, #tpu.memory_space<vmem>>, %arg8: memref<256x256xbf16, #tpu.memory_space<vmem>>, %arg9: memref<256x128xbf16, #tpu.memory_space<vmem>>, %arg10: memref<8x128xf32, #tpu.memory_space<vmem>>, %arg11: memref<8x256xf32, #tpu.memory_space<vmem>>, %arg12: memref<1xi32, #tpu.memory_space<smem>>) attributes {dimension_semantics = [], scalar_prefetch = 0 : i64, scratch_operands = 2 : i64, tpu.core_type = #tpu.core_type<tc>} {
    %c0_i32 = arith.constant 0 : i32
    %c0 = arith.constant 0 : index
    %0 = memref.load %arg12[%c0] : memref<1xi32, #tpu.memory_space<smem>>
    memref.store %c0_i32, %arg12[%c0] : memref<1xi32, #tpu.memory_space<smem>>
    %c0_0 = arith.constant 0 : index
    %c0_1 = arith.constant 0 : index
    %1 = vector.load %arg1[%c0_0, %c0_1] : memref<8x128xbf16, #tpu.memory_space<vmem>>, vector<8x128xbf16>
    %c0_2 = arith.constant 0 : index
    %c0_3 = arith.constant 0 : index
    %2 = vector.load %arg2[%c0_2, %c0_3] : memref<128x256xbf16, #tpu.memory_space<vmem>>, vector<128x256xbf16>
    %cst = arith.constant dense<0.000000e+00> : vector<8x256xf32>
    %3 = tpu.matmul %1, %2, %cst {dimension_numbers = #tpu.dot_dimension_numbers<[1], [0], [0], [1], [0, 0, 1, 1], [], []>} : vector<8x128xbf16>, vector<128x256xbf16>, vector<8x256xf32> -> vector<8x256xf32>
    %c0_4 = arith.constant 0 : index
    %c0_5 = arith.constant 0 : index
    %4 = vector.load %arg5[%c0_4, %c0_5] : memref<1x256xf32, #tpu.memory_space<vmem>>, vector<1x256xf32>
    %5 = vector.broadcast %4 : vector<1x256xf32> to vector<8x256xf32>
    %6 = arith.addf %3, %5 : vector<8x256xf32>
    %c0_6 = arith.constant 0 : index
    %c0_7 = arith.constant 0 : index
    %7 = vector.load %arg11[%c0_6, %c0_7] : memref<8x256xf32, #tpu.memory_space<vmem>>, vector<8x256xf32>
    tpu.vector_store %arg11[%c0_6, %c0_7], %6 {strides = array<i32>} : memref<8x256xf32, #tpu.memory_space<vmem>>, vector<8x256xf32>,
    %8 = arith.truncf %6 : vector<8x256xf32> to vector<8x256xbf16>
    %c0_8 = arith.constant 0 : index
    %c0_9 = arith.constant 0 : index
    %9 = vector.load %arg3[%c0_8, %c0_9] : memref<256x256xbf16, #tpu.memory_space<vmem>>, vector<256x128xbf16>
    %cst_10 = arith.constant dense<0.000000e+00> : vector<8x128xf32>
    %10 = tpu.matmul %8, %9, %cst_10 {dimension_numbers = #tpu.dot_dimension_numbers<[1], [0], [0], [1], [0, 0, 1, 1], [], []>} : vector<8x256xbf16>, vector<256x128xbf16>, vector<8x128xf32> -> vector<8x128xf32>
    %c0_11 = arith.constant 0 : index
    %c0_12 = arith.constant 0 : index
    %11 = vector.load %arg6[%c0_11, %c0_12] : memref<1x256xf32, #tpu.memory_space<vmem>>, vector<1x128xf32>
    %12 = vector.broadcast %11 : vector<1x128xf32> to vector<8x128xf32>
    %13 = arith.addf %10, %12 : vector<8x128xf32>
    %c0_13 = arith.constant 0 : index
    %c0_14 = arith.constant 0 : index
    %14 = vector.load %arg10[%c0_13, %c0_14] : memref<8x128xf32, #tpu.memory_space<vmem>>, vector<8x128xf32>
    tpu.vector_store %arg10[%c0_13, %c0_14], %13 {strides = array<i32>} : memref<8x128xf32, #tpu.memory_space<vmem>>, vector<8x128xf32>,
    %c0_15 = arith.constant 0 : index
    %c0_16 = arith.constant 0 : index
    %15 = vector.load %arg11[%c0_15, %c0_16] : memref<8x256xf32, #tpu.memory_space<vmem>>, vector<8x256xf32>
    %16 = arith.truncf %15 : vector<8x256xf32> to vector<8x256xbf16>
    %c0_17 = arith.constant 0 : index
    %c128 = arith.constant 128 : index
    %17 = vector.load %arg3[%c0_17, %c128] : memref<256x256xbf16, #tpu.memory_space<vmem>>, vector<256x128xbf16>
    %c0_18 = arith.constant 0 : index
    %c128_19 = arith.constant 128 : index
    %18 = vector.load %arg6[%c0_18, %c128_19] : memref<1x256xf32, #tpu.memory_space<vmem>>, vector<1x128xf32>
    %cst_20 = arith.constant dense<0.000000e+00> : vector<8x128xf32>
    %19 = tpu.matmul %16, %17, %cst_20 {dimension_numbers = #tpu.dot_dimension_numbers<[1], [0], [0], [1], [0, 0, 1, 1], [], []>} : vector<8x256xbf16>, vector<256x128xbf16>, vector<8x128xf32> -> vector<8x128xf32>
    %20 = vector.broadcast %18 : vector<1x128xf32> to vector<8x128xf32>
    %21 = arith.addf %19, %20 : vector<8x128xf32>
    %c0_21 = arith.constant 0 : index
    %c0_22 = arith.constant 0 : index
    %22 = vector.load %arg0[%c0_21, %c0_22] : memref<8x128xf32, #tpu.memory_space<vmem>>, vector<8x128xf32>
    %23 = arith.subf %21, %22 : vector<8x128xf32>
    %24 = arith.mulf %23, %23 : vector<8x128xf32>
    %25 = vector.shape_cast %24 : vector<8x128xf32> to vector<1x8x128xf32>
    %cst_23 = arith.constant dense<0.000000e+00> : vector<1xf32>
    %26 = vector.multi_reduction <add>, %25, %cst_23 [1, 2] : vector<1x8x128xf32> to vector<1xf32>
    %27 = vector.shape_cast %26 : vector<1xf32> to vector<1x1x1xf32>
    %28 = vector.extract %27[0, 0, 0] : f32 from vector<1x1x1xf32>
    %cst_24 = arith.constant 9.765625E-4 : f32
    %29 = arith.mulf %28, %cst_24 : f32
    %c0_25 = arith.constant 0 : index
    %c0_26 = arith.constant 0 : index
    %30 = vector.load %arg10[%c0_25, %c0_26] : memref<8x128xf32, #tpu.memory_space<vmem>>, vector<8x128xf32>
    %31 = arith.truncf %30 : vector<8x128xf32> to vector<8x128xbf16>
    %c0_27 = arith.constant 0 : index
    %c0_28 = arith.constant 0 : index
    %32 = vector.load %arg4[%c0_27, %c0_28] : memref<128x256xbf16, #tpu.memory_space<vmem>>, vector<128x256xbf16>
    %c0_29 = arith.constant 0 : index
    %c0_30 = arith.constant 0 : index
    %33 = vector.load %arg7[%c0_29, %c0_30] : memref<1x256xf32, #tpu.memory_space<vmem>>, vector<1x256xf32>
    %cst_31 = arith.constant dense<0.000000e+00> : vector<8x256xf32>
    %34 = tpu.matmul %31, %32, %cst_31 {dimension_numbers = #tpu.dot_dimension_numbers<[1], [0], [0], [1], [0, 0, 1, 1], [], []>} : vector<8x128xbf16>, vector<128x256xbf16>, vector<8x256xf32> -> vector<8x256xf32>
    %35 = vector.broadcast %33 : vector<1x256xf32> to vector<8x256xf32>
    %36 = arith.addf %34, %35 : vector<8x256xf32>
    %c0_32 = arith.constant 0 : index
    %c0_33 = arith.constant 0 : index
    %37 = vector.load %arg11[%c0_32, %c0_33] : memref<8x256xf32, #tpu.memory_space<vmem>>, vector<8x256xf32>
    %38 = arith.subf %36, %37 : vector<8x256xf32>
    %39 = arith.mulf %38, %38 : vector<8x256xf32>
    %40 = vector.shape_cast %39 : vector<8x256xf32> to vector<1x8x256xf32>
    %cst_34 = arith.constant dense<0.000000e+00> : vector<1xf32>
    %41 = vector.multi_reduction <add>, %40, %cst_34 [1, 2] : vector<1x8x256xf32> to vector<1xf32>
    %42 = vector.shape_cast %41 : vector<1xf32> to vector<1x1x1xf32>
    %43 = vector.extract %42[0, 0, 0] : f32 from vector<1x1x1xf32>
    %cst_35 = arith.constant 4.8828125E-4 : f32
    %44 = arith.mulf %43, %cst_35 : f32
    %45 = arith.truncf %23 : vector<8x128xf32> to vector<8x128xbf16>
    %c0_36 = arith.constant 0 : index
    %c0_37 = arith.constant 0 : index
    %46 = vector.load %arg8[%c0_36, %c0_37] : memref<256x256xbf16, #tpu.memory_space<vmem>>, vector<128x256xbf16>
    %cst_38 = arith.constant dense<0.000000e+00> : vector<8x256xf32>
    %47 = tpu.matmul %45, %46, %cst_38 {dimension_numbers = #tpu.dot_dimension_numbers<[1], [0], [0], [1], [0, 0, 1, 1], [], []>} : vector<8x128xbf16>, vector<128x256xbf16>, vector<8x256xf32> -> vector<8x256xf32>
    %cst_39 = arith.constant 9.765625E-4 : f32
    %48 = vector.broadcast %cst_39 : f32 to vector<8x256xf32>
    %49 = arith.mulf %48, %38 : vector<8x256xf32>
    %50 = arith.subf %47, %49 : vector<8x256xf32>
    %c0_40 = arith.constant 0 : index
    %c0_41 = arith.constant 0 : index
    %51 = vector.load %arg11[%c0_40, %c0_41] : memref<8x256xf32, #tpu.memory_space<vmem>>, vector<8x256xf32>
    %cst_42 = arith.constant 1.000000e-03 : f32
    %52 = vector.broadcast %cst_42 : f32 to vector<8x256xf32>
    %53 = arith.mulf %52, %50 : vector<8x256xf32>
    %54 = arith.subf %51, %53 : vector<8x256xf32>
    %c0_43 = arith.constant 0 : index
    %c0_44 = arith.constant 0 : index
    %55 = vector.load %arg11[%c0_43, %c0_44] : memref<8x256xf32, #tpu.memory_space<vmem>>, vector<8x256xf32>
    tpu.vector_store %arg11[%c0_43, %c0_44], %54 {strides = array<i32>} : memref<8x256xf32, #tpu.memory_space<vmem>>, vector<8x256xf32>,
    %56 = arith.truncf %38 : vector<8x256xf32> to vector<8x256xbf16>
    %c0_45 = arith.constant 0 : index
    %c0_46 = arith.constant 0 : index
    %57 = vector.load %arg9[%c0_45, %c0_46] : memref<256x128xbf16, #tpu.memory_space<vmem>>, vector<256x128xbf16>
    %cst_47 = arith.constant dense<0.000000e+00> : vector<8x128xf32>
    %58 = tpu.matmul %56, %57, %cst_47 {dimension_numbers = #tpu.dot_dimension_numbers<[1], [0], [0], [1], [0, 0, 1, 1], [], []>} : vector<8x256xbf16>, vector<256x128xbf16>, vector<8x128xf32> -> vector<8x128xf32>
    %c0_48 = arith.constant 0 : index
    %c0_49 = arith.constant 0 : index
    %59 = vector.load %arg10[%c0_48, %c0_49] : memref<8x128xf32, #tpu.memory_space<vmem>>, vector<8x128xf32>
    %cst_50 = arith.constant 1.000000e-03 : f32
    %60 = vector.broadcast %cst_50 : f32 to vector<8x128xf32>
    %61 = arith.mulf %60, %58 : vector<8x128xf32>
    %62 = arith.subf %59, %61 : vector<8x128xf32>
    %c0_51 = arith.constant 0 : index
    %c0_52 = arith.constant 0 : index
    %63 = vector.load %arg10[%c0_51, %c0_52] : memref<8x128xf32, #tpu.memory_space<vmem>>, vector<8x128xf32>
    tpu.vector_store %arg10[%c0_51, %c0_52], %62 {strides = array<i32>} : memref<8x128xf32, #tpu.memory_space<vmem>>, vector<8x128xf32>,
    %cst_53 = arith.constant 0.000000e+00 : f32
    %64 = arith.addf %cst_53, %29 : f32
    %65 = arith.addf %64, %44 : f32
    %cst_54 = arith.constant 1.000000e-01 : f32
    %66 = arith.cmpf olt, %65, %cst_54 : f32
    %67 = arith.extui %66 : i1 to i32
    %c0_55 = arith.constant 0 : index
    %68 = memref.load %arg12[%c0_55] : memref<1xi32, #tpu.memory_space<smem>>
    memref.store %67, %arg12[%c0_55] : memref<1xi32, #tpu.memory_space<smem>>
    %c0_56 = arith.constant 0 : index
    %69 = memref.load %arg12[%c0_56] : memref<1xi32, #tpu.memory_space<smem>>
    %c0_i32_57 = arith.constant 0 : i32
    %70 = arith.cmpi eq, %69, %c0_i32_57 : i32
    %71 = arith.extui %70 : i1 to i32
    %c0_i32_58 = arith.constant 0 : i32
    %72 = arith.cmpi ne, %71, %c0_i32_58 : i32
    scf.if %72 {
      %c0_62 = arith.constant 0 : index
      %c0_63 = arith.constant 0 : index
      %77 = vector.load %arg1[%c0_62, %c0_63] : memref<8x128xbf16, #tpu.memory_space<vmem>>, vector<8x128xbf16>
      %c0_64 = arith.constant 0 : index
      %c0_65 = arith.constant 0 : index
      %78 = vector.load %arg2[%c0_64, %c0_65] : memref<128x256xbf16, #tpu.memory_space<vmem>>, vector<128x256xbf16>
      %cst_66 = arith.constant dense<0.000000e+00> : vector<8x256xf32>
      %79 = tpu.matmul %77, %78, %cst_66 {dimension_numbers = #tpu.dot_dimension_numbers<[1], [0], [0], [1], [0, 0, 1, 1], [], []>} : vector<8x128xbf16>, vector<128x256xbf16>, vector<8x256xf32> -> vector<8x256xf32>
      %c0_67 = arith.constant 0 : index
      %c0_68 = arith.constant 0 : index
      %80 = vector.load %arg5[%c0_67, %c0_68] : memref<1x256xf32, #tpu.memory_space<vmem>>, vector<1x256xf32>
      %81 = vector.broadcast %80 : vector<1x256xf32> to vector<8x256xf32>
      %82 = arith.addf %79, %81 : vector<8x256xf32>
      %c0_69 = arith.constant 0 : index
      %c0_70 = arith.constant 0 : index
      %83 = vector.load %arg11[%c0_69, %c0_70] : memref<8x256xf32, #tpu.memory_space<vmem>>, vector<8x256xf32>
      %84 = arith.subf %82, %83 : vector<8x256xf32>
      %85 = arith.mulf %84, %84 : vector<8x256xf32>
      %86 = vector.shape_cast %85 : vector<8x256xf32> to vector<1x8x256xf32>
      %cst_71 = arith.constant dense<0.000000e+00> : vector<1xf32>
      %87 = vector.multi_reduction <add>, %86, %cst_71 [1, 2] : vector<1x8x256xf32> to vector<1xf32>
      %88 = vector.shape_cast %87 : vector<1xf32> to vector<1x1x1xf32>
      %89 = vector.extract %88[0, 0, 0] : f32 from vector<1x1x1xf32>
      %cst_72 = arith.constant 4.8828125E-4 : f32
      %90 = arith.mulf %89, %cst_72 : f32
      %c0_73 = arith.constant 0 : index
      %c0_74 = arith.constant 0 : index
      %91 = vector.load %arg11[%c0_73, %c0_74] : memref<8x256xf32, #tpu.memory_space<vmem>>, vector<8x256xf32>
      %92 = arith.truncf %91 : vector<8x256xf32> to vector<8x256xbf16>
      %c0_75 = arith.constant 0 : index
      %c0_76 = arith.constant 0 : index
      %93 = vector.load %arg3[%c0_75, %c0_76] : memref<256x256xbf16, #tpu.memory_space<vmem>>, vector<256x256xbf16>
      %cst_77 = arith.constant dense<0.000000e+00> : vector<8x256xf32>
      %94 = tpu.matmul %92, %93, %cst_77 {dimension_numbers = #tpu.dot_dimension_numbers<[1], [0], [0], [1], [0, 0, 1, 1], [], []>} : vector<8x256xbf16>, vector<256x256xbf16>, vector<8x256xf32> -> vector<8x256xf32>
      %c0_78 = arith.constant 0 : index
      %c0_79 = arith.constant 0 : index
      %95 = vector.load %arg6[%c0_78, %c0_79] : memref<1x256xf32, #tpu.memory_space<vmem>>, vector<1x256xf32>
      %96 = vector.broadcast %95 : vector<1x256xf32> to vector<8x256xf32>
      %97 = arith.addf %94, %96 : vector<8x256xf32>
      %98 = vector.extract_strided_slice %97 {offsets = [0, 0], sizes = [8, 128], strides = [1, 1]} : vector<8x256xf32> to vector<8x128xf32>
      %99 = vector.extract_strided_slice %97 {offsets = [0, 128], sizes = [8, 128], strides = [1, 1]} : vector<8x256xf32> to vector<8x128xf32>
      %c0_80 = arith.constant 0 : index
      %c0_81 = arith.constant 0 : index
      %100 = vector.load %arg0[%c0_80, %c0_81] : memref<8x128xf32, #tpu.memory_space<vmem>>, vector<8x128xf32>
      %101 = arith.subf %99, %100 : vector<8x128xf32>
      %c0_82 = arith.constant 0 : index
      %c0_83 = arith.constant 0 : index
      %102 = vector.load %arg10[%c0_82, %c0_83] : memref<8x128xf32, #tpu.memory_space<vmem>>, vector<8x128xf32>
      %103 = arith.subf %98, %102 : vector<8x128xf32>
      %104 = arith.mulf %101, %101 : vector<8x128xf32>
      %105 = vector.shape_cast %104 : vector<8x128xf32> to vector<1x8x128xf32>
      %cst_84 = arith.constant dense<0.000000e+00> : vector<1xf32>
      %106 = vector.multi_reduction <add>, %105, %cst_84 [1, 2] : vector<1x8x128xf32> to vector<1xf32>
      %107 = vector.shape_cast %106 : vector<1xf32> to vector<1x1x1xf32>
      %108 = vector.extract %107[0, 0, 0] : f32 from vector<1x1x1xf32>
      %cst_85 = arith.constant 9.765625E-4 : f32
      %109 = arith.mulf %108, %cst_85 : f32
      %110 = arith.mulf %103, %103 : vector<8x128xf32>
      %111 = vector.shape_cast %110 : vector<8x128xf32> to vector<1x8x128xf32>
      %cst_86 = arith.constant dense<0.000000e+00> : vector<1xf32>
      %112 = vector.multi_reduction <add>, %111, %cst_86 [1, 2] : vector<1x8x128xf32> to vector<1xf32>
      %113 = vector.shape_cast %112 : vector<1xf32> to vector<1x1x1xf32>
      %114 = vector.extract %113[0, 0, 0] : f32 from vector<1x1x1xf32>
      %cst_87 = arith.constant 9.765625E-4 : f32
      %115 = arith.mulf %114, %cst_87 : f32
      %c0_88 = arith.constant 0 : index
      %c0_89 = arith.constant 0 : index
      %116 = vector.load %arg10[%c0_88, %c0_89] : memref<8x128xf32, #tpu.memory_space<vmem>>, vector<8x128xf32>
      %117 = arith.truncf %116 : vector<8x128xf32> to vector<8x128xbf16>
      %c0_90 = arith.constant 0 : index
      %c0_91 = arith.constant 0 : index
      %118 = vector.load %arg4[%c0_90, %c0_91] : memref<128x256xbf16, #tpu.memory_space<vmem>>, vector<128x256xbf16>
      %cst_92 = arith.constant dense<0.000000e+00> : vector<8x256xf32>
      %119 = tpu.matmul %117, %118, %cst_92 {dimension_numbers = #tpu.dot_dimension_numbers<[1], [0], [0], [1], [0, 0, 1, 1], [], []>} : vector<8x128xbf16>, vector<128x256xbf16>, vector<8x256xf32> -> vector<8x256xf32>
      %c0_93 = arith.constant 0 : index
      %c0_94 = arith.constant 0 : index
      %120 = vector.load %arg7[%c0_93, %c0_94] : memref<1x256xf32, #tpu.memory_space<vmem>>, vector<1x256xf32>
      %121 = vector.broadcast %120 : vector<1x256xf32> to vector<8x256xf32>
      %122 = arith.addf %119, %121 : vector<8x256xf32>
      %c0_95 = arith.constant 0 : index
      %c0_96 = arith.constant 0 : index
      %123 = vector.load %arg11[%c0_95, %c0_96] : memref<8x256xf32, #tpu.memory_space<vmem>>, vector<8x256xf32>
      %124 = arith.subf %122, %123 : vector<8x256xf32>
      %125 = arith.mulf %124, %124 : vector<8x256xf32>
      %126 = vector.shape_cast %125 : vector<8x256xf32> to vector<1x8x256xf32>
      %cst_97 = arith.constant dense<0.000000e+00> : vector<1xf32>
      %127 = vector.multi_reduction <add>, %126, %cst_97 [1, 2] : vector<1x8x256xf32> to vector<1xf32>
      %128 = vector.shape_cast %127 : vector<1xf32> to vector<1x1x1xf32>
      %129 = vector.extract %128[0, 0, 0] : f32 from vector<1x1x1xf32>
      %cst_98 = arith.constant 4.8828125E-4 : f32
      %130 = arith.mulf %129, %cst_98 : f32
      %131 = tpu.concatenate %101, %103 in 1 : vector<8x128xf32>, vector<8x128xf32> -> vector<8x256xf32>
      %132 = arith.truncf %131 : vector<8x256xf32> to vector<8x256xbf16>
      %c0_99 = arith.constant 0 : index
      %c0_100 = arith.constant 0 : index
      %133 = vector.load %arg8[%c0_99, %c0_100] : memref<256x256xbf16, #tpu.memory_space<vmem>>, vector<256x256xbf16>
      %cst_101 = arith.constant dense<0.000000e+00> : vector<8x256xf32>
      %134 = tpu.matmul %132, %133, %cst_101 {dimension_numbers = #tpu.dot_dimension_numbers<[1], [0], [0], [1], [0, 0, 1, 1], [], []>} : vector<8x256xbf16>, vector<256x256xbf16>, vector<8x256xf32> -> vector<8x256xf32>
      %135 = arith.addf %84, %124 : vector<8x256xf32>
      %cst_102 = arith.constant 9.765625E-4 : f32
      %136 = vector.broadcast %cst_102 : f32 to vector<8x256xf32>
      %137 = arith.mulf %136, %135 : vector<8x256xf32>
      %138 = arith.subf %134, %137 : vector<8x256xf32>
      %c0_103 = arith.constant 0 : index
      %c0_104 = arith.constant 0 : index
      %139 = vector.load %arg11[%c0_103, %c0_104] : memref<8x256xf32, #tpu.memory_space<vmem>>, vector<8x256xf32>
      %cst_105 = arith.constant 1.000000e-03 : f32
      %140 = vector.broadcast %cst_105 : f32 to vector<8x256xf32>
      %141 = arith.mulf %140, %138 : vector<8x256xf32>
      %142 = arith.subf %139, %141 : vector<8x256xf32>
      %c0_106 = arith.constant 0 : index
      %c0_107 = arith.constant 0 : index
      %143 = vector.load %arg11[%c0_106, %c0_107] : memref<8x256xf32, #tpu.memory_space<vmem>>, vector<8x256xf32>
      tpu.vector_store %arg11[%c0_106, %c0_107], %142 {strides = array<i32>} : memref<8x256xf32, #tpu.memory_space<vmem>>, vector<8x256xf32>,
      %144 = arith.truncf %124 : vector<8x256xf32> to vector<8x256xbf16>
      %c0_108 = arith.constant 0 : index
      %c0_109 = arith.constant 0 : index
      %145 = vector.load %arg9[%c0_108, %c0_109] : memref<256x128xbf16, #tpu.memory_space<vmem>>, vector<256x128xbf16>
      %cst_110 = arith.constant dense<0.000000e+00> : vector<8x128xf32>
      %146 = tpu.matmul %144, %145, %cst_110 {dimension_numbers = #tpu.dot_dimension_numbers<[1], [0], [0], [1], [0, 0, 1, 1], [], []>} : vector<8x256xbf16>, vector<256x128xbf16>, vector<8x128xf32> -> vector<8x128xf32>
      %cst_111 = arith.constant 0.001953125 : f32
      %147 = vector.broadcast %cst_111 : f32 to vector<8x128xf32>
      %148 = arith.mulf %147, %103 : vector<8x128xf32>
      %149 = arith.subf %146, %148 : vector<8x128xf32>
      %c0_112 = arith.constant 0 : index
      %c0_113 = arith.constant 0 : index
      %150 = vector.load %arg10[%c0_112, %c0_113] : memref<8x128xf32, #tpu.memory_space<vmem>>, vector<8x128xf32>
      %cst_114 = arith.constant 1.000000e-03 : f32
      %151 = vector.broadcast %cst_114 : f32 to vector<8x128xf32>
      %152 = arith.mulf %151, %149 : vector<8x128xf32>
      %153 = arith.subf %150, %152 : vector<8x128xf32>
      %c0_115 = arith.constant 0 : index
      %c0_116 = arith.constant 0 : index
      %154 = vector.load %arg10[%c0_115, %c0_116] : memref<8x128xf32, #tpu.memory_space<vmem>>, vector<8x128xf32>
      tpu.vector_store %arg10[%c0_115, %c0_116], %153 {strides = array<i32>} : memref<8x128xf32, #tpu.memory_space<vmem>>, vector<8x128xf32>,
      %cst_117 = arith.constant 0.000000e+00 : f32
      %155 = arith.addf %cst_117, %90 : f32
      %156 = arith.addf %155, %109 : f32
      %157 = arith.addf %156, %115 : f32
      %158 = arith.addf %157, %130 : f32
      %cst_118 = arith.constant 1.000000e-01 : f32
      %159 = arith.cmpf olt, %158, %cst_118 : f32
      %160 = arith.extui %159 : i1 to i32
      %c0_119 = arith.constant 0 : index
      %161 = memref.load %arg12[%c0_119] : memref<1xi32, #tpu.memory_space<smem>>
      memref.store %160, %arg12[%c0_119] : memref<1xi32, #tpu.memory_space<smem>>
    } else {
    }
    %c0_59 = arith.constant 0 : index
    %73 = memref.load %arg12[%c0_59] : memref<1xi32, #tpu.memory_space<smem>>
    %c0_i32_60 = arith.constant 0 : i32
    %74 = arith.cmpi eq, %73, %c0_i32_60 : i32
    %75 = arith.extui %74 : i1 to i32
    %c0_i32_61 = arith.constant 0 : i32
    %76 = arith.cmpi ne, %75, %c0_i32_61 : i32
    scf.if %76 {
      %c0_62 = arith.constant 0 : index
      %c0_63 = arith.constant 0 : index
      %77 = vector.load %arg1[%c0_62, %c0_63] : memref<8x128xbf16, #tpu.memory_space<vmem>>, vector<8x128xbf16>
      %c0_64 = arith.constant 0 : index
      %c0_65 = arith.constant 0 : index
      %78 = vector.load %arg2[%c0_64, %c0_65] : memref<128x256xbf16, #tpu.memory_space<vmem>>, vector<128x256xbf16>
      %cst_66 = arith.constant dense<0.000000e+00> : vector<8x256xf32>
      %79 = tpu.matmul %77, %78, %cst_66 {dimension_numbers = #tpu.dot_dimension_numbers<[1], [0], [0], [1], [0, 0, 1, 1], [], []>} : vector<8x128xbf16>, vector<128x256xbf16>, vector<8x256xf32> -> vector<8x256xf32>
      %c0_67 = arith.constant 0 : index
      %c0_68 = arith.constant 0 : index
      %80 = vector.load %arg5[%c0_67, %c0_68] : memref<1x256xf32, #tpu.memory_space<vmem>>, vector<1x256xf32>
      %81 = vector.broadcast %80 : vector<1x256xf32> to vector<8x256xf32>
      %82 = arith.addf %79, %81 : vector<8x256xf32>
      %c0_69 = arith.constant 0 : index
      %c0_70 = arith.constant 0 : index
      %83 = vector.load %arg11[%c0_69, %c0_70] : memref<8x256xf32, #tpu.memory_space<vmem>>, vector<8x256xf32>
      %84 = arith.subf %82, %83 : vector<8x256xf32>
      %c0_71 = arith.constant 0 : index
      %c0_72 = arith.constant 0 : index
      %85 = vector.load %arg11[%c0_71, %c0_72] : memref<8x256xf32, #tpu.memory_space<vmem>>, vector<8x256xf32>
      %86 = arith.truncf %85 : vector<8x256xf32> to vector<8x256xbf16>
      %c0_73 = arith.constant 0 : index
      %c0_74 = arith.constant 0 : index
      %87 = vector.load %arg3[%c0_73, %c0_74] : memref<256x256xbf16, #tpu.memory_space<vmem>>, vector<256x256xbf16>
      %cst_75 = arith.constant dense<0.000000e+00> : vector<8x256xf32>
      %88 = tpu.matmul %86, %87, %cst_75 {dimension_numbers = #tpu.dot_dimension_numbers<[1], [0], [0], [1], [0, 0, 1, 1], [], []>} : vector<8x256xbf16>, vector<256x256xbf16>, vector<8x256xf32> -> vector<8x256xf32>
      %c0_76 = arith.constant 0 : index
      %c0_77 = arith.constant 0 : index
      %89 = vector.load %arg6[%c0_76, %c0_77] : memref<1x256xf32, #tpu.memory_space<vmem>>, vector<1x256xf32>
      %90 = vector.broadcast %89 : vector<1x256xf32> to vector<8x256xf32>
      %91 = arith.addf %88, %90 : vector<8x256xf32>
      %92 = vector.extract_strided_slice %91 {offsets = [0, 0], sizes = [8, 128], strides = [1, 1]} : vector<8x256xf32> to vector<8x128xf32>
      %93 = vector.extract_strided_slice %91 {offsets = [0, 128], sizes = [8, 128], strides = [1, 1]} : vector<8x256xf32> to vector<8x128xf32>
      %c0_78 = arith.constant 0 : index
      %c0_79 = arith.constant 0 : index
      %94 = vector.load %arg0[%c0_78, %c0_79] : memref<8x128xf32, #tpu.memory_space<vmem>>, vector<8x128xf32>
      %95 = arith.subf %93, %94 : vector<8x128xf32>
      %c0_80 = arith.constant 0 : index
      %c0_81 = arith.constant 0 : index
      %96 = vector.load %arg10[%c0_80, %c0_81] : memref<8x128xf32, #tpu.memory_space<vmem>>, vector<8x128xf32>
      %97 = arith.subf %92, %96 : vector<8x128xf32>
      %c0_82 = arith.constant 0 : index
      %c0_83 = arith.constant 0 : index
      %98 = vector.load %arg10[%c0_82, %c0_83] : memref<8x128xf32, #tpu.memory_space<vmem>>, vector<8x128xf32>
      %99 = arith.truncf %98 : vector<8x128xf32> to vector<8x128xbf16>
      %c0_84 = arith.constant 0 : index
      %c0_85 = arith.constant 0 : index
      %100 = vector.load %arg4[%c0_84, %c0_85] : memref<128x256xbf16, #tpu.memory_space<vmem>>, vector<128x256xbf16>
      %cst_86 = arith.constant dense<0.000000e+00> : vector<8x256xf32>
      %101 = tpu.matmul %99, %100, %cst_86 {dimension_numbers = #tpu.dot_dimension_numbers<[1], [0], [0], [1], [0, 0, 1, 1], [], []>} : vector<8x128xbf16>, vector<128x256xbf16>, vector<8x256xf32> -> vector<8x256xf32>
      %c0_87 = arith.constant 0 : index
      %c0_88 = arith.constant 0 : index
      %102 = vector.load %arg7[%c0_87, %c0_88] : memref<1x256xf32, #tpu.memory_space<vmem>>, vector<1x256xf32>
      %103 = vector.broadcast %102 : vector<1x256xf32> to vector<8x256xf32>
      %104 = arith.addf %101, %103 : vector<8x256xf32>
      %c0_89 = arith.constant 0 : index
      %c0_90 = arith.constant 0 : index
      %105 = vector.load %arg11[%c0_89, %c0_90] : memref<8x256xf32, #tpu.memory_space<vmem>>, vector<8x256xf32>
      %106 = arith.subf %104, %105 : vector<8x256xf32>
      %107 = tpu.concatenate %95, %97 in 1 : vector<8x128xf32>, vector<8x128xf32> -> vector<8x256xf32>
      %108 = arith.truncf %107 : vector<8x256xf32> to vector<8x256xbf16>
      %c0_91 = arith.constant 0 : index
      %c0_92 = arith.constant 0 : index
      %109 = vector.load %arg8[%c0_91, %c0_92] : memref<256x256xbf16, #tpu.memory_space<vmem>>, vector<256x256xbf16>
      %cst_93 = arith.constant dense<0.000000e+00> : vector<8x256xf32>
      %110 = tpu.matmul %108, %109, %cst_93 {dimension_numbers = #tpu.dot_dimension_numbers<[1], [0], [0], [1], [0, 0, 1, 1], [], []>} : vector<8x256xbf16>, vector<256x256xbf16>, vector<8x256xf32> -> vector<8x256xf32>
      %111 = arith.addf %84, %106 : vector<8x256xf32>
      %cst_94 = arith.constant 9.765625E-4 : f32
      %112 = vector.broadcast %cst_94 : f32 to vector<8x256xf32>
      %113 = arith.mulf %112, %111 : vector<8x256xf32>
      %114 = arith.subf %110, %113 : vector<8x256xf32>
      %c0_95 = arith.constant 0 : index
      %c0_96 = arith.constant 0 : index
      %115 = vector.load %arg11[%c0_95, %c0_96] : memref<8x256xf32, #tpu.memory_space<vmem>>, vector<8x256xf32>
      %cst_97 = arith.constant 1.000000e-03 : f32
      %116 = vector.broadcast %cst_97 : f32 to vector<8x256xf32>
      %117 = arith.mulf %116, %114 : vector<8x256xf32>
      %118 = arith.subf %115, %117 : vector<8x256xf32>
      %c0_98 = arith.constant 0 : index
      %c0_99 = arith.constant 0 : index
      %119 = vector.load %arg11[%c0_98, %c0_99] : memref<8x256xf32, #tpu.memory_space<vmem>>, vector<8x256xf32>
      tpu.vector_store %arg11[%c0_98, %c0_99], %118 {strides = array<i32>} : memref<8x256xf32, #tpu.memory_space<vmem>>, vector<8x256xf32>,
      %120 = arith.truncf %106 : vector<8x256xf32> to vector<8x256xbf16>
      %c0_100 = arith.constant 0 : index
      %c0_101 = arith.constant 0 : index
      %121 = vector.load %arg9[%c0_100, %c0_101] : memref<256x128xbf16, #tpu.memory_space<vmem>>, vector<256x128xbf16>
      %cst_102 = arith.constant dense<0.000000e+00> : vector<8x128xf32>
      %122 = tpu.matmul %120, %121, %cst_102 {dimension_numbers = #tpu.dot_dimension_numbers<[1], [0], [0], [1], [0, 0, 1, 1], [], []>} : vector<8x256xbf16>, vector<256x128xbf16>, vector<8x128xf32> -> vector<8x128xf32>
      %cst_103 = arith.constant 0.001953125 : f32
      %123 = vector.broadcast %cst_103 : f32 to vector<8x128xf32>
      %124 = arith.mulf %123, %97 : vector<8x128xf32>
      %125 = arith.subf %122, %124 : vector<8x128xf32>
      %c0_104 = arith.constant 0 : index
      %c0_105 = arith.constant 0 : index
      %126 = vector.load %arg10[%c0_104, %c0_105] : memref<8x128xf32, #tpu.memory_space<vmem>>, vector<8x128xf32>
      %cst_106 = arith.constant 1.000000e-03 : f32
      %127 = vector.broadcast %cst_106 : f32 to vector<8x128xf32>
      %128 = arith.mulf %127, %125 : vector<8x128xf32>
      %129 = arith.subf %126, %128 : vector<8x128xf32>
      %c0_107 = arith.constant 0 : index
      %c0_108 = arith.constant 0 : index
      %130 = vector.load %arg10[%c0_107, %c0_108] : memref<8x128xf32, #tpu.memory_space<vmem>>, vector<8x128xf32>
      tpu.vector_store %arg10[%c0_107, %c0_108], %129 {strides = array<i32>} : memref<8x128xf32, #tpu.memory_space<vmem>>, vector<8x128xf32>,
    } else {
    }
    return
  }
}

</mosaic_0001>

<bundles_post_ra>
// kernel: tpu_custom_call.1
= control target key start
LH: loop header
LB: loop body
LE: loop exit
PB: predicated region body
PF: predicated region fallthrough
CT: control target
= control target key end

     0   :  { %15 = vsyncpa [#allocation5], 0  ;;  %s5055_s0 = inlined_call_operand.hbm [shape: f32[8,128], index: 0, kind: input, shape index: {}]   ;;  %s5056_s1 = inlined_call_operand.hbm [shape: bf16[8,128], index: 1, kind: input, shape index: {}]   ;;  %s5057_s2 = inlined_call_operand.hbm [shape: bf16[128,256], index: 2, kind: input, shape index: {}]   ;;  %s5058_s3 = inlined_call_operand.hbm [shape: bf16[256,256], index: 3, kind: input, shape index: {}]   ;;  %s5059_s4 = inlined_call_operand.hbm [shape: bf16[128,256], index: 4, kind: input, shape index: {}]   ;;  %s5060_s5 = inlined_call_operand.vmem [shape: f32[1,256], index: 5, kind: input, shape index: {}]   ;;  %s5061_s6 = inlined_call_operand.vmem [shape: f32[1,256], index: 6, kind: input, shape index: {}]   ;;  %s5062_s7 = inlined_call_operand.vmem [shape: f32[1,256], index: 7, kind: input, shape index: {}]   ;;  %s5063_s8 = inlined_call_operand.hbm [shape: bf16[256,256], index: 8, kind: input, shape index: {}]   ;;  %s5064_s9 = inlined_call_operand.hbm [shape: bf16[256,128], index: 9, kind: input, shape index: {}]   ;;  %s5065_s10 = inlined_call_operand.hbm [shape: f32[8,128], index: 10, kind: output, shape index: {}]  }
   0x1   :  { %16 = vsyncpa [#allocation8], 0 }
   0x2   :  { %17 = vsyncpa [#allocation11], 0 }
   0x3   :  { %18 = vsyncpa [#allocation14], 0  ;;  %s36_s15 = sshll.u32 %s5056_s1, 4  ;;  %s37_s15 = int_to_ptr.hbm [resolvable:$true] %s36_s15 }
   0x4   :  { %19 = vsyncpa [#allocation6], 0  ;;  %s4849_s16 = smov [#allocation7]   ;;  %s59_s20 = sshll.u32 %s5058_s3, 4  ;;  %s60_s20 = int_to_ptr.hbm [resolvable:$true] %s59_s20 }
   0x5   :  { %s38_s17 = sshll.u32 %s4849_s16, 4  ;;  %s4850_s21 = smov [#allocation10]   ;;  %s39_s17 = int_to_ptr.vmem [resolvable:$true] %s38_s17 }
   0x6   :  { %41 = dma.hbm_to_vmem [thread:$0]  %s37_s15, 64, %s39_s17, [#allocation8]  }
   0x7   :  { %s61_s22 = sshll.u32 %s4850_s21, 4  ;;  %s91_s25 = sshll.u32 %s5063_s8, 4  ;;  %s62_s22 = int_to_ptr.vmem [resolvable:$true] %s61_s22  ;;  %s92_s25 = int_to_ptr.hbm [resolvable:$true] %s91_s25 }
   0x8   :  { %s4851_s1 = smov 128   ;;  %s4852_s26 = smov 8  }
   0x9   :  { %67 = dma.hbm_to_vmem [thread:$0]  %s60_s20, 4096, %s62_s22, [#allocation11], %s4851_s1, %s4851_s1, %s4852_s26  }
   0xa   :  { %s25_s29 = sshll.u32 %s5055_s0, 4  ;;  %s4853_s30 = smov [#allocation13]   ;;  %s26_s29 = int_to_ptr.hbm [resolvable:$true] %s25_s29 }
   0xb   :  { %s93_s11 = sshll.u32 %s4853_s30, 4  ;;  %s4854_s3 = smov [#allocation4]   ;;  %s94_s11 = int_to_ptr.vmem [resolvable:$true] %s93_s11 }
   0xc   :  { %99 = dma.hbm_to_vmem [thread:$0]  %s92_s25, 4096, %s94_s11, [#allocation14], %s4851_s1, %s4851_s1, %s4852_s26  }
   0xd   :  { %s27_s12 = sshll.u32 %s4854_s3, 4  ;;  %s46_s8 = sshll.u32 %s5057_s2, 4  ;;  %s28_s12 = int_to_ptr.vmem [resolvable:$true] %s27_s12  ;;  %s47_s8 = int_to_ptr.hbm [resolvable:$true] %s46_s8 }
   0xe   :  { %30 = dma.hbm_to_vmem [thread:$0]  %s26_s29, 128, %s28_s12, [#allocation5]  }
   0xf   :  { %s72_s17 = sshll.u32 %s5059_s4, 4  ;;  %s4855_s18 = smov [#allocation9]   ;;  %s73_s17 = int_to_ptr.hbm [resolvable:$true] %s72_s17 }
  0x10   :  { %s48_s0 = sshll.u32 %s4855_s18, 4  ;;  %s4856_s19 = smov [#allocation12]   ;;  %s49_s0 = int_to_ptr.vmem [resolvable:$true] %s48_s0 }
  0x11   :  { %54 = dma.hbm_to_vmem [thread:$0]  %s47_s8, 2048, %s49_s0, [#allocation8], %s4851_s1, %s4851_s1, %s4852_s26  }
  0x12   :  { %s74_s20 = sshll.u32 %s4856_s19, 4  ;;  %s104_s23 = sshll.u32 %s5064_s9, 4  ;;  %s75_s20 = int_to_ptr.vmem [resolvable:$true] %s74_s20  ;;  %s105_s23 = int_to_ptr.hbm [resolvable:$true] %s104_s23 }
  0x13   :  { %80 = dma.hbm_to_vmem [thread:$0]  %s73_s17, 2048, %s75_s20, [#allocation11], %s4851_s1, %s4851_s1, %s4852_s26  }
  0x14   :  { %s4857_s2 = smov [#allocation15]   ;;  %s4858_s25 = smov 64  }
  0x15   :  { %s106_s24 = sshll.u32 %s4857_s2, 4  ;;  %s4859_s27 = smov 4   ;;  %s107_s24 = int_to_ptr.vmem [resolvable:$true] %s106_s24 }
  0x16   :  { %112 = dma.hbm_to_vmem [thread:$0]  %s105_s23, 2048, %s107_s24, [#allocation14], %s4858_s25, %s4858_s25, %s4859_s27  }
  0x17   :  { %4839 = dma.done.wait [#allocation5], 128  }
  0x18   :  { %4840 = vsyncadd [#allocation5], 4294967168 }
  0x19   :  { %4841 = dma.done.wait [#allocation8], 2112  }
  0x1a   :  { %4842 = vsyncadd [#allocation8], 4294965184 }
  0x1b   :  { %4843 = dma.done.wait [#allocation11], 6144  }
  0x1c   :  { %4844 = vsyncadd [#allocation11], 4294961152 }
  0x1d   :  { %4845 = dma.done.wait [#allocation14], 6144  }
  0x1e   :  { %4846 = vsyncadd [#allocation14], 4294961152  ;;  %v3076_v0 = vld [vmem:[#allocation9 + $0x70] sm:$0xf]  ;;  %v4315_v1 = vld [vmem:[#allocation9 + $0x74] sm:$0xf0] }
  0x1f   :  { %v4314_v2 = vld [vmem:[#allocation9 + $0x74] sm:$0xf]  ;;  %v3077_v3 = vor.u32 %v4315_v1, %v3076_v0  ;;  %v3078_v4 = vld [vmem:[#allocation9 + $0x78] sm:$0xf0]  ;;  %v3068_v5 = vld [vmem:[#allocation9 + $0x60] sm:$0xf] }
  0x20   :  { %v4313_v6 = vld [vmem:[#allocation9 + $0x64] sm:$0xf0]  ;;  %v3081_v7 = vor.u32 %v4314_v2, %v3078_v4  ;;  %v4312_v8 = vld [vmem:[#allocation9 + $0x64] sm:$0xf]  ;;  %v3070_v9 = vld [vmem:[#allocation9 + $0x68] sm:$0xf0] }
  0x21   :  { %246 = vmatpush.bf16.msra.mxu0 %v3077_v3  ;;  %v3069_v10 = vor.u32 %v4313_v6, %v3068_v5  ;;  %v3073_v11 = vor.u32 %v4312_v8, %v3070_v9  ;;  %v3060_v12 = vld [vmem:[#allocation9 + $0x50] sm:$0xf]  ;;  %v4311_v13 = vld [vmem:[#allocation9 + $0x54] sm:$0xf0]  ;;  %v4310_v14 = vld [vmem:[#allocation9 + $0x54] sm:$0xf] }
  0x22   :  { %259 = vmatpush.bf16.msra.mxu1 %v3081_v7  ;;  %v3062_v15 = vld [vmem:[#allocation9 + $0x58] sm:$0xf0]  ;;  %v3061_v16 = vor.u32 %v4311_v13, %v3060_v12  ;;  %v3052_v18 = vld [vmem:[#allocation9 + $0x40] sm:$0xf]  ;;  %v4309_v19 = vld [vmem:[#allocation9 + $0x44] sm:$0xf0] }
  0x23   :  { %v3065_v17 = vor.u32 %v4310_v14, %v3062_v15  ;;  %v4308_v20 = vld [vmem:[#allocation9 + $0x44] sm:$0xf]  ;;  %v3054_v21 = vld [vmem:[#allocation9 + $0x48] sm:$0xf0]  ;;  %v3044_v22 = vld [vmem:[#allocation9 + $0x30] sm:$0xf]  ;;  %v3053_v24 = vor.u32 %v4309_v19, %v3052_v18 }
  0x24   :  { %v4307_v23 = vld [vmem:[#allocation9 + $0x34] sm:$0xf0]  ;;  %v4306_v25 = vld [vmem:[#allocation9 + $0x34] sm:$0xf]  ;;  %v3112_v26 = vld [vmem:[#allocation10 + $0x70] sm:$0xf]  ;;  %v3057_v29 = vor.u32 %v4308_v20, %v3054_v21 }
  0x25   :  { %247 = vmatpush.bf16.msra.mxu0 %v3069_v10  ;;  %v4323_v27 = vld [vmem:[#allocation10 + $0x74] sm:$0xf0]  ;;  %v3144_v28 = vld [vmem:[#allocation10 + $0xf0] sm:$0xf]  ;;  %v3108_v32 = vld [vmem:[#allocation10 + $0x60] sm:$0xf]  ;;  %v3045_v39 = vor.u32 %v4307_v23, %v3044_v22 }
  0x26   :  { %260 = vmatpush.bf16.msra.mxu1 %v3073_v11  ;;  %v3113_v30 = vor.u32 %v4323_v27, %v3112_v26  ;;  %v4331_v31 = vld [vmem:[#allocation10 + $0xf4] sm:$0xf0]  ;;  %v4322_v33 = vld [vmem:[#allocation10 + $0x64] sm:$0xf0]  ;;  %v3046_v34 = vld [vmem:[#allocation9 + $0x38] sm:$0xf0] }
  0x27   :  { %v3145_v35 = vor.u32 %v4331_v31, %v3144_v28  ;;  %v3140_v36 = vld [vmem:[#allocation10 + $0xe0] sm:$0xf]  ;;  %v4330_v37 = vld [vmem:[#allocation10 + $0xe4] sm:$0xf0]  ;;  %v3109_v38 = vor.u32 %v4322_v33, %v3108_v32  ;;  %v3104_v42 = vld [vmem:[#allocation10 + $0x50] sm:$0xf]  ;;  %v3049_v44 = vor.u32 %v4306_v25, %v3046_v34 }
  0x28   :  { %408 = vmatpush.bf16.msra.mxu2 %v3113_v30  ;;  %v3036_v40 = vld [vmem:[#allocation9 + $0x20] sm:$0xf]  ;;  %v3141_v41 = vor.u32 %v4330_v37, %v3140_v36  ;;  %v4321_v43 = vld [vmem:[#allocation10 + $0x54] sm:$0xf0]  ;;  %v4305_v45 = vld [vmem:[#allocation9 + $0x24] sm:$0xf0] }
  0x29   :  { %248 = vmatpush.bf16.msra.mxu0 %v3061_v16  ;;  %421 = vmatpush.bf16.msra.mxu3 %v3145_v35  ;;  %v3136_v46 = vld [vmem:[#allocation10 + $0xd0] sm:$0xf]  ;;  %v4329_v47 = vld [vmem:[#allocation10 + $0xd4] sm:$0xf0]  ;;  %v4304_v48 = vld [vmem:[#allocation9 + $0x24] sm:$0xf]  ;;  %v3105_v50 = vor.u32 %v4321_v43, %v3104_v42  ;;  %v3037_v51 = vor.u32 %v4305_v45, %v3036_v40 }
  0x2a   :  { %261 = vmatpush.bf16.msra.mxu1 %v3065_v17  ;;  %v3038_v49 = vld [vmem:[#allocation9 + $0x28] sm:$0xf0]  ;;  %v3028_v52 = vld [vmem:[#allocation9 + $0x10] sm:$0xf]  ;;  %v3137_v53 = vor.u32 %v4329_v47, %v3136_v46  ;;  %v3100_v54 = vld [vmem:[#allocation10 + $0x40] sm:$0xf] }
  0x2b   :  { %v4320_v55 = vld [vmem:[#allocation10 + $0x44] sm:$0xf0]  ;;  %v3041_v56 = vor.u32 %v4304_v48, %v3038_v49  ;;  %v4303_v57 = vld [vmem:[#allocation9 + $0x14] sm:$0xf0]  ;;  %v3132_v58 = vld [vmem:[#allocation10 + $0xc0] sm:$0xf] }
  0x2c   :  { %409 = vmatpush.bf16.msra.mxu2 %v3109_v38  ;;  %v4328_v59 = vld [vmem:[#allocation10 + $0xc4] sm:$0xf0]  ;;  %v4302_v60 = vld [vmem:[#allocation9 + $0x14] sm:$0xf]  ;;  %v3030_v61 = vld [vmem:[#allocation9 + $0x18] sm:$0xf0]  ;;  %v3101_v63 = vor.u32 %v4320_v55, %v3100_v54  ;;  %v3029_v0 = vor.u32 %v4303_v57, %v3028_v52 }
  0x2d   :  { %249 = vmatpush.bf16.msra.mxu0 %v3053_v24  ;;  %422 = vmatpush.bf16.msra.mxu3 %v3141_v41  ;;  %v3020_v62 = vld [vmem:[#allocation9] sm:$0xf]  ;;  %v4301_v1 = vld [vmem:[#allocation9 + $0x4] sm:$0xf0]  ;;  %v3133_v2 = vor.u32 %v4328_v59, %v3132_v58  ;;  %v3096_v3 = vld [vmem:[#allocation10 + $0x30] sm:$0xf]  ;;  %v3033_v5 = vor.u32 %v4302_v60, %v3030_v61 }
  0x2e   :  { %262 = vmatpush.bf16.msra.mxu1 %v3057_v29  ;;  %v4319_v4 = vld [vmem:[#allocation10 + $0x34] sm:$0xf0]  ;;  %v4300_v6 = vld [vmem:[#allocation9 + $0x4] sm:$0xf]  ;;  %v3128_v7 = vld [vmem:[#allocation10 + $0xb0] sm:$0xf]  ;;  %v3021_v16 = vor.u32 %v4301_v1, %v3020_v62 }
  0x2f   :  { %v4327_v8 = vld [vmem:[#allocation10 + $0xb4] sm:$0xf0]  ;;  %v3022_v9 = vld [vmem:[#allocation9 + $0x8] sm:$0xf0]  ;;  %v3176_v10 = vld [vmem:[#allocation10 + $0x74] sm:$0xf]  ;;  %v3097_v14 = vor.u32 %v4319_v4, %v3096_v3 }
  0x30   :  { %410 = vmatpush.bf16.msra.mxu2 %v3105_v50  ;;  %v4339_v11 = vld [vmem:[#allocation10 + $0x78] sm:$0xf0]  ;;  %v3208_v12 = vld [vmem:[#allocation10 + $0xf4] sm:$0xf]  ;;  %v3092_v15 = vld [vmem:[#allocation10 + $0x20] sm:$0xf]  ;;  %v3129_v17 = vor.u32 %v4327_v8, %v3128_v7  ;;  %v3025_v19 = vor.u32 %v4300_v6, %v3022_v9 }
  0x31   :  { %250 = vmatpush.bf16.msra.mxu0 %v3045_v39  ;;  %423 = vmatpush.bf16.msra.mxu3 %v3137_v53  ;;  %v4347_v13 = vld [vmem:[#allocation10 + $0xf8] sm:$0xf0]  ;;  %v4318_v18 = vld [vmem:[#allocation10 + $0x24] sm:$0xf0]  ;;  %v3177_v20 = vor.u32 %v4339_v11, %v3176_v10  ;;  %v3124_v21 = vld [vmem:[#allocation10 + $0xa0] sm:$0xf] }
  0x32   :  { %263 = vmatpush.bf16.msra.mxu1 %v3049_v44  ;;  %v4326_v22 = vld [vmem:[#allocation10 + $0xa4] sm:$0xf0]  ;;  %v3209_v23 = vor.u32 %v4347_v13, %v3208_v12  ;;  %v3172_v24 = vld [vmem:[#allocation10 + $0x64] sm:$0xf]  ;;  %v4338_v25 = vld [vmem:[#allocation10 + $0x68] sm:$0xf0]  ;;  %v3093_v28 = vor.u32 %v4318_v18, %v3092_v15 }
  0x33   :  { %v3204_v26 = vld [vmem:[#allocation10 + $0xe4] sm:$0xf]  ;;  %v4346_v27 = vld [vmem:[#allocation10 + $0xe8] sm:$0xf0]  ;;  %v143_v29 = vld [vmem:[#allocation7] sm:$0xf]  ;;  %v3125_v30 = vor.u32 %v4326_v22, %v3124_v21  ;;  %v3173_v33 = vor.u32 %v4338_v25, %v3172_v24 }
  0x34   :  { %411 = vmatpush.bf16.msra.mxu2 %v3101_v63  ;;  %v3088_v31 = vld [vmem:[#allocation10 + $0x10] sm:$0xf]  ;;  %v4317_v32 = vld [vmem:[#allocation10 + $0x14] sm:$0xf0]  ;;  %v3205_v36 = vor.u32 %v4346_v27, %v3204_v26  ;;  %v3168_v37 = vld [vmem:[#allocation10 + $0x54] sm:$0xf] }
  0x35   :  { %251 = vmatpush.bf16.msra.mxu0 %v3037_v51  ;;  %424 = vmatpush.bf16.msra.mxu3 %v3133_v2  ;;  %v3120_v34 = vld [vmem:[#allocation10 + $0x90] sm:$0xf]  ;;  %v4325_v35 = vld [vmem:[#allocation10 + $0x94] sm:$0xf0]  ;;  %v4337_v38 = vld [vmem:[#allocation10 + $0x58] sm:$0xf0]  ;;  %v3089_v41 = vor.u32 %v4317_v32, %v3088_v31 }
  0x36   :  { %264 = vmatpush.bf16.msra.mxu1 %v3041_v56  ;;  %v3200_v39 = vld [vmem:[#allocation10 + $0xd4] sm:$0xf]  ;;  %v4345_v40 = vld [vmem:[#allocation10 + $0xd8] sm:$0xf0]  ;;  %v3121_v42 = vor.u32 %v4325_v35, %v3120_v34  ;;  %v3169_v43 = vor.u32 %v4337_v38, %v3168_v37  ;;  %v3164_v45 = vld [vmem:[#allocation10 + $0x44] sm:$0xf] }
  0x37   :  { %v3201_v44 = vor.u32 %v4345_v40, %v3200_v39  ;;  %v4336_v46 = vld [vmem:[#allocation10 + $0x48] sm:$0xf0]  ;;  %v3196_v47 = vld [vmem:[#allocation10 + $0xc4] sm:$0xf]  ;;  %v3160_v51 = vld [vmem:[#allocation10 + $0x34] sm:$0xf] }
  0x38   :  { %412 = vmatpush.bf16.msra.mxu2 %v3097_v14  ;;  %v4344_v48 = vld [vmem:[#allocation10 + $0xc8] sm:$0xf0]  ;;  %v3165_v49 = vor.u32 %v4336_v46, %v3164_v45  ;;  %v4335_v52 = vld [vmem:[#allocation10 + $0x38] sm:$0xf0]  ;;  %v3192_v53 = vld [vmem:[#allocation10 + $0xb4] sm:$0xf] }
  0x39   :  { %252 = vmatpush.bf16.msra.mxu0 %v3029_v0  ;;  %425 = vmatpush.bf16.msra.mxu3 %v3129_v17  ;;  %v3197_v50 = vor.u32 %v4344_v48, %v3196_v47  ;;  %v4343_v54 = vld [vmem:[#allocation10 + $0xb8] sm:$0xf0]  ;;  %v3161_v55 = vor.u32 %v4335_v52, %v3160_v51  ;;  %v3156_v57 = vld [vmem:[#allocation10 + $0x24] sm:$0xf]  ;;  %v4334_v58 = vld [vmem:[#allocation10 + $0x28] sm:$0xf0] }
  0x3a   :  { %265 = vmatpush.bf16.msra.mxu1 %v3033_v5  ;;  %v3193_v56 = vor.u32 %v4343_v54, %v3192_v53  ;;  %v3188_v59 = vld [vmem:[#allocation10 + $0xa4] sm:$0xf]  ;;  %v3157_v60 = vor.u32 %v4334_v58, %v3156_v57  ;;  %v4342_v61 = vld [vmem:[#allocation10 + $0xa8] sm:$0xf0]  ;;  %v3152_v63 = vld [vmem:[#allocation10 + $0x14] sm:$0xf] }
  0x3b   :  { %v3189_v62 = vor.u32 %v4342_v61, %v3188_v59  ;;  %v4333_v0 = vld [vmem:[#allocation10 + $0x18] sm:$0xf0]  ;;  %v3184_v1 = vld [vmem:[#allocation10 + $0x94] sm:$0xf]  ;;  %v3084_v5 = vld [vmem:[#allocation10] sm:$0xf] }
  0x3c   :  { %413 = vmatpush.bf16.msra.mxu2 %v3093_v28  ;;  %v3153_v2 = vor.u32 %v4333_v0, %v3152_v63  ;;  %v4341_v3 = vld [vmem:[#allocation10 + $0x98] sm:$0xf0]  ;;  %v4316_v6 = vld [vmem:[#allocation10 + $0x4] sm:$0xf0]  ;;  %v3116_v8 = vld [vmem:[#allocation10 + $0x80] sm:$0xf] }
  0x3d   :  { %253 = vmatpush.bf16.msra.mxu0 %v3021_v16  ;;  %426 = vmatpush.bf16.msra.mxu3 %v3125_v30  ;;  %v3185_v4 = vor.u32 %v4341_v3, %v3184_v1  ;;  %v3085_v7 = vor.u32 %v4316_v6, %v3084_v5  ;;  %v4324_v9 = vld [vmem:[#allocation10 + $0x84] sm:$0xf0]  ;;  %v3148_v10 = vld [vmem:[#allocation10 + $0x4] sm:$0xf]  ;;  %v4332_v12 = vld [vmem:[#allocation10 + $0x8] sm:$0xf0] }
  0x3e   :  { %266 = vmatpush.bf16.msra.mxu1 %v3025_v19  ;;  %v3117_v11 = vor.u32 %v4324_v9, %v3116_v8  ;;  %v3180_v13 = vld [vmem:[#allocation10 + $0x84] sm:$0xf]  ;;  %v4340_v14 = vld [vmem:[#allocation10 + $0x88] sm:$0xf0]  ;;  %v3149_v15 = vor.u32 %v4332_v12, %v3148_v10  ;;  %v3332_v17 = vld [vmem:[#allocation13 + $0x70] sm:$0xf] }
  0x3f   :  { %v3181_v16 = vor.u32 %v4340_v14, %v3180_v13  ;;  %v4379_v18 = vld [vmem:[#allocation13 + $0x74] sm:$0xf0]  ;;  %v4378_v19 = vld [vmem:[#allocation13 + $0x74] sm:$0xf]  ;;  %v3334_v21 = vld [vmem:[#allocation13 + $0x78] sm:$0xf0] }
  0x40   :  { %254 = vmatmul.bf16.vlgmr.msra.gmra.mxu0 %v143_v29  ;;  %414 = vmatpush.bf16.msra.mxu2 %v3089_v41  ;;  %v3268_v22 = vld [vmem:[#allocation12 + $0x70] sm:$0xf]  ;;  %v3337_v24 = vor.u32 %v4378_v19, %v3334_v21  ;;  %v4362_v26 = vld [vmem:[#allocation12 + $0x74] sm:$0xf]  ;;  %v3270_v27 = vld [vmem:[#allocation12 + $0x78] sm:$0xf0] }
  0x41   :  { %571 = vmatpush.bf16.msrb.mxu0 %v3177_v20  ;;  %267 = vmatmul.bf16.vlgmr.msra.gmra.mxu1 %v143_v29  ;;  %v3333_v20 = vor.u32 %v4379_v18, %v3332_v17  ;;  %v3324_v28 = vld [vmem:[#allocation13 + $0x60] sm:$0xf]  ;;  %v3273_v29 = vor.u32 %v4362_v26, %v3270_v27  ;;  %v4377_v30 = vld [vmem:[#allocation13 + $0x64] sm:$0xf0]  ;;  %v4376_v31 = vld [vmem:[#allocation13 + $0x64] sm:$0xf] }
  0x42   :  { %584 = vmatpush.bf16.msrb.mxu1 %v3209_v23  ;;  %427 = vmatpush.bf16.msra.mxu3 %v3121_v42  ;;  %v4363_v23 = vld [vmem:[#allocation12 + $0x74] sm:$0xf0]  ;;  %v3326_v32 = vld [vmem:[#allocation13 + $0x68] sm:$0xf0]  ;;  %v3260_v35 = vld [vmem:[#allocation12 + $0x60] sm:$0xf] }
  0x43   :  { %v3269_v25 = vor.u32 %v4363_v23, %v3268_v22  ;;  %v3329_v34 = vor.u32 %v4376_v31, %v3326_v32  ;;  %v4360_v37 = vld [vmem:[#allocation12 + $0x64] sm:$0xf]  ;;  %v3262_v39 = vld [vmem:[#allocation12 + $0x68] sm:$0xf0]  ;;  %v3316_v40 = vld [vmem:[#allocation13 + $0x50] sm:$0xf] }
  0x44   :  { %415 = vmatpush.bf16.msra.mxu2 %v3085_v7  ;;  %v4375_v41 = vld [vmem:[#allocation13 + $0x54] sm:$0xf0]  ;;  %v3265_v42 = vor.u32 %v4360_v37, %v3262_v39  ;;  %v3252_v45 = vld [vmem:[#allocation12 + $0x50] sm:$0xf]  ;;  %v4358_v48 = vld [vmem:[#allocation12 + $0x54] sm:$0xf] }
  0x45   :  { %572 = vmatpush.bf16.msrb.mxu0 %v3173_v33  ;;  %v3325_v33 = vor.u32 %v4377_v30, %v3324_v28  ;;  %v3317_v46 = vor.u32 %v4375_v41, %v3316_v40  ;;  %v4359_v47 = vld [vmem:[#allocation12 + $0x54] sm:$0xf0]  ;;  %v3308_v52 = vld [vmem:[#allocation13 + $0x40] sm:$0xf]  ;;  %v4373_v53 = vld [vmem:[#allocation13 + $0x44] sm:$0xf0] }
  0x46   :  { %585 = vmatpush.bf16.msrb.mxu1 %v3205_v36  ;;  %428 = vmatpush.bf16.msra.mxu3 %v3117_v11  ;;  %v4361_v36 = vld [vmem:[#allocation12 + $0x64] sm:$0xf0]  ;;  %v3253_v51 = vor.u32 %v4359_v47, %v3252_v45  ;;  %v4372_v54 = vld [vmem:[#allocation13 + $0x44] sm:$0xf]  ;;  %v3244_v57 = vld [vmem:[#allocation12 + $0x40] sm:$0xf]  ;;  %v3309_v61 = vor.u32 %v4373_v53, %v3308_v52 }
  0x47   :  { %v3261_v38 = vor.u32 %v4361_v36, %v3260_v35  ;;  %v4357_v58 = vld [vmem:[#allocation12 + $0x44] sm:$0xf0]  ;;  %v4356_v59 = vld [vmem:[#allocation12 + $0x44] sm:$0xf]  ;;  %v3300_v0 = vld [vmem:[#allocation13 + $0x30] sm:$0xf] }
  0x48   :  { %714 = vmatpush.bf16.msrb.mxu2 %v3269_v25  ;;  %v3245_v63 = vor.u32 %v4357_v58, %v3244_v57  ;;  %v4371_v1 = vld [vmem:[#allocation13 + $0x34] sm:$0xf0]  ;;  %v4370_v3 = vld [vmem:[#allocation13 + $0x34] sm:$0xf]  ;;  %v160_v7 = vld [vmem:[%s5060_s5] sm:$0x3] }
  0x49   :  { %573 = vmatpush.bf16.msrb.mxu0 %v3169_v43  ;;  %v4374_v43 = vld [vmem:[#allocation13 + $0x54] sm:$0xf]  ;;  %v3301_v5 = vor.u32 %v4371_v1, %v3300_v0  ;;  %v162_v8 = vperm.slane %v160_v7, 0  ;;  %v163_v9 = vperm.slane %v160_v7, 1  ;;  %v3236_v18 = vld [vmem:[#allocation12 + $0x30] sm:$0xf] }
  0x4a   :  { %586 = vmatpush.bf16.msrb.mxu1 %v3201_v44  ;;  %727 = vmatpush.bf16.msrb.mxu3 %v3273_v29  ;;  %v3318_v44 = vld [vmem:[#allocation13 + $0x58] sm:$0xf0]  ;;  %v4355_v19 = vld [vmem:[#allocation12 + $0x34] sm:$0xf0]  ;;  %v3292_v23 = vld [vmem:[#allocation13 + $0x20] sm:$0xf] }
  0x4b   :  { %v3237_v21 = vor.u32 %v4355_v19, %v3236_v18  ;;  %v3238_v22 = vld [vmem:[#allocation12 + $0x38] sm:$0xf0]  ;;  %v4368_v27 = vld [vmem:[#allocation13 + $0x24] sm:$0xf]  ;;  %v3294_v28 = vld [vmem:[#allocation13 + $0x28] sm:$0xf0] }
  0x4c   :  { %715 = vmatpush.bf16.msrb.mxu2 %v3261_v38  ;;  %v3297_v29 = vor.u32 %v4368_v27, %v3294_v28  ;;  %v3228_v30 = vld [vmem:[#allocation12 + $0x20] sm:$0xf]  ;;  %v4353_v31 = vld [vmem:[#allocation12 + $0x24] sm:$0xf0]  ;;  %v3284_v35 = vld [vmem:[#allocation13 + $0x10] sm:$0xf] }
  0x4d   :  { %574 = vmatpush.bf16.msrb.mxu0 %v3165_v49  ;;  %v3254_v49 = vld [vmem:[#allocation12 + $0x58] sm:$0xf0]  ;;  %v3229_v32 = vor.u32 %v4353_v31, %v3228_v30  ;;  %v4367_v37 = vld [vmem:[#allocation13 + $0x14] sm:$0xf0]  ;;  %v4366_v38 = vld [vmem:[#allocation13 + $0x14] sm:$0xf] }
  0x4e   :  { %587 = vmatpush.bf16.msrb.mxu1 %v3197_v50  ;;  %v3321_v50 = vor.u32 %v4374_v43, %v3318_v44  ;;  %728 = vmatpush.bf16.msrb.mxu3 %v3265_v42  ;;  %v3286_v39 = vld [vmem:[#allocation13 + $0x18] sm:$0xf0]  ;;  %v3285_v40 = vor.u32 %v4367_v37, %v3284_v35  ;;  %v3220_v42 = vld [vmem:[#allocation12 + $0x10] sm:$0xf]  ;;  %v4351_v43 = vld [vmem:[#allocation12 + $0x14] sm:$0xf0] }
  0x4f   :  { %v3289_v41 = vor.u32 %v4366_v38, %v3286_v39  ;;  %v4350_v44 = vld [vmem:[#allocation12 + $0x14] sm:$0xf]  ;;  %v3221_v45 = vor.u32 %v4351_v43, %v3220_v42  ;;  %v3276_v47 = vld [vmem:[#allocation13] sm:$0xf]  ;;  %v3214_v58 = vld [vmem:[#allocation12 + $0x8] sm:$0xf0] }
  0x50   :  { %716 = vmatpush.bf16.msrb.mxu2 %v3253_v51  ;;  %v3278_v51 = vld [vmem:[#allocation13 + $0x8] sm:$0xf0]  ;;  %v4646_v0 = vld [vmem:[%s5061_s6 + $0x1] ss:$0 sm:$0xff]  ;;  %v4382_v27 = vld [vmem:[#allocation15 + $0x10] sm:$0xff] }
  0x51   :  { %575 = vmatpush.bf16.msrb.mxu0 %v3161_v55  ;;  %v3257_v55 = vor.u32 %v4358_v48, %v3254_v49  ;;  %v4365_v49 = vld [vmem:[#allocation13 + $0x4] sm:$0xf0]  ;;  %v4390_v28 = vld [vmem:[#allocation15 + $0x50] sm:$0xff]  ;;  %v4380_v31 = vld [vmem:[#allocation15] sm:$0xff] }
  0x52   :  { %588 = vmatpush.bf16.msrb.mxu1 %v3193_v56  ;;  %v3310_v56 = vld [vmem:[#allocation13 + $0x48] sm:$0xf0]  ;;  %v3277_v52 = vor.u32 %v4365_v49, %v3276_v47  ;;  %v628_v42 = vld [vmem:[%s5062_s7] sm:$0x3] }
  0x53   :  { %729 = vmatpush.bf16.msrb.mxu3 %v3257_v55  ;;  %v4349_v55 = vld [vmem:[#allocation12 + $0x4] sm:$0xf0]  ;;  %v630_v43 = vperm.slane %v628_v42, 0 }
  0x54   :  { %717 = vmatpush.bf16.msrb.mxu2 %v3245_v63  ;;  %v4394_v63 = vld [vmem:[#allocation15 + $0x70] sm:$0xff]  ;;  %v4389_v30 = vld [vmem:[#allocation15 + $0x48] sm:$0xff] }
  0x55   :  { %576 = vmatpush.bf16.msrb.mxu0 %v3157_v60  ;;  %v3246_v60 = vld [vmem:[#allocation12 + $0x48] sm:$0xf0] }
  0x56   :  { %589 = vmatpush.bf16.msrb.mxu1 %v3189_v62  ;;  %v3313_v62 = vor.u32 %v4372_v54, %v3310_v56  ;;  %v3212_v54 = vld [vmem:[#allocation12] sm:$0xf]  ;;  %v4348_v56 = vld [vmem:[#allocation12 + $0x4] sm:$0xf] }
  0x57   :  { %v3213_v57 = vor.u32 %v4349_v55, %v3212_v54 }
  0x58   :  { %718 = vmatpush.bf16.msrb.mxu2 %v3237_v21  ;;  %v4385_v21 = vld [vmem:[#allocation15 + $0x28] sm:$0xff] }
  0x59   :  { %577 = vmatpush.bf16.msrb.mxu0 %v3153_v2  ;;  %v3249_v2 = vor.u32 %v4356_v59, %v3246_v60  ;;  %v3217_v59 = vor.u32 %v4348_v56, %v3214_v58  ;;  %v4387_v60 = vld [vmem:[#allocation15 + $0x38] sm:$0xff] }
  0x5a   :  { %590 = vmatpush.bf16.msrb.mxu1 %v3185_v4  ;;  %v3302_v4 = vld [vmem:[#allocation13 + $0x38] sm:$0xf0] }
  0x5b   :  { %v3305_v6 = vor.u32 %v4370_v3, %v3302_v4  ;;  %730 = vmatpush.bf16.msrb.mxu3 %v3249_v2  ;;  %v597_v4 = vld [vmem:[#allocation4] sm:$0xff] }
  0x5c   :  { %719 = vmatpush.bf16.msrb.mxu2 %v3229_v32  ;;  %v4388_v32 = vld [vmem:[#allocation15 + $0x40] sm:$0xff] }
  0x5d   :  { %578 = vmatpush.bf16.msrb.mxu0 %v3149_v15 }
  0x5e   :  { %591 = vmatpush.bf16.msrb.mxu1 %v3181_v16 }
  0x60   :  { %720 = vmatpush.bf16.msrb.mxu2 %v3221_v45 }
  0x61   :  { %852 = vmatpush.bf16.msra.mxu0 %v3333_v20  ;;  %v4354_v20 = vld [vmem:[#allocation12 + $0x34] sm:$0xf] }
  0x62   :  { %865 = vmatpush.bf16.msra.mxu1 %v3337_v24  ;;  %v4369_v24 = vld [vmem:[#allocation13 + $0x24] sm:$0xf0]  ;;  %v3241_v25 = vor.u32 %v4354_v20, %v3238_v22 }
  0x63   :  { %v3293_v26 = vor.u32 %v4369_v24, %v3292_v23  ;;  %v4393_v22 = vld [vmem:[#allocation15 + $0x68] sm:$0xff]  ;;  %v4384_v23 = vld [vmem:[#allocation15 + $0x20] sm:$0xff] }
  0x64   :  { %731 = vmatpush.bf16.msrb.mxu3 %v3241_v25  ;;  %721 = vmatpush.bf16.msrb.mxu2 %v3213_v57  ;;  %v4392_v24 = vld [vmem:[#allocation15 + $0x60] sm:$0xff]  ;;  %v4383_v25 = vld [vmem:[#allocation15 + $0x18] sm:$0xff] }
  0x65   :  { %853 = vmatpush.bf16.msra.mxu0 %v3325_v33  ;;  %v4352_v33 = vld [vmem:[#allocation12 + $0x24] sm:$0xf] }
  0x66   :  { %866 = vmatpush.bf16.msra.mxu1 %v3329_v34  ;;  %v3230_v34 = vld [vmem:[#allocation12 + $0x28] sm:$0xf0] }
  0x67   :  { %v3233_v36 = vor.u32 %v4352_v33, %v3230_v34 }
  0x69   :  { %854 = vmatpush.bf16.msra.mxu0 %v3317_v46  ;;  %732 = vmatpush.bf16.msrb.mxu3 %v3233_v36  ;;  %v3222_v46 = vld [vmem:[#allocation12 + $0x18] sm:$0xf0] }
  0x6a   :  { %867 = vmatpush.bf16.msra.mxu1 %v3321_v50  ;;  %v3225_v48 = vor.u32 %v4350_v44, %v3222_v46  ;;  %v4364_v50 = vld [vmem:[#allocation13 + $0x4] sm:$0xf]  ;;  %v631_v44 = vperm.slane %v628_v42, 1 }
  0x6b   :  { %v3281_v53 = vor.u32 %v4364_v50, %v3278_v51 }
  0x6d   :  { %855 = vmatpush.bf16.msra.mxu0 %v3309_v61  ;;  %733 = vmatpush.bf16.msrb.mxu3 %v3225_v48  ;;  %v4395_v61 = vld [vmem:[#allocation15 + $0x78] sm:$0xff] }
  0x6e   :  { %868 = vmatpush.bf16.msra.mxu1 %v3313_v62  ;;  %v4386_v62 = vld [vmem:[#allocation15 + $0x30] sm:$0xff] }
  0x71   :  { %856 = vmatpush.bf16.msra.mxu0 %v3301_v5  ;;  %734 = vmatpush.bf16.msrb.mxu3 %v3217_v59  ;;  %v4645_v5 = vld [vmem:[%s5061_s6] ss:$0 sm:$0xff] }
  0x72   :  { %869 = vmatpush.bf16.msra.mxu1 %v3305_v6 }
  0x75   :  { %857 = vmatpush.bf16.msra.mxu0 %v3293_v26  ;;  %v4391_v26 = vld [vmem:[#allocation15 + $0x58] sm:$0xff] }
  0x76   :  { %870 = vmatpush.bf16.msra.mxu1 %v3297_v29  ;;  %v4381_v29 = vld [vmem:[#allocation15 + $0x8] sm:$0xff] }
  0x79   :  { %858 = vmatpush.bf16.msra.mxu0 %v3285_v40 }
  0x7a   :  { %871 = vmatpush.bf16.msra.mxu1 %v3289_v41 }
  0x7d   :  { %859 = vmatpush.bf16.msra.mxu0 %v3277_v52 }
  0x7e   :  { %872 = vmatpush.bf16.msra.mxu1 %v3281_v53 }
  0xbd   :  { %v255_v10 = vpop.f32.mrf.mxu0 }
  0xbe   :  { %v4940_v11 = vadd.f32 %v255_v10, %v162_v8  ;;  %v268_v12 = vpop.f32.mrf.mxu1 }
  0xbf   :  { %v4942_v13 = vadd.f32 %v268_v12, %v163_v9 }
  0xc0   :  { %v274_v14 = vpack.c.bf16 %v4940_v11, %v4940_v11 }
  0xc1   :  { %v275_v15 = vpack.c.bf16 %v4942_v13, %v4942_v13 }
  0xc2   :  { %416 = vmatmul.bf16.vlgmr.msra.gmra.mxu2 %v274_v14  ;;  %579 = vmatmul.bf16.vlgmr.msrb.gmra.mxu0 %v274_v14 }
  0xc3   :  { %429 = vmatmul.bf16.vlgmr.msra.gmra.mxu3 %v275_v15  ;;  %592 = vmatmul.bf16.vlgmr.msrb.gmra.mxu1 %v275_v15 }
  0xc4   :  { %1018 = vmatpush.bf16.msra.mxu2 %v4387_v60  ;;  %1031 = vmatpush.bf16.msra.mxu3 %v4395_v61 }
  0xc5   :  { %v257_v16 = vpop.f32.mrf.mxu0 }
  0xc6   :  { %v270_v17 = vpop.f32.mrf.mxu1 }
  0xc8   :  { %1019 = vmatpush.bf16.msra.mxu2 %v4386_v62  ;;  %1032 = vmatpush.bf16.msra.mxu3 %v4394_v63 }
  0xcc   :  { %1020 = vmatpush.bf16.msra.mxu2 %v4385_v21  ;;  %1033 = vmatpush.bf16.msra.mxu3 %v4393_v22 }
  0xd0   :  { %1021 = vmatpush.bf16.msra.mxu2 %v4384_v23  ;;  %1034 = vmatpush.bf16.msra.mxu3 %v4392_v24 }
  0xd4   :  { %1022 = vmatpush.bf16.msra.mxu2 %v4383_v25  ;;  %1035 = vmatpush.bf16.msra.mxu3 %v4391_v26 }
  0xd8   :  { %1023 = vmatpush.bf16.msra.mxu2 %v4382_v27  ;;  %1036 = vmatpush.bf16.msra.mxu3 %v4390_v28 }
  0xdc   :  { %1024 = vmatpush.bf16.msra.mxu2 %v4381_v29  ;;  %1037 = vmatpush.bf16.msra.mxu3 %v4389_v30 }
  0xe0   :  { %1025 = vmatpush.bf16.msra.mxu2 %v4380_v31  ;;  %1038 = vmatpush.bf16.msra.mxu3 %v4388_v32 }
 0x13f   :  { %v580_v1 = vpop.f32.mrf.mxu0 }
 0x140   :  { %v581_v2 = vadd.f32 %v4646_v0, %v580_v1  ;;  %v593_v3 = vpop.f32.mrf.mxu1 }
 0x142   :  { %v594_v6 = vadd.f32 %v593_v3, %v581_v2 }
 0x144   :  { %v598_v7 = vsub.f32 %v594_v6, %v597_v4 }
 0x145   :  { %v417_v8 = vpop.f32.mrf.mxu2 }
 0x146   :  { %v418_v9 = vadd.f32 %v4645_v5, %v417_v8  ;;  %v430_v10 = vpop.f32.mrf.mxu3  ;;  %v755_v12 = vpack.c.bf16 %v598_v7, %v598_v7  ;;  %v599_v14 = vmul.f32 %v598_v7, %v598_v7 }
 0x147   :  { %v582_v15 = vpop.f32.mrf.mxu0 }
 0x148   :  { %v4954_v16 = vadd.f32 %v430_v10, %v418_v9  ;;  %v595_v17 = vpop.f32.mrf.mxu1  ;;  %860 = vmatmul.bf16.vlgmr.msra.gmra.mxu0 %v755_v12  ;;  %873 = vmatmul.bf16.vlgmr.msra.gmra.mxu1 %v755_v12 }
 0x149   :  { %600 = vadd.xlane.f32.xlu0 %v599_v14 }
 0x14a   :  { %v611_v18 = vpack.c.bf16 %v4954_v16, %v4954_v16 }
 0x14c   :  { %722 = vmatmul.bf16.vlgmr.msrb.gmra.mxu2 %v611_v18  ;;  %735 = vmatmul.bf16.vlgmr.msrb.gmra.mxu3 %v611_v18 }
 0x14d   :  { %v419_v19 = vpop.f32.mrf.mxu2 }
 0x14e   :  { %v432_v20 = vpop.f32.mrf.mxu3 }
 0x1bc   :  { %v601_v33 = vpop.xlane.xlu0 %600 }
 0x1bd   :  { %v602_v34 = vrot.slane %v601_v33, 4 }
 0x1bf   :  { %v603_v35 = vadd.f32 %v602_v34, %v601_v33 }
 0x1c1   :  { %v604_v36 = vrot.slane %v603_v35, 2 }
 0x1c3   :  { %v605_v37 = vadd.f32 %v604_v36, %v603_v35 }
 0x1c5   :  { %v861_v38 = vpop.f32.mrf.mxu0  ;;  %v874_v39 = vpop.f32.mrf.mxu1  ;;  %v606_v40 = vrot.slane %v605_v37, 1 }
 0x1c7   :  { %v607_v41 = vadd.f32 %v606_v40, %v605_v37 }
 0x1c9   :  { %4620 = vpush %v607_v41 }
 0x1cd   :  { %v863_v45 = vpop.f32.mrf.mxu0  ;;  %v876_v46 = vpop.f32.mrf.mxu1 }
 0x1cf   :  { %v723_v47 = vpop.f32.mrf.mxu2  ;;  %v736_v48 = vpop.f32.mrf.mxu3 }
 0x1d0   :  { %v724_v49 = vadd.f32 %v723_v47, %v630_v43  ;;  %v737_v50 = vadd.f32 %v736_v48, %v631_v44 }
 0x1d2   :  { %v740_v51 = vsub.f32 %v724_v49, %v4940_v11  ;;  %v741_v52 = vsub.f32 %v737_v50, %v4942_v13 }
 0x1d4   :  { %v878_v53 = vmul.f32 0.0009765625, %v740_v51  ;;  %v888_v54 = vpack.c.bf16 %v740_v51, %v740_v51  ;;  %v879_v55 = vmul.f32 0.0009765625, %v741_v52  ;;  %v889_v56 = vpack.c.bf16 %v741_v52, %v741_v52 }
 0x1d5   :  { %v742_v57 = vmul.f32 %v740_v51, %v740_v51  ;;  %v743_v58 = vmul.f32 %v741_v52, %v741_v52 }
 0x1d6   :  { %v880_v59 = vsub.f32 %v861_v38, %v878_v53  ;;  %v881_v60 = vsub.f32 %v874_v39, %v879_v55  ;;  %1026 = vmatmul.bf16.vlgmr.msra.gmra.mxu2 %v888_v54  ;;  %1039 = vmatmul.bf16.vlgmr.msra.gmra.mxu3 %v889_v56 }
 0x1d7   :  { %v725_v61 = vpop.f32.mrf.mxu2  ;;  %v738_v62 = vpop.f32.mrf.mxu3  ;;  %v744_v63 = vadd.f32 %v743_v58, %v742_v57 }
 0x1d8   :  { %v882_v0 = vmul.f32 0.001, %v880_v59  ;;  %v883_v1 = vmul.f32 0.001, %v881_v60 }
 0x1d9   :  { %745 = vadd.xlane.f32.xlu0 %v744_v63 }
 0x1da   :  { %v884_v2 = vsub.f32 %v4940_v11, %v882_v0  ;;  %v885_v3 = vsub.f32 %v4942_v13, %v883_v1 }
 0x1dc   :  { %886 = vst [vmem:[#allocation2] sm:$0xff] %v884_v2 }
 0x1dd   :  { %887 = vst [vmem:[#allocation2 + $0x8] sm:$0xff] %v885_v3 }
 0x1fa   :  { %s4621_s3 = spop %4620 }
 0x1fb   :  { %s609_s12 = smul.f32 0.0009765625, %s4621_s3 }
 0x24c   :  { %v746_v4 = vpop.xlane.xlu0 %745 }
 0x24d   :  { %v747_v5 = vrot.slane %v746_v4, 4 }
 0x24f   :  { %v748_v6 = vadd.f32 %v747_v5, %v746_v4 }
 0x251   :  { %v749_v7 = vrot.slane %v748_v6, 2 }
 0x253   :  { %v750_v8 = vadd.f32 %v749_v7, %v748_v6 }
 0x255   :  { %v751_v9 = vrot.slane %v750_v8, 1 }
 0x257   :  { %v752_v10 = vadd.f32 %v751_v9, %v750_v8 }
 0x259   :  { %4622 = vpush %v752_v10  ;;  %v1027_v12 = vpop.f32.mrf.mxu2  ;;  %v1040_v14 = vpop.f32.mrf.mxu3 }
 0x25a   :  { %v1041_v15 = vadd.f32 %v1040_v14, %v1027_v12 }
 0x25c   :  { %v1045_v17 = vmul.f32 0.001, %v1041_v15 }
 0x25e   :  { %v1046_v18 = vsub.f32 %v4954_v16, %v1045_v17 }
 0x260   :  { %1047 = vst [vmem:[#allocation16] sm:$0xff] %v1046_v18 }
 0x261   :  { %v1029_v11 = vpop.f32.mrf.mxu2  ;;  %v1042_v19 = vpop.f32.mrf.mxu3 }
 0x28a   :  { %s4623_s13 = spop %4622 }
 0x28b   :  { %s754_s14 = smul.f32 0.00048828125, %s4623_s13 }
 0x28d   :  { %s1049_s8 = sadd.f32 %s754_s14, %s609_s12 }
 0x28f   :  { %p1050_p0 = scmp.lt.f32.partialorder %s1049_s8, 0.1 }
 0x291   :  { %s1051_s15 = scalar_select %p1050_p0, 1, 0 }
 0x292   :  { %1057 = sbr.rel (%p1050_p0) target bundleno = 1058 (0x422), region = 73 }
 0x293   :  { %1052 = sst [smem:[#allocation3]] %s1051_s15 }
 0x297   :  { %v3461_v13 = vld [vmem:[#allocation9 + $0x70] sm:$0xf]  ;;  %v4411_v20 = vld [vmem:[#allocation9 + $0x74] sm:$0xf0]  ;;  %v4410_v21 = vld [vmem:[#allocation9 + $0x74] sm:$0xf] }
 0x298   :  { %v3462_v22 = vor.u32 %v4411_v20, %v3461_v13  ;;  %v3463_v23 = vld [vmem:[#allocation9 + $0x78] sm:$0xf0]  ;;  %v3525_v24 = vld [vmem:[#allocation10 + $0x70] sm:$0xf]  ;;  %v4427_v25 = vld [vmem:[#allocation10 + $0x74] sm:$0xf0] }
 0x299   :  { %v3466_v16 = vor.u32 %v4410_v21, %v3463_v23  ;;  %v3526_v26 = vor.u32 %v4427_v25, %v3525_v24  ;;  %v3589_v27 = vld [vmem:[#allocation10 + $0xf0] sm:$0xf]  ;;  %v4443_v28 = vld [vmem:[#allocation10 + $0xf4] sm:$0xf0]  ;;  %v3453_v29 = vld [vmem:[#allocation9 + $0x60] sm:$0xf] }
 0x29a   :  { %1161 = vmatpush.bf16.msra.mxu0 %v3462_v22  ;;  %v3590_v30 = vor.u32 %v4443_v28, %v3589_v27  ;;  %v4409_v31 = vld [vmem:[#allocation9 + $0x64] sm:$0xf0]  ;;  %v4408_v32 = vld [vmem:[#allocation9 + $0x64] sm:$0xf]  ;;  %v3455_v33 = vld [vmem:[#allocation9 + $0x68] sm:$0xf0] }
 0x29b   :  { %1174 = vmatpush.bf16.msra.mxu1 %v3466_v16  ;;  %1404 = vmatpush.bf16.msra.mxu2 %v3526_v26  ;;  %v3454_v34 = vor.u32 %v4409_v31, %v3453_v29  ;;  %v3458_v35 = vor.u32 %v4408_v32, %v3455_v33  ;;  %v3517_v36 = vld [vmem:[#allocation10 + $0x60] sm:$0xf]  ;;  %v4425_v37 = vld [vmem:[#allocation10 + $0x64] sm:$0xf0]  ;;  %v3445_v41 = vld [vmem:[#allocation9 + $0x50] sm:$0xf] }
 0x29c   :  { %v3581_v38 = vld [vmem:[#allocation10 + $0xe0] sm:$0xf]  ;;  %1417 = vmatpush.bf16.msra.mxu3 %v3590_v30  ;;  %v3518_v39 = vor.u32 %v4425_v37, %v3517_v36  ;;  %v4441_v40 = vld [vmem:[#allocation10 + $0xe4] sm:$0xf0]  ;;  %v4407_v42 = vld [vmem:[#allocation9 + $0x54] sm:$0xf0] }
 0x29d   :  { %v3582_v43 = vor.u32 %v4441_v40, %v3581_v38  ;;  %v4406_v44 = vld [vmem:[#allocation9 + $0x54] sm:$0xf]  ;;  %v3447_v45 = vld [vmem:[#allocation9 + $0x58] sm:$0xf0]  ;;  %v3509_v46 = vld [vmem:[#allocation10 + $0x50] sm:$0xf]  ;;  %v3446_v47 = vor.u32 %v4407_v42, %v3445_v41 }
 0x29e   :  { %1162 = vmatpush.bf16.msra.mxu0 %v3454_v34  ;;  %v4423_v48 = vld [vmem:[#allocation10 + $0x54] sm:$0xf0]  ;;  %v3573_v49 = vld [vmem:[#allocation10 + $0xd0] sm:$0xf]  ;;  %v3450_v51 = vor.u32 %v4406_v44, %v3447_v45  ;;  %v3437_v53 = vld [vmem:[#allocation9 + $0x40] sm:$0xf] }
 0x29f   :  { %v4439_v50 = vld [vmem:[#allocation10 + $0xd4] sm:$0xf0]  ;;  %1175 = vmatpush.bf16.msra.mxu1 %v3458_v35  ;;  %1405 = vmatpush.bf16.msra.mxu2 %v3518_v39  ;;  %v3510_v52 = vor.u32 %v4423_v48, %v3509_v46  ;;  %v4405_v54 = vld [vmem:[#allocation9 + $0x44] sm:$0xf0]  ;;  %v4404_v55 = vld [vmem:[#allocation9 + $0x44] sm:$0xf] }
 0x2a0   :  { %1418 = vmatpush.bf16.msra.mxu3 %v3582_v43  ;;  %v3574_v56 = vor.u32 %v4439_v50, %v3573_v49  ;;  %v3439_v57 = vld [vmem:[#allocation9 + $0x48] sm:$0xf0]  ;;  %v3501_v58 = vld [vmem:[#allocation10 + $0x40] sm:$0xf]  ;;  %v4421_v59 = vld [vmem:[#allocation10 + $0x44] sm:$0xf0]  ;;  %v3438_v62 = vor.u32 %v4405_v54, %v3437_v53 }
 0x2a1   :  { %v3565_v60 = vld [vmem:[#allocation10 + $0xc0] sm:$0xf]  ;;  %v4437_v61 = vld [vmem:[#allocation10 + $0xc4] sm:$0xf0]  ;;  %v3442_v63 = vor.u32 %v4404_v55, %v3439_v57  ;;  %v3502_v0 = vor.u32 %v4421_v59, %v3501_v58  ;;  %v3429_v1 = vld [vmem:[#allocation9 + $0x30] sm:$0xf] }
 0x2a2   :  { %1163 = vmatpush.bf16.msra.mxu0 %v3446_v47  ;;  %v4403_v2 = vld [vmem:[#allocation9 + $0x34] sm:$0xf0]  ;;  %v4402_v3 = vld [vmem:[#allocation9 + $0x34] sm:$0xf]  ;;  %v3566_v4 = vor.u32 %v4437_v61, %v3565_v60  ;;  %v3431_v5 = vld [vmem:[#allocation9 + $0x38] sm:$0xf0] }
 0x2a3   :  { %1176 = vmatpush.bf16.msra.mxu1 %v3450_v51  ;;  %1406 = vmatpush.bf16.msra.mxu2 %v3510_v52  ;;  %v3493_v6 = vld [vmem:[#allocation10 + $0x30] sm:$0xf]  ;;  %v4419_v7 = vld [vmem:[#allocation10 + $0x34] sm:$0xf0]  ;;  %v3430_v10 = vor.u32 %v4403_v2, %v3429_v1  ;;  %v3434_v12 = vor.u32 %v4402_v3, %v3431_v5  ;;  %v3421_v15 = vld [vmem:[#allocation9 + $0x20] sm:$0xf] }
 0x2a4   :  { %1419 = vmatpush.bf16.msra.mxu3 %v3574_v56  ;;  %v3557_v8 = vld [vmem:[#allocation10 + $0xb0] sm:$0xf]  ;;  %v4435_v9 = vld [vmem:[#allocation10 + $0xb4] sm:$0xf0]  ;;  %v3494_v14 = vor.u32 %v4419_v7, %v3493_v6  ;;  %v4401_v17 = vld [vmem:[#allocation9 + $0x24] sm:$0xf0] }
 0x2a5   :  { %v4400_v18 = vld [vmem:[#allocation9 + $0x24] sm:$0xf]  ;;  %v3558_v11 = vor.u32 %v4435_v9, %v3557_v8  ;;  %v3423_v19 = vld [vmem:[#allocation9 + $0x28] sm:$0xf0]  ;;  %v3485_v13 = vld [vmem:[#allocation10 + $0x20] sm:$0xf]  ;;  %v3422_v23 = vor.u32 %v4401_v17, %v3421_v15 }
 0x2a6   :  { %1164 = vmatpush.bf16.msra.mxu0 %v3438_v62  ;;  %v4417_v20 = vld [vmem:[#allocation10 + $0x24] sm:$0xf0]  ;;  %v3549_v21 = vld [vmem:[#allocation10 + $0xa0] sm:$0xf]  ;;  %v3426_v24 = vor.u32 %v4400_v18, %v3423_v19  ;;  %v3413_v16 = vld [vmem:[#allocation9 + $0x10] sm:$0xf] }
 0x2a7   :  { %1177 = vmatpush.bf16.msra.mxu1 %v3442_v63  ;;  %1407 = vmatpush.bf16.msra.mxu2 %v3502_v0  ;;  %v4433_v22 = vld [vmem:[#allocation10 + $0xa4] sm:$0xf0]  ;;  %v3486_v25 = vor.u32 %v4417_v20, %v3485_v13  ;;  %v4399_v26 = vld [vmem:[#allocation9 + $0x14] sm:$0xf0]  ;;  %v4398_v27 = vld [vmem:[#allocation9 + $0x14] sm:$0xf] }
 0x2a8   :  { %1420 = vmatpush.bf16.msra.mxu3 %v3566_v4  ;;  %v3550_v28 = vor.u32 %v4433_v22, %v3549_v21  ;;  %v3415_v29 = vld [vmem:[#allocation9 + $0x18] sm:$0xf0]  ;;  %v3477_v30 = vld [vmem:[#allocation10 + $0x10] sm:$0xf]  ;;  %v4415_v31 = vld [vmem:[#allocation10 + $0x14] sm:$0xf0]  ;;  %v3414_v34 = vor.u32 %v4399_v26, %v3413_v16 }
 0x2a9   :  { %v3541_v32 = vld [vmem:[#allocation10 + $0x90] sm:$0xf]  ;;  %v4431_v33 = vld [vmem:[#allocation10 + $0x94] sm:$0xf0]  ;;  %v3405_v35 = vld [vmem:[#allocation9] sm:$0xf]  ;;  %v3418_v37 = vor.u32 %v4398_v27, %v3415_v29  ;;  %v3478_v38 = vor.u32 %v4415_v31, %v3477_v30 }
 0x2aa   :  { %1165 = vmatpush.bf16.msra.mxu0 %v3430_v10  ;;  %v4397_v36 = vld [vmem:[#allocation9 + $0x4] sm:$0xf0]  ;;  %v4396_v39 = vld [vmem:[#allocation9 + $0x4] sm:$0xf]  ;;  %v3407_v40 = vld [vmem:[#allocation9 + $0x8] sm:$0xf0]  ;;  %v3542_v42 = vor.u32 %v4431_v33, %v3541_v32 }
 0x2ab   :  { %1178 = vmatpush.bf16.msra.mxu1 %v3434_v12  ;;  %1408 = vmatpush.bf16.msra.mxu2 %v3494_v14  ;;  %v3469_v41 = vld [vmem:[#allocation10] sm:$0xf]  ;;  %v4413_v43 = vld [vmem:[#allocation10 + $0x4] sm:$0xf0]  ;;  %v4426_v46 = vld [vmem:[#allocation10 + $0x74] sm:$0xf]  ;;  %v3406_v49 = vor.u32 %v4397_v36, %v3405_v35  ;;  %v3410_v53 = vor.u32 %v4396_v39, %v3407_v40 }
 0x2ac   :  { %1421 = vmatpush.bf16.msra.mxu3 %v3558_v11  ;;  %v3533_v44 = vld [vmem:[#allocation10 + $0x80] sm:$0xf]  ;;  %v4429_v45 = vld [vmem:[#allocation10 + $0x84] sm:$0xf0]  ;;  %v3527_v47 = vld [vmem:[#allocation10 + $0x78] sm:$0xf0]  ;;  %v3470_v54 = vor.u32 %v4413_v43, %v3469_v41 }
 0x2ad   :  { %v4442_v48 = vld [vmem:[#allocation10 + $0xf4] sm:$0xf]  ;;  %v3591_v50 = vld [vmem:[#allocation10 + $0xf8] sm:$0xf0]  ;;  %v3653_v51 = vld [vmem:[#allocation12 + $0x70] sm:$0xf]  ;;  %v3534_v58 = vor.u32 %v4429_v45, %v3533_v44  ;;  %v3530_v59 = vor.u32 %v4426_v46, %v3527_v47 }
 0x2ae   :  { %1166 = vmatpush.bf16.msra.mxu0 %v3422_v23  ;;  %v4459_v52 = vld [vmem:[#allocation12 + $0x74] sm:$0xf0]  ;;  %v4458_v55 = vld [vmem:[#allocation12 + $0x74] sm:$0xf]  ;;  %v3655_v56 = vld [vmem:[#allocation12 + $0x78] sm:$0xf0]  ;;  %v3594_v61 = vor.u32 %v4442_v48, %v3591_v50 }
 0x2af   :  { %1179 = vmatpush.bf16.msra.mxu1 %v3426_v24  ;;  %1409 = vmatpush.bf16.msra.mxu2 %v3486_v25  ;;  %v4966_v57 = vld [vmem:[#allocation2] sm:$0xff]  ;;  %v4968_v60 = vld [vmem:[#allocation2 + $0x8] sm:$0xff]  ;;  %v3654_v62 = vor.u32 %v4459_v52, %v3653_v51  ;;  %v3658_v2 = vor.u32 %v4458_v55, %v3655_v56  ;;  %v3645_v4 = vld [vmem:[#allocation12 + $0x60] sm:$0xf] }
 0x2b0   :  { %1422 = vmatpush.bf16.msra.mxu3 %v3550_v28  ;;  %v4424_v63 = vld [vmem:[#allocation10 + $0x64] sm:$0xf]  ;;  %v3519_v0 = vld [vmem:[#allocation10 + $0x68] sm:$0xf0]  ;;  %v4457_v5 = vld [vmem:[#allocation12 + $0x64] sm:$0xf0]  ;;  %v4972_v6 = vpack.c.bf16 %v4966_v57, %v4966_v57  ;;  %v4976_v9 = vpack.c.bf16 %v4968_v60, %v4968_v60 }
 0x2b1   :  { %v4440_v1 = vld [vmem:[#allocation10 + $0xe4] sm:$0xf]  ;;  %v3583_v3 = vld [vmem:[#allocation10 + $0xe8] sm:$0xf0]  ;;  %v3522_v10 = vor.u32 %v4424_v63, %v3519_v0  ;;  %v1058_v12 = vld [vmem:[#allocation7] sm:$0xf]  ;;  %v3646_v15 = vor.u32 %v4457_v5, %v3645_v4 }
 0x2b2   :  { %1167 = vmatpush.bf16.msra.mxu0 %v3414_v34  ;;  %v4456_v7 = vld [vmem:[#allocation12 + $0x64] sm:$0xf]  ;;  %v3647_v8 = vld [vmem:[#allocation12 + $0x68] sm:$0xf0]  ;;  %v3586_v14 = vor.u32 %v4440_v1, %v3583_v3  ;;  %v4422_v17 = vld [vmem:[#allocation10 + $0x54] sm:$0xf] }
 0x2b3   :  { %1180 = vmatpush.bf16.msra.mxu1 %v3418_v37  ;;  %1410 = vmatpush.bf16.msra.mxu2 %v3478_v38  ;;  %v3511_v18 = vld [vmem:[#allocation10 + $0x58] sm:$0xf0]  ;;  %v4438_v11 = vld [vmem:[#allocation10 + $0xd4] sm:$0xf]  ;;  %v3650_v19 = vor.u32 %v4456_v7, %v3647_v8  ;;  %v3637_v20 = vld [vmem:[#allocation12 + $0x50] sm:$0xf] }
 0x2b4   :  { %1423 = vmatpush.bf16.msra.mxu3 %v3542_v42  ;;  %v3575_v13 = vld [vmem:[#allocation10 + $0xd8] sm:$0xf0]  ;;  %v4455_v21 = vld [vmem:[#allocation12 + $0x54] sm:$0xf0]  ;;  %v4454_v22 = vld [vmem:[#allocation12 + $0x54] sm:$0xf]  ;;  %v3514_v24 = vor.u32 %v4422_v17, %v3511_v18 }
 0x2b5   :  { %v3639_v23 = vld [vmem:[#allocation12 + $0x58] sm:$0xf0]  ;;  %v3578_v25 = vor.u32 %v4438_v11, %v3575_v13  ;;  %v3638_v16 = vor.u32 %v4455_v21, %v3637_v20  ;;  %v4420_v26 = vld [vmem:[#allocation10 + $0x44] sm:$0xf]  ;;  %v3503_v27 = vld [vmem:[#allocation10 + $0x48] sm:$0xf0] }
 0x2b6   :  { %1168 = vmatpush.bf16.msra.mxu0 %v3406_v49  ;;  %v4436_v28 = vld [vmem:[#allocation10 + $0xc4] sm:$0xf]  ;;  %v3642_v29 = vor.u32 %v4454_v22, %v3639_v23  ;;  %v3567_v30 = vld [vmem:[#allocation10 + $0xc8] sm:$0xf0]  ;;  %v3629_v31 = vld [vmem:[#allocation12 + $0x40] sm:$0xf]  ;;  %v3506_v35 = vor.u32 %v4420_v26, %v3503_v27 }
 0x2b7   :  { %1181 = vmatpush.bf16.msra.mxu1 %v3410_v53  ;;  %1411 = vmatpush.bf16.msra.mxu2 %v3470_v54  ;;  %v4453_v32 = vld [vmem:[#allocation12 + $0x44] sm:$0xf0]  ;;  %v4452_v33 = vld [vmem:[#allocation12 + $0x44] sm:$0xf]  ;;  %v3631_v34 = vld [vmem:[#allocation12 + $0x48] sm:$0xf0]  ;;  %v3570_v36 = vor.u32 %v4436_v28, %v3567_v30 }
 0x2b8   :  { %1424 = vmatpush.bf16.msra.mxu3 %v3534_v58  ;;  %v3630_v37 = vor.u32 %v4453_v32, %v3629_v31  ;;  %v4418_v38 = vld [vmem:[#allocation10 + $0x34] sm:$0xf]  ;;  %v3495_v39 = vld [vmem:[#allocation10 + $0x38] sm:$0xf0]  ;;  %v3634_v41 = vor.u32 %v4452_v33, %v3631_v34  ;;  %v3621_v43 = vld [vmem:[#allocation12 + $0x30] sm:$0xf] }
 0x2b9   :  { %1169 = vmatmul.bf16.vlgmr.msra.gmra.mxu0 %v1058_v12  ;;  %v4434_v40 = vld [vmem:[#allocation10 + $0xb4] sm:$0xf]  ;;  %v3559_v42 = vld [vmem:[#allocation10 + $0xb8] sm:$0xf0]  ;;  %v4451_v44 = vld [vmem:[#allocation12 + $0x34] sm:$0xf0]  ;;  %v3498_v47 = vor.u32 %v4418_v38, %v3495_v39 }
 0x2ba   :  { %1430 = vmatpush.bf16.msrb.mxu0 %v3530_v59  ;;  %1412 = vmatmul.bf16.vlgmr.msra.gmra.mxu2 %v4972_v6  ;;  %v4450_v45 = vld [vmem:[#allocation12 + $0x34] sm:$0xf]  ;;  %v3623_v46 = vld [vmem:[#allocation12 + $0x38] sm:$0xf0]  ;;  %v3562_v48 = vor.u32 %v4434_v40, %v3559_v42  ;;  %v3622_v49 = vor.u32 %v4451_v44, %v3621_v43  ;;  %v4416_v50 = vld [vmem:[#allocation10 + $0x24] sm:$0xf] }
 0x2bb   :  { %1443 = vmatpush.bf16.msrb.mxu1 %v3594_v61  ;;  %1585 = vmatpush.bf16.msrb.mxu2 %v3654_v62  ;;  %v3487_v51 = vld [vmem:[#allocation10 + $0x28] sm:$0xf0]  ;;  %v4432_v52 = vld [vmem:[#allocation10 + $0xa4] sm:$0xf]  ;;  %v3626_v53 = vor.u32 %v4450_v45, %v3623_v46  ;;  %v3613_v55 = vld [vmem:[#allocation12 + $0x20] sm:$0xf] }
 0x2bc   :  { %1598 = vmatpush.bf16.msrb.mxu3 %v3658_v2  ;;  %1182 = vmatmul.bf16.vlgmr.msra.gmra.mxu1 %v1058_v12  ;;  %v3551_v54 = vld [vmem:[#allocation10 + $0xa8] sm:$0xf0]  ;;  %v4449_v56 = vld [vmem:[#allocation12 + $0x24] sm:$0xf0]  ;;  %v4448_v58 = vld [vmem:[#allocation12 + $0x24] sm:$0xf]  ;;  %v3490_v61 = vor.u32 %v4416_v50, %v3487_v51 }
 0x2bd   :  { %1425 = vmatmul.bf16.vlgmr.msra.gmra.mxu3 %v4976_v9  ;;  %v3615_v59 = vld [vmem:[#allocation12 + $0x28] sm:$0xf0]  ;;  %v3554_v62 = vor.u32 %v4432_v52, %v3551_v54  ;;  %v3614_v63 = vor.u32 %v4449_v56, %v3613_v55  ;;  %v4414_v0 = vld [vmem:[#allocation10 + $0x14] sm:$0xf]  ;;  %v3479_v1 = vld [vmem:[#allocation10 + $0x18] sm:$0xf0] }
 0x2be   :  { %1431 = vmatpush.bf16.msrb.mxu0 %v3522_v10  ;;  %v4430_v2 = vld [vmem:[#allocation10 + $0x94] sm:$0xf]  ;;  %v3618_v3 = vor.u32 %v4448_v58, %v3615_v59  ;;  %v3543_v4 = vld [vmem:[#allocation10 + $0x98] sm:$0xf0]  ;;  %v3605_v5 = vld [vmem:[#allocation12 + $0x10] sm:$0xf]  ;;  %v3482_v12 = vor.u32 %v4414_v0, %v3479_v1 }
 0x2bf   :  { %1444 = vmatpush.bf16.msrb.mxu1 %v3586_v14  ;;  %1586 = vmatpush.bf16.msrb.mxu2 %v3646_v15  ;;  %v4447_v7 = vld [vmem:[#allocation12 + $0x14] sm:$0xf0]  ;;  %v4446_v8 = vld [vmem:[#allocation12 + $0x14] sm:$0xf]  ;;  %v3607_v10 = vld [vmem:[#allocation12 + $0x18] sm:$0xf0]  ;;  %v3546_v15 = vor.u32 %v4430_v2, %v3543_v4 }
 0x2c0   :  { %1599 = vmatpush.bf16.msrb.mxu3 %v3650_v19  ;;  %v4412_v14 = vld [vmem:[#allocation10 + $0x4] sm:$0xf]  ;;  %v3606_v17 = vor.u32 %v4447_v7, %v3605_v5  ;;  %v3471_v18 = vld [vmem:[#allocation10 + $0x8] sm:$0xf0]  ;;  %v3610_v13 = vor.u32 %v4446_v8, %v3607_v10  ;;  %v3597_v20 = vld [vmem:[#allocation12] sm:$0xf] }
 0x2c1   :  { %v4428_v11 = vld [vmem:[#allocation10 + $0x84] sm:$0xf]  ;;  %v3535_v19 = vld [vmem:[#allocation10 + $0x88] sm:$0xf0]  ;;  %v4445_v21 = vld [vmem:[#allocation12 + $0x4] sm:$0xf0] }
 0x2c2   :  { %1432 = vmatpush.bf16.msrb.mxu0 %v3514_v24  ;;  %v4444_v22 = vld [vmem:[#allocation12 + $0x4] sm:$0xf]  ;;  %v3599_v23 = vld [vmem:[#allocation12 + $0x8] sm:$0xf0]  ;;  %v3781_v24 = vld [vmem:[#allocation13 + $0xf0] sm:$0xf]  ;;  %v3538_v28 = vor.u32 %v4428_v11, %v3535_v19 }
 0x2c3   :  { %1445 = vmatpush.bf16.msrb.mxu1 %v3578_v25  ;;  %1587 = vmatpush.bf16.msrb.mxu2 %v3638_v16  ;;  %v4491_v25 = vld [vmem:[#allocation13 + $0xf4] sm:$0xf0]  ;;  %v3474_v16 = vor.u32 %v4412_v14, %v3471_v18  ;;  %v4490_v26 = vld [vmem:[#allocation13 + $0xf4] sm:$0xf]  ;;  %v3783_v27 = vld [vmem:[#allocation13 + $0xf8] sm:$0xf0]  ;;  %v3602_v31 = vor.u32 %v4444_v22, %v3599_v23 }
 0x2c4   :  { %1600 = vmatpush.bf16.msrb.mxu3 %v3642_v29  ;;  %v3598_v29 = vor.u32 %v4445_v21, %v3597_v20  ;;  %v4980_v30 = vld [vmem:[#allocation16] sm:$0xff]  ;;  %v3782_v32 = vor.u32 %v4491_v25, %v3781_v24  ;;  %v3717_v33 = vld [vmem:[#allocation13 + $0x70] sm:$0xf]  ;;  %v4475_v34 = vld [vmem:[#allocation13 + $0x74] sm:$0xf0] }
 0x2c5   :  { %v1482_v38 = vpack.c.bf16 %v4980_v30, %v4980_v30  ;;  %v4488_v39 = vld [vmem:[#allocation13 + $0xe4] sm:$0xf]  ;;  %v3775_v40 = vld [vmem:[#allocation13 + $0xe8] sm:$0xf0]  ;;  %v3709_v43 = vld [vmem:[#allocation13 + $0x60] sm:$0xf] }
 0x2c6   :  { %1433 = vmatpush.bf16.msrb.mxu0 %v3506_v35  ;;  %v3773_v35 = vld [vmem:[#allocation13 + $0xe0] sm:$0xf]  ;;  %v4473_v44 = vld [vmem:[#allocation13 + $0x64] sm:$0xf0]  ;;  %v3765_v45 = vld [vmem:[#allocation13 + $0xd0] sm:$0xf] }
 0x2c7   :  { %1446 = vmatpush.bf16.msrb.mxu1 %v3570_v36  ;;  %1588 = vmatpush.bf16.msrb.mxu2 %v3630_v37  ;;  %v4489_v36 = vld [vmem:[#allocation13 + $0xe4] sm:$0xf0]  ;;  %v3786_v37 = vor.u32 %v4490_v26, %v3783_v27  ;;  %v4487_v46 = vld [vmem:[#allocation13 + $0xd4] sm:$0xf0]  ;;  %v3710_v50 = vor.u32 %v4473_v44, %v3709_v43  ;;  %v3701_v52 = vld [vmem:[#allocation13 + $0x50] sm:$0xf] }
 0x2c8   :  { %1601 = vmatpush.bf16.msrb.mxu3 %v3634_v41  ;;  %v3718_v41 = vor.u32 %v4475_v34, %v3717_v33  ;;  %v3774_v42 = vor.u32 %v4489_v36, %v3773_v35  ;;  %v3766_v51 = vor.u32 %v4487_v46, %v3765_v45  ;;  %v3757_v54 = vld [vmem:[#allocation13 + $0xc0] sm:$0xf]  ;;  %v4485_v55 = vld [vmem:[#allocation13 + $0xc4] sm:$0xf0]  ;;  %v4484_v56 = vld [vmem:[#allocation13 + $0xc4] sm:$0xf] }
 0x2c9   :  { %v3759_v58 = vld [vmem:[#allocation13 + $0xc8] sm:$0xf0]  ;;  %v4483_v0 = vld [vmem:[#allocation13 + $0xb4] sm:$0xf0]  ;;  %v4482_v2 = vld [vmem:[#allocation13 + $0xb4] sm:$0xf] }
 0x2ca   :  { %1434 = vmatpush.bf16.msrb.mxu0 %v3498_v47  ;;  %v3778_v47 = vor.u32 %v4488_v39, %v3775_v40  ;;  %v3762_v1 = vor.u32 %v4484_v56, %v3759_v58  ;;  %v3741_v7 = vld [vmem:[#allocation13 + $0xa0] sm:$0xf]  ;;  %v4481_v8 = vld [vmem:[#allocation13 + $0xa4] sm:$0xf0]  ;;  %v3733_v14 = vld [vmem:[#allocation13 + $0x90] sm:$0xf] }
 0x2cb   :  { %1447 = vmatpush.bf16.msrb.mxu1 %v3562_v48  ;;  %1589 = vmatpush.bf16.msrb.mxu2 %v3622_v49  ;;  %v4486_v48 = vld [vmem:[#allocation13 + $0xd4] sm:$0xf]  ;;  %v3767_v49 = vld [vmem:[#allocation13 + $0xd8] sm:$0xf0]  ;;  %v4480_v19 = vld [vmem:[#allocation13 + $0xa4] sm:$0xf] }
 0x2cc   :  { %1602 = vmatpush.bf16.msrb.mxu3 %v3626_v53  ;;  %v4471_v53 = vld [vmem:[#allocation13 + $0x54] sm:$0xf0]  ;;  %v4474_v18 = vld [vmem:[#allocation13 + $0x74] sm:$0xf]  ;;  %v3719_v11 = vld [vmem:[#allocation13 + $0x78] sm:$0xf0] }
 0x2cd   :  { %v3702_v59 = vor.u32 %v4471_v53, %v3701_v52  ;;  %v3743_v20 = vld [vmem:[#allocation13 + $0xa8] sm:$0xf0]  ;;  %v3685_v22 = vld [vmem:[#allocation13 + $0x30] sm:$0xf]  ;;  %v4467_v23 = vld [vmem:[#allocation13 + $0x34] sm:$0xf0] }
 0x2ce   :  { %1435 = vmatpush.bf16.msrb.mxu0 %v3490_v61  ;;  %v3693_v61 = vld [vmem:[#allocation13 + $0x40] sm:$0xf]  ;;  %v3746_v21 = vor.u32 %v4480_v19, %v3743_v20  ;;  %v3686_v25 = vor.u32 %v4467_v23, %v3685_v22  ;;  %v4472_v27 = vld [vmem:[#allocation13 + $0x64] sm:$0xf]  ;;  %v4507_v33 = vld [vmem:[#allocation15 + $0x78] sm:$0xff] }
 0x2cf   :  { %1448 = vmatpush.bf16.msrb.mxu1 %v3554_v62  ;;  %1590 = vmatpush.bf16.msrb.mxu2 %v3614_v63  ;;  %v4469_v62 = vld [vmem:[#allocation13 + $0x44] sm:$0xf0]  ;;  %v3749_v63 = vld [vmem:[#allocation13 + $0xb0] sm:$0xf]  ;;  %v3725_v24 = vld [vmem:[#allocation13 + $0x80] sm:$0xf] }
 0x2d0   :  { %1603 = vmatpush.bf16.msrb.mxu3 %v3618_v3  ;;  %v3751_v3 = vld [vmem:[#allocation13 + $0xb8] sm:$0xf0]  ;;  %v3694_v4 = vor.u32 %v4469_v62, %v3693_v61  ;;  %v3750_v5 = vor.u32 %v4483_v0, %v3749_v63  ;;  %v3677_v35 = vld [vmem:[#allocation13 + $0x20] sm:$0xf]  ;;  %v4465_v36 = vld [vmem:[#allocation13 + $0x24] sm:$0xf0] }
 0x2d1   :  { %v3754_v10 = vor.u32 %v4482_v2, %v3751_v3  ;;  %v3703_v39 = vld [vmem:[#allocation13 + $0x58] sm:$0xf0]  ;;  %v4476_v40 = vld [vmem:[#allocation13 + $0x84] sm:$0xf]  ;;  %v4506_v44 = vld [vmem:[#allocation15 + $0x70] sm:$0xff] }
 0x2d2   :  { %1436 = vmatpush.bf16.msrb.mxu0 %v3482_v12  ;;  %v3742_v12 = vor.u32 %v4481_v8, %v3741_v7  ;;  %v3669_v45 = vld [vmem:[#allocation13 + $0x10] sm:$0xf]  ;;  %v4463_v46 = vld [vmem:[#allocation13 + $0x14] sm:$0xf0]  ;;  %v3661_v52 = vld [vmem:[#allocation13] sm:$0xf] }
 0x2d3   :  { %1449 = vmatpush.bf16.msrb.mxu1 %v3546_v15  ;;  %1591 = vmatpush.bf16.msrb.mxu2 %v3606_v17  ;;  %v4479_v15 = vld [vmem:[#allocation13 + $0x94] sm:$0xf0]  ;;  %v4461_v53 = vld [vmem:[#allocation13 + $0x4] sm:$0xf0]  ;;  %v3679_v61 = vld [vmem:[#allocation13 + $0x28] sm:$0xf0] }
 0x2d4   :  { %1604 = vmatpush.bf16.msrb.mxu3 %v3610_v13  ;;  %v3734_v17 = vor.u32 %v4479_v15, %v3733_v14  ;;  %v3722_v13 = vor.u32 %v4474_v18, %v3719_v11  ;;  %v4499_v58 = vld [vmem:[#allocation15 + $0x38] sm:$0xff]  ;;  %v4498_v63 = vld [vmem:[#allocation15 + $0x30] sm:$0xff]  ;;  %v4497_v8 = vld [vmem:[#allocation15 + $0x28] sm:$0xff] }
 0x2d5   :  { %v4503_v0 = vld [vmem:[#allocation15 + $0x58] sm:$0xff]  ;;  %v4462_v3 = vld [vmem:[#allocation13 + $0x14] sm:$0xf]  ;;  %v4460_v18 = vld [vmem:[#allocation13 + $0x4] sm:$0xf] }
 0x2d6   :  { %1437 = vmatpush.bf16.msrb.mxu0 %v3474_v16  ;;  %v4477_v16 = vld [vmem:[#allocation13 + $0x84] sm:$0xf0]  ;;  %v3663_v11 = vld [vmem:[#allocation13 + $0x8] sm:$0xf0] }
 0x2d7   :  { %1450 = vmatpush.bf16.msrb.mxu1 %v3538_v28  ;;  %1592 = vmatpush.bf16.msrb.mxu2 %v3598_v29  ;;  %v3726_v26 = vor.u32 %v4477_v16, %v3725_v24  ;;  %v3711_v28 = vld [vmem:[#allocation13 + $0x68] sm:$0xf0]  ;;  %v4478_v29 = vld [vmem:[#allocation13 + $0x94] sm:$0xf]  ;;  %v3666_v20 = vor.u32 %v4460_v18, %v3663_v11 }
 0x2d8   :  { %1605 = vmatpush.bf16.msrb.mxu3 %v3602_v31  ;;  %v3714_v31 = vor.u32 %v4472_v27, %v3711_v28  ;;  %v4501_v22 = vld [vmem:[#allocation15 + $0x48] sm:$0xff] }
 0x2d9   :  { %1438 = vmatmul.bf16.vlgmr.msrb.gmra.mxu0 %v4972_v6  ;;  %v3770_v6 = vor.u32 %v4486_v48, %v3767_v49  ;;  %v4468_v48 = vld [vmem:[#allocation13 + $0x44] sm:$0xf]  ;;  %v3695_v49 = vld [vmem:[#allocation13 + $0x48] sm:$0xf0] }
 0x2da   :  { %1451 = vmatmul.bf16.vlgmr.msrb.gmra.mxu1 %v4976_v9  ;;  %1593 = vmatmul.bf16.vlgmr.msrb.gmra.mxu2 %v1482_v38  ;;  %v3758_v9 = vor.u32 %v4485_v55, %v3757_v54  ;;  %v4466_v54 = vld [vmem:[#allocation13 + $0x34] sm:$0xf]  ;;  %v3687_v55 = vld [vmem:[#allocation13 + $0x38] sm:$0xf0] }
 0x2db   :  { %1833 = vmatpush.bf16.msra.mxu1 %v3782_v32  ;;  %1606 = vmatmul.bf16.vlgmr.msrb.gmra.mxu3 %v1482_v38  ;;  %v3735_v32 = vld [vmem:[#allocation13 + $0x98] sm:$0xf0]  ;;  %v3678_v38 = vor.u32 %v4465_v36, %v3677_v35  ;;  %v3690_v56 = vor.u32 %v4466_v54, %v3687_v55 }
 0x2dc   :  { %1859 = vmatpush.bf16.msra.mxu3 %v3786_v37  ;;  %1820 = vmatpush.bf16.msra.mxu0 %v3718_v41  ;;  %v3738_v34 = vor.u32 %v4478_v29, %v3735_v32  ;;  %v4470_v37 = vld [vmem:[#allocation13 + $0x54] sm:$0xf]  ;;  %v3727_v41 = vld [vmem:[#allocation13 + $0x88] sm:$0xf0]  ;;  %v4495_v29 = vld [vmem:[#allocation15 + $0x18] sm:$0xff] }
 0x2dd   :  { %1846 = vmatpush.bf16.msra.mxu2 %v3722_v13  ;;  %v3730_v43 = vor.u32 %v4476_v40, %v3727_v41  ;;  %v4493_v41 = vld [vmem:[#allocation15 + $0x8] sm:$0xff] }
 0x2df   :  { %1834 = vmatpush.bf16.msra.mxu1 %v3774_v42  ;;  %v3706_v42 = vor.u32 %v4470_v37, %v3703_v39  ;;  %v4494_v37 = vld [vmem:[#allocation15 + $0x10] sm:$0xff] }
 0x2e0   :  { %1860 = vmatpush.bf16.msra.mxu3 %v3778_v47  ;;  %1821 = vmatpush.bf16.msra.mxu0 %v3710_v50  ;;  %v3670_v47 = vor.u32 %v4463_v46, %v3669_v45  ;;  %v3698_v50 = vor.u32 %v4468_v48, %v3695_v49  ;;  %v1499_v48 = vld [vmem:[%s5062_s7] sm:$0x3]  ;;  %v1456_v49 = vld [vmem:[#allocation4] sm:$0xff] }
 0x2e1   :  { %1847 = vmatpush.bf16.msra.mxu2 %v3714_v31  ;;  %v4500_v31 = vld [vmem:[#allocation15 + $0x40] sm:$0xff] }
 0x2e3   :  { %1835 = vmatpush.bf16.msra.mxu1 %v3766_v51  ;;  %v4505_v51 = vld [vmem:[#allocation15 + $0x68] sm:$0xff] }
 0x2e4   :  { %1861 = vmatpush.bf16.msra.mxu3 %v3770_v6  ;;  %1822 = vmatpush.bf16.msra.mxu0 %v3702_v59  ;;  %v3662_v6 = vor.u32 %v4461_v53, %v3661_v52  ;;  %v4504_v59 = vld [vmem:[#allocation15 + $0x60] sm:$0xff]  ;;  %v1502_v53 = vperm.slane %v1499_v48, 1 }
 0x2e5   :  { %1848 = vmatpush.bf16.msra.mxu2 %v3706_v42 }
 0x2e7   :  { %1836 = vmatpush.bf16.msra.mxu1 %v3758_v9  ;;  %v4464_v9 = vld [vmem:[#allocation13 + $0x24] sm:$0xf] }
 0x2e8   :  { %1862 = vmatpush.bf16.msra.mxu3 %v3762_v1  ;;  %1823 = vmatpush.bf16.msra.mxu0 %v3694_v4  ;;  %v3682_v62 = vor.u32 %v4464_v9, %v3679_v61  ;;  %v1075_v1 = vld [vmem:[%s5060_s5] sm:$0x3]  ;;  %v3671_v4 = vld [vmem:[#allocation13 + $0x18] sm:$0xf0] }
 0x2e9   :  { %1849 = vmatpush.bf16.msra.mxu2 %v3698_v50  ;;  %v1077_v2 = vperm.slane %v1075_v1, 0  ;;  %v3674_v7 = vor.u32 %v4462_v3, %v3671_v4 }
 0x2eb   :  { %1837 = vmatpush.bf16.msra.mxu1 %v3750_v5  ;;  %v1078_v5 = vperm.slane %v1075_v1, 1 }
 0x2ec   :  { %1863 = vmatpush.bf16.msra.mxu3 %v3754_v10  ;;  %1824 = vmatpush.bf16.msra.mxu0 %v3686_v25  ;;  %v4502_v10 = vld [vmem:[#allocation15 + $0x50] sm:$0xff] }
 0x2ed   :  { %1850 = vmatpush.bf16.msra.mxu2 %v3690_v56 }
 0x2ef   :  { %1838 = vmatpush.bf16.msra.mxu1 %v3742_v12  ;;  %v1238_v12 = vld [vmem:[%s5061_s6] sm:$0x3] }
 0x2f0   :  { %1864 = vmatpush.bf16.msra.mxu3 %v3746_v21  ;;  %1825 = vmatpush.bf16.msra.mxu0 %v3678_v38  ;;  %v1240_v13 = vperm.slane %v1238_v12, 0  ;;  %v4496_v21 = vld [vmem:[#allocation15 + $0x20] sm:$0xff] }
 0x2f1   :  { %1851 = vmatpush.bf16.msra.mxu2 %v3682_v62 }
 0x2f3   :  { %1839 = vmatpush.bf16.msra.mxu1 %v3734_v17 }
 0x2f4   :  { %1865 = vmatpush.bf16.msra.mxu3 %v3738_v34  ;;  %1826 = vmatpush.bf16.msra.mxu0 %v3670_v47 }
 0x2f5   :  { %1852 = vmatpush.bf16.msra.mxu2 %v3674_v7 }
 0x2f7   :  { %1840 = vmatpush.bf16.msra.mxu1 %v3726_v26 }
 0x2f8   :  { %1866 = vmatpush.bf16.msra.mxu3 %v3730_v43  ;;  %1827 = vmatpush.bf16.msra.mxu0 %v3662_v6  ;;  %v4492_v43 = vld [vmem:[#allocation15] sm:$0xff] }
 0x2f9   :  { %1853 = vmatpush.bf16.msra.mxu2 %v3666_v20 }
 0x2fb   :  { %2027 = vmatpush.bf16.msrb.mxu1 %v4507_v33 }
 0x2fc   :  { %2014 = vmatpush.bf16.msrb.mxu0 %v4499_v58 }
 0x2ff   :  { %2028 = vmatpush.bf16.msrb.mxu1 %v4506_v44  ;;  %v1241_v44 = vperm.slane %v1238_v12, 1 }
 0x300   :  { %2015 = vmatpush.bf16.msrb.mxu0 %v4498_v63 }
 0x303   :  { %2029 = vmatpush.bf16.msrb.mxu1 %v4505_v51  ;;  %v1501_v51 = vperm.slane %v1499_v48, 0 }
 0x304   :  { %2016 = vmatpush.bf16.msrb.mxu0 %v4497_v8 }
 0x307   :  { %2030 = vmatpush.bf16.msrb.mxu1 %v4504_v59 }
 0x308   :  { %2017 = vmatpush.bf16.msrb.mxu0 %v4496_v21 }
 0x30b   :  { %2031 = vmatpush.bf16.msrb.mxu1 %v4503_v0 }
 0x30c   :  { %2018 = vmatpush.bf16.msrb.mxu0 %v4495_v29 }
 0x30f   :  { %2032 = vmatpush.bf16.msrb.mxu1 %v4502_v10 }
 0x310   :  { %2019 = vmatpush.bf16.msrb.mxu0 %v4494_v37 }
 0x313   :  { %2033 = vmatpush.bf16.msrb.mxu1 %v4501_v22 }
 0x314   :  { %2020 = vmatpush.bf16.msrb.mxu0 %v4493_v41 }
 0x317   :  { %2034 = vmatpush.bf16.msrb.mxu1 %v4500_v31 }
 0x318   :  { %2021 = vmatpush.bf16.msrb.mxu0 %v4492_v43 }
 0x336   :  { %v1170_v14 = vpop.f32.mrf.mxu0 }
 0x337   :  { %v1171_v15 = vadd.f32 %v1170_v14, %v1077_v2 }
 0x339   :  { %v1183_v17 = vpop.f32.mrf.mxu1  ;;  %v1189_v23 = vsub.f32 %v1171_v15, %v4966_v57 }
 0x33a   :  { %v1184_v19 = vadd.f32 %v1183_v17, %v1078_v5 }
 0x33b   :  { %v1191_v16 = vmul.f32 %v1189_v23, %v1189_v23 }
 0x33c   :  { %v1190_v24 = vsub.f32 %v1184_v19, %v4968_v60 }
 0x33d   :  { %v1413_v25 = vpop.f32.mrf.mxu2 }
 0x33e   :  { %v1414_v26 = vadd.f32 %v1413_v25, %v1240_v13  ;;  %v1192_v28 = vmul.f32 %v1190_v24, %v1190_v24  ;;  %v1172_v33 = vpop.f32.mrf.mxu0 }
 0x340   :  { %v1426_v27 = vpop.f32.mrf.mxu3  ;;  %v1193_v34 = vadd.f32 %v1192_v28, %v1191_v16 }
 0x341   :  { %v1427_v32 = vadd.f32 %v1426_v27, %v1414_v26  ;;  %v1185_v35 = vpop.f32.mrf.mxu1 }
 0x342   :  { %1194 = vadd.xlane.f32.xlu0 %v1193_v34 }
 0x343   :  { %v4995_v36 = vsub.f32 %v1427_v32, %v4980_v30 }
 0x345   :  { %v1627_v38 = vpack.c.bf16 %v4995_v36, %v4995_v36  ;;  %v1471_v39 = vmul.f32 %v4995_v36, %v4995_v36  ;;  %v1415_v40 = vpop.f32.mrf.mxu2 }
 0x347   :  { %1841 = vmatmul.bf16.vlgmr.msra.gmra.mxu1 %v1627_v38  ;;  %1867 = vmatmul.bf16.vlgmr.msra.gmra.mxu3 %v1627_v38 }
 0x348   :  { %v1428_v42 = vpop.f32.mrf.mxu3  ;;  %1472 = vadd.xlane.f32.xlu1 %v1471_v39 }
 0x356   :  { %v1439_v45 = vpop.f32.mrf.mxu0 }
 0x357   :  { %v1440_v46 = vadd.f32 %v1439_v45, %v1241_v44  ;;  %v1452_v47 = vpop.f32.mrf.mxu1 }
 0x359   :  { %v1453_v50 = vadd.f32 %v1452_v47, %v1440_v46 }
 0x35b   :  { %v1457_v52 = vsub.f32 %v1453_v50, %v1456_v49 }
 0x35d   :  { %v1626_v54 = vpack.c.bf16 %v1457_v52, %v1457_v52  ;;  %v1594_v55 = vpop.f32.mrf.mxu2  ;;  %v1460_v6 = vmul.f32 %v1457_v52, %v1457_v52 }
 0x35e   :  { %v1595_v56 = vadd.f32 %v1594_v55, %v1501_v51  ;;  %v1607_v58 = vpop.f32.mrf.mxu3  ;;  %v1441_v59 = vpop.f32.mrf.mxu0 }
 0x35f   :  { %v1608_v9 = vadd.f32 %v1607_v58, %v1502_v53  ;;  %v1454_v61 = vpop.f32.mrf.mxu1  ;;  %1828 = vmatmul.bf16.vlgmr.msra.gmra.mxu0 %v1626_v54  ;;  %1854 = vmatmul.bf16.vlgmr.msra.gmra.mxu2 %v1626_v54 }
 0x360   :  { %v1611_v62 = vsub.f32 %v1595_v56, %v4966_v57  ;;  %1461 = vadd.xlane.f32.xlu0 %v1460_v6 }
 0x361   :  { %v1612_v63 = vsub.f32 %v1608_v9, %v4968_v60 }
 0x362   :  { %v1613_v0 = vmul.f32 %v1611_v62, %v1611_v62  ;;  %v1872_v1 = vadd.f32 %v1611_v62, %v1189_v23  ;;  %v1884_v10 = vpack.c.bf16 %v1611_v62, %v1611_v62 }
 0x363   :  { %v1885_v2 = vpack.c.bf16 %v1612_v63, %v1612_v63  ;;  %v1614_v3 = vmul.f32 %v1612_v63, %v1612_v63  ;;  %v1873_v4 = vadd.f32 %v1612_v63, %v1190_v24  ;;  %v2040_v63 = vmul.f32 0.001953125, %v4995_v36 }
 0x364   :  { %v1874_v41 = vmul.f32 0.0009765625, %v1872_v1 }
 0x365   :  { %2035 = vmatmul.bf16.vlgmr.msrb.gmra.mxu1 %v1885_v2  ;;  %v1596_v5 = vpop.f32.mrf.mxu2  ;;  %v1615_v7 = vadd.f32 %v1614_v3, %v1613_v0  ;;  %v1875_v52 = vmul.f32 0.0009765625, %v1873_v4 }
 0x366   :  { %v1609_v8 = vpop.f32.mrf.mxu3 }
 0x367   :  { %1616 = vadd.xlane.f32.xlu1 %v1615_v7 }
 0x36f   :  { %2022 = vmatmul.bf16.vlgmr.msrb.gmra.mxu0 %v1884_v10 }
 0x3b5   :  { %v1195_v12 = vpop.xlane.xlu0 %1194 }
 0x3b6   :  { %v1196_v14 = vrot.slane %v1195_v12, 4 }
 0x3b8   :  { %v1197_v15 = vadd.f32 %v1196_v14, %v1195_v12 }
 0x3ba   :  { %v1198_v17 = vrot.slane %v1197_v15, 2 }
 0x3bb   :  { %v1473_v20 = vpop.xlane.xlu1 %1472 }
 0x3bc   :  { %v1199_v18 = vadd.f32 %v1198_v17, %v1197_v15  ;;  %v1474_v21 = vrot.slane %v1473_v20, 4 }
 0x3be   :  { %v1200_v11 = vrot.slane %v1199_v18, 1  ;;  %v1475_v24 = vadd.f32 %v1474_v21, %v1473_v20 }
 0x3c0   :  { %v1201_v19 = vadd.f32 %v1200_v11, %v1199_v18  ;;  %v1476_v25 = vrot.slane %v1475_v24, 2 }
 0x3c2   :  { %4624 = vpush %v1201_v19  ;;  %v1477_v29 = vadd.f32 %v1476_v25, %v1475_v24 }
 0x3c4   :  { %v1842_v13 = vpop.f32.mrf.mxu1  ;;  %v1478_v35 = vrot.slane %v1477_v29, 1 }
 0x3c6   :  { %v1479_v45 = vadd.f32 %v1478_v35, %v1477_v29 }
 0x3ca   :  { %v1868_v22 = vpop.f32.mrf.mxu3 }
 0x3cc   :  { %v1844_v23 = vpop.f32.mrf.mxu1 }
 0x3d2   :  { %v1870_v26 = vpop.f32.mrf.mxu3 }
 0x3d3   :  { %v1462_v16 = vpop.xlane.xlu0 %1461 }
 0x3d4   :  { %v1463_v27 = vrot.slane %v1462_v16, 4 }
 0x3d6   :  { %v1464_v28 = vadd.f32 %v1463_v27, %v1462_v16 }
 0x3d8   :  { %v1465_v31 = vrot.slane %v1464_v28, 2 }
 0x3da   :  { %v1466_v32 = vadd.f32 %v1465_v31, %v1464_v28  ;;  %v1617_v33 = vpop.xlane.xlu1 %1616 }
 0x3db   :  { %v1618_v34 = vrot.slane %v1617_v33, 4 }
 0x3dc   :  { %v1829_v37 = vpop.f32.mrf.mxu0  ;;  %v1467_v38 = vrot.slane %v1466_v32, 1 }
 0x3dd   :  { %v1619_v39 = vadd.f32 %v1618_v34, %v1617_v33  ;;  %v1843_v40 = vadd.f32 %v1842_v13, %v1829_v37 }
 0x3de   :  { %v1468_v42 = vadd.f32 %v1467_v38, %v1466_v32 }
 0x3df   :  { %v1620_v43 = vrot.slane %v1619_v39, 2  ;;  %v1876_v44 = vsub.f32 %v1843_v40, %v1874_v41 }
 0x3e0   :  { %4626 = vpush %v1468_v42 }
 0x3e1   :  { %v1621_v46 = vadd.f32 %v1620_v43, %v1619_v39  ;;  %v1878_v47 = vmul.f32 0.001, %v1876_v44  ;;  %4628 = vpush %v1479_v45 }
 0x3e2   :  { %v2036_v48 = vpop.f32.mrf.mxu1  ;;  %v1855_v49 = vpop.f32.mrf.mxu2 }
 0x3e3   :  { %v1880_v50 = vsub.f32 %v4966_v57, %v1878_v47  ;;  %v1869_v51 = vadd.f32 %v1868_v22, %v1855_v49  ;;  %v1622_v53 = vrot.slane %v1621_v46, 1 }
 0x3e4   :  { %v1831_v54 = vpop.f32.mrf.mxu0 }
 0x3e5   :  { %1882 = vst [vmem:[#allocation2] sm:$0xff] %v1880_v50  ;;  %v1877_v55 = vsub.f32 %v1869_v51, %v1875_v52  ;;  %v1623_v6 = vadd.f32 %v1622_v53, %v1621_v46 }
 0x3e7   :  { %v1879_v56 = vmul.f32 0.001, %v1877_v55  ;;  %4630 = vpush %v1623_v6 }
 0x3e9   :  { %v1881_v58 = vsub.f32 %v4968_v60, %v1879_v56 }
 0x3ea   :  { %v2038_v59 = vpop.f32.mrf.mxu1  ;;  %v1857_v9 = vpop.f32.mrf.mxu2 }
 0x3eb   :  { %1883 = vst [vmem:[#allocation2 + $0x8] sm:$0xff] %v1881_v58 }
 0x3ec   :  { %v2023_v61 = vpop.f32.mrf.mxu0 }
 0x3ed   :  { %v2037_v62 = vadd.f32 %v2036_v48, %v2023_v61 }
 0x3ef   :  { %v2041_v0 = vsub.f32 %v2037_v62, %v2040_v63 }
 0x3f1   :  { %v2043_v57 = vmul.f32 0.001, %v2041_v0 }
 0x3f3   :  { %v2044_v1 = vsub.f32 %v4980_v30, %v2043_v57  ;;  %s4625_s21 = spop %4624 }
 0x3f4   :  { %v2025_v2 = vpop.f32.mrf.mxu0  ;;  %s1203_s2 = smul.f32 0.00048828125, %s4625_s21 }
 0x3f5   :  { %2045 = vst [vmem:[#allocation16] sm:$0xff] %v2044_v1 }
 0x411   :  { %s4627_s22 = spop %4626 }
 0x412   :  { %s1470_s23 = smul.f32 0.0009765625, %s4627_s22  ;;  %s4629_s24 = spop %4628 }
 0x413   :  { %s1481_s27 = smul.f32 0.0009765625, %s4629_s24 }
 0x414   :  { %s2047_s25 = sadd.f32 %s1470_s23, %s1203_s2 }
 0x416   :  { %s2048_s9 = sadd.f32 %s2047_s25, %s1481_s27 }
 0x418   :  { %s4631_s4 = spop %4630 }
 0x419   :  { %s1625_s1 = smul.f32 0.00048828125, %s4631_s4 }
 0x41b   :  { %s2049_s26 = sadd.f32 %s2048_s9, %s1625_s1 }
 0x41d   :  { %p2050_p1 = scmp.lt.f32.partialorder %s2049_s26, 0.1 }
 0x41f   :  { %s2051_s28 = scalar_select %p2050_p1, 1, 0 }
 0x421   :  { %2052 = sst [smem:[#allocation3]] %s2051_s28 }
 0x422 PF:  { %s2053_s29 = sld [smem:[#allocation3]] }
 0x428   :  { %p3851_p2 = scmp.ne.s32.totalorder %s2053_s29, 0 }
 0x42a   :  { %2057 = sbr.rel (%p3851_p2) target bundleno = 1422 (0x58e), region = 77 }
 0x42f   :  { %v3910_v60 = vld [vmem:[#allocation9 + $0x70] sm:$0xf]  ;;  %v4523_v30 = vld [vmem:[#allocation9 + $0x74] sm:$0xf0]  ;;  %v4522_v36 = vld [vmem:[#allocation9 + $0x74] sm:$0xf] }
 0x430   :  { %v3911_v3 = vor.u32 %v4523_v30, %v3910_v60  ;;  %v3912_v4 = vld [vmem:[#allocation9 + $0x78] sm:$0xf0]  ;;  %v3974_v5 = vld [vmem:[#allocation10 + $0x70] sm:$0xf]  ;;  %v4539_v7 = vld [vmem:[#allocation10 + $0x74] sm:$0xf0] }
 0x431   :  { %v3915_v8 = vor.u32 %v4522_v36, %v3912_v4  ;;  %v3975_v10 = vor.u32 %v4539_v7, %v3974_v5  ;;  %v4038_v12 = vld [vmem:[#allocation10 + $0xf0] sm:$0xf]  ;;  %v4555_v14 = vld [vmem:[#allocation10 + $0xf4] sm:$0xf0]  ;;  %v3902_v15 = vld [vmem:[#allocation9 + $0x60] sm:$0xf] }
 0x432   :  { %2161 = vmatpush.bf16.msra.mxu0 %v3911_v3  ;;  %v4039_v17 = vor.u32 %v4555_v14, %v4038_v12  ;;  %v4521_v18 = vld [vmem:[#allocation9 + $0x64] sm:$0xf0]  ;;  %v4520_v11 = vld [vmem:[#allocation9 + $0x64] sm:$0xf]  ;;  %v3904_v19 = vld [vmem:[#allocation9 + $0x68] sm:$0xf0] }
 0x433   :  { %2174 = vmatpush.bf16.msra.mxu1 %v3915_v8  ;;  %2391 = vmatpush.bf16.msra.mxu2 %v3975_v10  ;;  %v3903_v13 = vor.u32 %v4521_v18, %v3902_v15  ;;  %v3907_v20 = vor.u32 %v4520_v11, %v3904_v19  ;;  %v3966_v21 = vld [vmem:[#allocation10 + $0x60] sm:$0xf]  ;;  %v4537_v22 = vld [vmem:[#allocation10 + $0x64] sm:$0xf0]  ;;  %v3894_v16 = vld [vmem:[#allocation9 + $0x50] sm:$0xf] }
 0x434   :  { %v4030_v23 = vld [vmem:[#allocation10 + $0xe0] sm:$0xf]  ;;  %2404 = vmatpush.bf16.msra.mxu3 %v4039_v17  ;;  %v3967_v24 = vor.u32 %v4537_v22, %v3966_v21  ;;  %v4553_v25 = vld [vmem:[#allocation10 + $0xe4] sm:$0xf0]  ;;  %v4519_v26 = vld [vmem:[#allocation9 + $0x54] sm:$0xf0] }
 0x435   :  { %v4031_v27 = vor.u32 %v4553_v25, %v4030_v23  ;;  %v4518_v28 = vld [vmem:[#allocation9 + $0x54] sm:$0xf]  ;;  %v3896_v29 = vld [vmem:[#allocation9 + $0x58] sm:$0xf0]  ;;  %v3958_v31 = vld [vmem:[#allocation10 + $0x50] sm:$0xf]  ;;  %v3895_v32 = vor.u32 %v4519_v26, %v3894_v16 }
 0x436   :  { %2162 = vmatpush.bf16.msra.mxu0 %v3903_v13  ;;  %v4535_v33 = vld [vmem:[#allocation10 + $0x54] sm:$0xf0]  ;;  %v4022_v34 = vld [vmem:[#allocation10 + $0xd0] sm:$0xf]  ;;  %v3899_v37 = vor.u32 %v4518_v28, %v3896_v29  ;;  %v3886_v39 = vld [vmem:[#allocation9 + $0x40] sm:$0xf] }
 0x437   :  { %v4551_v35 = vld [vmem:[#allocation10 + $0xd4] sm:$0xf0]  ;;  %2175 = vmatpush.bf16.msra.mxu1 %v3907_v20  ;;  %2392 = vmatpush.bf16.msra.mxu2 %v3967_v24  ;;  %v3959_v38 = vor.u32 %v4535_v33, %v3958_v31  ;;  %v4517_v40 = vld [vmem:[#allocation9 + $0x44] sm:$0xf0]  ;;  %v4516_v41 = vld [vmem:[#allocation9 + $0x44] sm:$0xf] }
 0x438   :  { %2405 = vmatpush.bf16.msra.mxu3 %v4031_v27  ;;  %v4023_v42 = vor.u32 %v4551_v35, %v4022_v34  ;;  %v3888_v43 = vld [vmem:[#allocation9 + $0x48] sm:$0xf0]  ;;  %v3950_v44 = vld [vmem:[#allocation10 + $0x40] sm:$0xf]  ;;  %v4533_v45 = vld [vmem:[#allocation10 + $0x44] sm:$0xf0]  ;;  %v3887_v48 = vor.u32 %v4517_v40, %v3886_v39 }
 0x439   :  { %v4014_v46 = vld [vmem:[#allocation10 + $0xc0] sm:$0xf]  ;;  %v4549_v47 = vld [vmem:[#allocation10 + $0xc4] sm:$0xf0]  ;;  %v3891_v49 = vor.u32 %v4516_v41, %v3888_v43  ;;  %v3951_v50 = vor.u32 %v4533_v45, %v3950_v44  ;;  %v3878_v51 = vld [vmem:[#allocation9 + $0x30] sm:$0xf] }
 0x43a   :  { %2163 = vmatpush.bf16.msra.mxu0 %v3895_v32  ;;  %v4515_v52 = vld [vmem:[#allocation9 + $0x34] sm:$0xf0]  ;;  %v4514_v53 = vld [vmem:[#allocation9 + $0x34] sm:$0xf]  ;;  %v4015_v54 = vor.u32 %v4549_v47, %v4014_v46  ;;  %v3880_v55 = vld [vmem:[#allocation9 + $0x38] sm:$0xf0] }
 0x43b   :  { %2176 = vmatpush.bf16.msra.mxu1 %v3899_v37  ;;  %2393 = vmatpush.bf16.msra.mxu2 %v3959_v38  ;;  %v3942_v6 = vld [vmem:[#allocation10 + $0x30] sm:$0xf]  ;;  %v4531_v56 = vld [vmem:[#allocation10 + $0x34] sm:$0xf0]  ;;  %v3879_v9 = vor.u32 %v4515_v52, %v3878_v51  ;;  %v3883_v61 = vor.u32 %v4514_v53, %v3880_v55  ;;  %v3870_v63 = vld [vmem:[#allocation9 + $0x20] sm:$0xf] }
 0x43c   :  { %2406 = vmatpush.bf16.msra.mxu3 %v4023_v42  ;;  %v4006_v58 = vld [vmem:[#allocation10 + $0xb0] sm:$0xf]  ;;  %v4547_v59 = vld [vmem:[#allocation10 + $0xb4] sm:$0xf0]  ;;  %v3943_v62 = vor.u32 %v4531_v56, %v3942_v6  ;;  %v4513_v0 = vld [vmem:[#allocation9 + $0x24] sm:$0xf0] }
 0x43d   :  { %v4512_v57 = vld [vmem:[#allocation9 + $0x24] sm:$0xf]  ;;  %v4007_v1 = vor.u32 %v4547_v59, %v4006_v58  ;;  %v3872_v2 = vld [vmem:[#allocation9 + $0x28] sm:$0xf0]  ;;  %v3934_v60 = vld [vmem:[#allocation10 + $0x20] sm:$0xf]  ;;  %v3871_v4 = vor.u32 %v4513_v0, %v3870_v63 }
 0x43e   :  { %2164 = vmatpush.bf16.msra.mxu0 %v3887_v48  ;;  %v4529_v30 = vld [vmem:[#allocation10 + $0x24] sm:$0xf0]  ;;  %v3998_v36 = vld [vmem:[#allocation10 + $0xa0] sm:$0xf]  ;;  %v3875_v5 = vor.u32 %v4512_v57, %v3872_v2  ;;  %v3862_v8 = vld [vmem:[#allocation9 + $0x10] sm:$0xf] }
 0x43f   :  { %2177 = vmatpush.bf16.msra.mxu1 %v3891_v49  ;;  %2394 = vmatpush.bf16.msra.mxu2 %v3951_v50  ;;  %v4545_v3 = vld [vmem:[#allocation10 + $0xa4] sm:$0xf0]  ;;  %v3935_v7 = vor.u32 %v4529_v30, %v3934_v60  ;;  %v4511_v10 = vld [vmem:[#allocation9 + $0x14] sm:$0xf0]  ;;  %v4510_v12 = vld [vmem:[#allocation9 + $0x14] sm:$0xf] }
 0x440   :  { %2407 = vmatpush.bf16.msra.mxu3 %v4015_v54  ;;  %v3999_v14 = vor.u32 %v4545_v3, %v3998_v36  ;;  %v3864_v15 = vld [vmem:[#allocation9 + $0x18] sm:$0xf0]  ;;  %v3926_v17 = vld [vmem:[#allocation10 + $0x10] sm:$0xf]  ;;  %v4527_v18 = vld [vmem:[#allocation10 + $0x14] sm:$0xf0]  ;;  %v3863_v13 = vor.u32 %v4511_v10, %v3862_v8 }
 0x441   :  { %v3990_v11 = vld [vmem:[#allocation10 + $0x90] sm:$0xf]  ;;  %v4543_v19 = vld [vmem:[#allocation10 + $0x94] sm:$0xf0]  ;;  %v3854_v20 = vld [vmem:[#allocation9] sm:$0xf]  ;;  %v3867_v22 = vor.u32 %v4510_v12, %v3864_v15  ;;  %v3927_v23 = vor.u32 %v4527_v18, %v3926_v17 }
 0x442   :  { %2165 = vmatpush.bf16.msra.mxu0 %v3879_v9  ;;  %v4509_v21 = vld [vmem:[#allocation9 + $0x4] sm:$0xf0]  ;;  %v4508_v24 = vld [vmem:[#allocation9 + $0x4] sm:$0xf]  ;;  %v3856_v25 = vld [vmem:[#allocation9 + $0x8] sm:$0xf0]  ;;  %v3991_v26 = vor.u32 %v4543_v19, %v3990_v11 }
 0x443   :  { %2178 = vmatpush.bf16.msra.mxu1 %v3883_v61  ;;  %2395 = vmatpush.bf16.msra.mxu2 %v3943_v62  ;;  %v3918_v16 = vld [vmem:[#allocation10] sm:$0xf]  ;;  %v4525_v27 = vld [vmem:[#allocation10 + $0x4] sm:$0xf0]  ;;  %v4538_v31 = vld [vmem:[#allocation10 + $0x74] sm:$0xf]  ;;  %v3855_v34 = vor.u32 %v4509_v21, %v3854_v20  ;;  %v3859_v39 = vor.u32 %v4508_v24, %v3856_v25 }
 0x444   :  { %2408 = vmatpush.bf16.msra.mxu3 %v4007_v1  ;;  %v3982_v28 = vld [vmem:[#allocation10 + $0x80] sm:$0xf]  ;;  %v4541_v29 = vld [vmem:[#allocation10 + $0x84] sm:$0xf0]  ;;  %v3976_v32 = vld [vmem:[#allocation10 + $0x78] sm:$0xf0]  ;;  %v3919_v40 = vor.u32 %v4525_v27, %v3918_v16 }
 0x445   :  { %v4554_v33 = vld [vmem:[#allocation10 + $0xf4] sm:$0xf]  ;;  %v4040_v35 = vld [vmem:[#allocation10 + $0xf8] sm:$0xf0]  ;;  %v4102_v37 = vld [vmem:[#allocation12 + $0x70] sm:$0xf]  ;;  %v3983_v43 = vor.u32 %v4541_v29, %v3982_v28  ;;  %v3979_v44 = vor.u32 %v4538_v31, %v3976_v32 }
 0x446   :  { %2166 = vmatpush.bf16.msra.mxu0 %v3871_v4  ;;  %v4571_v38 = vld [vmem:[#allocation12 + $0x74] sm:$0xf0]  ;;  %v4570_v41 = vld [vmem:[#allocation12 + $0x74] sm:$0xf]  ;;  %v4104_v42 = vld [vmem:[#allocation12 + $0x78] sm:$0xf0]  ;;  %v4043_v47 = vor.u32 %v4554_v33, %v4040_v35 }
 0x447   :  { %2179 = vmatpush.bf16.msra.mxu1 %v3875_v5  ;;  %2396 = vmatpush.bf16.msra.mxu2 %v3935_v7  ;;  %v4536_v45 = vld [vmem:[#allocation10 + $0x64] sm:$0xf]  ;;  %v3968_v46 = vld [vmem:[#allocation10 + $0x68] sm:$0xf0]  ;;  %v4103_v48 = vor.u32 %v4571_v38, %v4102_v37  ;;  %v4094_v51 = vld [vmem:[#allocation12 + $0x60] sm:$0xf]  ;;  %v4107_v52 = vor.u32 %v4570_v41, %v4104_v42 }
 0x448   :  { %2409 = vmatpush.bf16.msra.mxu3 %v3999_v14  ;;  %v4552_v49 = vld [vmem:[#allocation10 + $0xe4] sm:$0xf]  ;;  %v4032_v50 = vld [vmem:[#allocation10 + $0xe8] sm:$0xf0]  ;;  %v4569_v53 = vld [vmem:[#allocation12 + $0x64] sm:$0xf0]  ;;  %v3971_v59 = vor.u32 %v4536_v45, %v3968_v46 }
 0x449   :  { %v4568_v54 = vld [vmem:[#allocation12 + $0x64] sm:$0xf]  ;;  %v4096_v55 = vld [vmem:[#allocation12 + $0x68] sm:$0xf0]  ;;  %v2058_v6 = vld [vmem:[#allocation7] sm:$0xf]  ;;  %v4035_v62 = vor.u32 %v4552_v49, %v4032_v50  ;;  %v4095_v63 = vor.u32 %v4569_v53, %v4094_v51 }
 0x44a   :  { %2167 = vmatpush.bf16.msra.mxu0 %v3863_v13  ;;  %v5010_v56 = vld [vmem:[#allocation2] sm:$0xff]  ;;  %v5012_v58 = vld [vmem:[#allocation2 + $0x8] sm:$0xff]  ;;  %v4534_v0 = vld [vmem:[#allocation10 + $0x54] sm:$0xf]  ;;  %v4099_v2 = vor.u32 %v4568_v54, %v4096_v55 }
 0x44b   :  { %2180 = vmatpush.bf16.msra.mxu1 %v3867_v22  ;;  %2397 = vmatpush.bf16.msra.mxu2 %v3927_v23  ;;  %v5016_v9 = vpack.c.bf16 %v5010_v56, %v5010_v56  ;;  %v5020_v61 = vpack.c.bf16 %v5012_v58, %v5012_v58  ;;  %v3960_v57 = vld [vmem:[#allocation10 + $0x58] sm:$0xf0]  ;;  %v4550_v1 = vld [vmem:[#allocation10 + $0xd4] sm:$0xf]  ;;  %v4086_v30 = vld [vmem:[#allocation12 + $0x50] sm:$0xf] }
 0x44c   :  { %2410 = vmatpush.bf16.msra.mxu3 %v3991_v26  ;;  %v4024_v60 = vld [vmem:[#allocation10 + $0xd8] sm:$0xf0]  ;;  %v4567_v36 = vld [vmem:[#allocation12 + $0x54] sm:$0xf0]  ;;  %v4566_v3 = vld [vmem:[#allocation12 + $0x54] sm:$0xf]  ;;  %v3963_v5 = vor.u32 %v4534_v0, %v3960_v57 }
 0x44d   :  { %v4088_v4 = vld [vmem:[#allocation12 + $0x58] sm:$0xf0]  ;;  %v4027_v7 = vor.u32 %v4550_v1, %v4024_v60  ;;  %v4087_v8 = vor.u32 %v4567_v36, %v4086_v30  ;;  %v4532_v10 = vld [vmem:[#allocation10 + $0x44] sm:$0xf]  ;;  %v3952_v12 = vld [vmem:[#allocation10 + $0x48] sm:$0xf0] }
 0x44e   :  { %2168 = vmatpush.bf16.msra.mxu0 %v3855_v34  ;;  %v4548_v14 = vld [vmem:[#allocation10 + $0xc4] sm:$0xf]  ;;  %v4091_v15 = vor.u32 %v4566_v3, %v4088_v4  ;;  %v4016_v17 = vld [vmem:[#allocation10 + $0xc8] sm:$0xf0]  ;;  %v4078_v18 = vld [vmem:[#allocation12 + $0x40] sm:$0xf]  ;;  %v3955_v20 = vor.u32 %v4532_v10, %v3952_v12 }
 0x44f   :  { %2181 = vmatpush.bf16.msra.mxu1 %v3859_v39  ;;  %2398 = vmatpush.bf16.msra.mxu2 %v3919_v40  ;;  %v4565_v11 = vld [vmem:[#allocation12 + $0x44] sm:$0xf0]  ;;  %v4564_v19 = vld [vmem:[#allocation12 + $0x44] sm:$0xf]  ;;  %v4080_v13 = vld [vmem:[#allocation12 + $0x48] sm:$0xf0]  ;;  %v4019_v21 = vor.u32 %v4548_v14, %v4016_v17 }
 0x450   :  { %2411 = vmatpush.bf16.msra.mxu3 %v3983_v43  ;;  %v4079_v22 = vor.u32 %v4565_v11, %v4078_v18  ;;  %v4530_v23 = vld [vmem:[#allocation10 + $0x34] sm:$0xf]  ;;  %v3944_v24 = vld [vmem:[#allocation10 + $0x38] sm:$0xf0]  ;;  %v4083_v16 = vor.u32 %v4564_v19, %v4080_v13  ;;  %v4070_v27 = vld [vmem:[#allocation12 + $0x30] sm:$0xf] }
 0x451   :  { %2169 = vmatmul.bf16.vlgmr.msra.gmra.mxu0 %v2058_v6  ;;  %v4546_v25 = vld [vmem:[#allocation10 + $0xb4] sm:$0xf]  ;;  %v4008_v26 = vld [vmem:[#allocation10 + $0xb8] sm:$0xf0]  ;;  %v4563_v28 = vld [vmem:[#allocation12 + $0x34] sm:$0xf0]  ;;  %v3947_v32 = vor.u32 %v4530_v23, %v3944_v24 }
 0x452   :  { %2417 = vmatpush.bf16.msrb.mxu0 %v3979_v44  ;;  %2182 = vmatmul.bf16.vlgmr.msra.gmra.mxu1 %v2058_v6  ;;  %v4562_v29 = vld [vmem:[#allocation12 + $0x34] sm:$0xf]  ;;  %v4072_v31 = vld [vmem:[#allocation12 + $0x38] sm:$0xf0]  ;;  %v4011_v33 = vor.u32 %v4546_v25, %v4008_v26  ;;  %v4071_v34 = vor.u32 %v4563_v28, %v4070_v27  ;;  %v4528_v35 = vld [vmem:[#allocation10 + $0x24] sm:$0xf] }
 0x453   :  { %2430 = vmatpush.bf16.msrb.mxu1 %v4043_v47  ;;  %2550 = vmatpush.bf16.msrb.mxu2 %v4103_v48  ;;  %v3936_v37 = vld [vmem:[#allocation10 + $0x28] sm:$0xf0]  ;;  %v4544_v38 = vld [vmem:[#allocation10 + $0xa4] sm:$0xf]  ;;  %v4075_v39 = vor.u32 %v4562_v29, %v4072_v31  ;;  %v4062_v41 = vld [vmem:[#allocation12 + $0x20] sm:$0xf] }
 0x454   :  { %2563 = vmatpush.bf16.msrb.mxu3 %v4107_v52  ;;  %2399 = vmatmul.bf16.vlgmr.msra.gmra.mxu2 %v5016_v9  ;;  %v4000_v40 = vld [vmem:[#allocation10 + $0xa8] sm:$0xf0]  ;;  %v4561_v42 = vld [vmem:[#allocation12 + $0x24] sm:$0xf0]  ;;  %v4560_v43 = vld [vmem:[#allocation12 + $0x24] sm:$0xf]  ;;  %v3939_v45 = vor.u32 %v4528_v35, %v3936_v37 }
 0x455   :  { %2412 = vmatmul.bf16.vlgmr.msra.gmra.mxu3 %v5020_v61  ;;  %v4064_v44 = vld [vmem:[#allocation12 + $0x28] sm:$0xf0]  ;;  %v4003_v46 = vor.u32 %v4544_v38, %v4000_v40  ;;  %v4063_v47 = vor.u32 %v4561_v42, %v4062_v41  ;;  %v4526_v48 = vld [vmem:[#allocation10 + $0x14] sm:$0xf]  ;;  %v3928_v49 = vld [vmem:[#allocation10 + $0x18] sm:$0xf0] }
 0x456   :  { %2418 = vmatpush.bf16.msrb.mxu0 %v3971_v59  ;;  %v4542_v50 = vld [vmem:[#allocation10 + $0x94] sm:$0xf]  ;;  %v4067_v51 = vor.u32 %v4560_v43, %v4064_v44  ;;  %v3992_v52 = vld [vmem:[#allocation10 + $0x98] sm:$0xf0]  ;;  %v4054_v53 = vld [vmem:[#allocation12 + $0x10] sm:$0xf]  ;;  %v3931_v59 = vor.u32 %v4526_v48, %v3928_v49 }
 0x457   :  { %2431 = vmatpush.bf16.msrb.mxu1 %v4035_v62  ;;  %2551 = vmatpush.bf16.msrb.mxu2 %v4095_v63  ;;  %v4559_v54 = vld [vmem:[#allocation12 + $0x14] sm:$0xf0]  ;;  %v4558_v55 = vld [vmem:[#allocation12 + $0x14] sm:$0xf]  ;;  %v4056_v6 = vld [vmem:[#allocation12 + $0x18] sm:$0xf0]  ;;  %v3995_v63 = vor.u32 %v4542_v50, %v3992_v52 }
 0x458   :  { %2564 = vmatpush.bf16.msrb.mxu3 %v4099_v2  ;;  %v4524_v62 = vld [vmem:[#allocation10 + $0x4] sm:$0xf]  ;;  %v4055_v0 = vor.u32 %v4559_v54, %v4054_v53  ;;  %v3920_v57 = vld [vmem:[#allocation10 + $0x8] sm:$0xf0]  ;;  %v4059_v60 = vor.u32 %v4558_v55, %v4056_v6  ;;  %v4046_v30 = vld [vmem:[#allocation12] sm:$0xf] }
 0x459   :  { %v4540_v1 = vld [vmem:[#allocation10 + $0x84] sm:$0xf]  ;;  %v3984_v2 = vld [vmem:[#allocation10 + $0x88] sm:$0xf0]  ;;  %v4557_v36 = vld [vmem:[#allocation12 + $0x4] sm:$0xf0] }
 0x45a   :  { %2419 = vmatpush.bf16.msrb.mxu0 %v3963_v5  ;;  %v4556_v3 = vld [vmem:[#allocation12 + $0x4] sm:$0xf]  ;;  %v4048_v4 = vld [vmem:[#allocation12 + $0x8] sm:$0xf0]  ;;  %v4230_v5 = vld [vmem:[#allocation13 + $0xf0] sm:$0xf]  ;;  %v3987_v14 = vor.u32 %v4540_v1, %v3984_v2 }
 0x45b   :  { %2432 = vmatpush.bf16.msrb.mxu1 %v4027_v7  ;;  %2552 = vmatpush.bf16.msrb.mxu2 %v4087_v8  ;;  %v4603_v7 = vld [vmem:[#allocation13 + $0xf4] sm:$0xf0]  ;;  %v3923_v8 = vor.u32 %v4524_v62, %v3920_v57  ;;  %v4602_v10 = vld [vmem:[#allocation13 + $0xf4] sm:$0xf]  ;;  %v4232_v12 = vld [vmem:[#allocation13 + $0xf8] sm:$0xf0]  ;;  %v4051_v18 = vor.u32 %v4556_v3, %v4048_v4 }
 0x45c   :  { %2565 = vmatpush.bf16.msrb.mxu3 %v4091_v15  ;;  %v4047_v15 = vor.u32 %v4557_v36, %v4046_v30  ;;  %v5024_v17 = vld [vmem:[#allocation16] sm:$0xff]  ;;  %v4231_v11 = vor.u32 %v4603_v7, %v4230_v5  ;;  %v4166_v19 = vld [vmem:[#allocation13 + $0x70] sm:$0xf]  ;;  %v4587_v13 = vld [vmem:[#allocation13 + $0x74] sm:$0xf0] }
 0x45d   :  { %v2447_v23 = vpack.c.bf16 %v5024_v17, %v5024_v17  ;;  %v4600_v24 = vld [vmem:[#allocation13 + $0xe4] sm:$0xf]  ;;  %v4224_v25 = vld [vmem:[#allocation13 + $0xe8] sm:$0xf0]  ;;  %v4158_v27 = vld [vmem:[#allocation13 + $0x60] sm:$0xf] }
 0x45e   :  { %2420 = vmatpush.bf16.msrb.mxu0 %v3955_v20  ;;  %v4222_v20 = vld [vmem:[#allocation13 + $0xe0] sm:$0xf]  ;;  %v4585_v28 = vld [vmem:[#allocation13 + $0x64] sm:$0xf0]  ;;  %v4214_v29 = vld [vmem:[#allocation13 + $0xd0] sm:$0xf] }
 0x45f   :  { %2433 = vmatpush.bf16.msrb.mxu1 %v4019_v21  ;;  %2553 = vmatpush.bf16.msrb.mxu2 %v4079_v22  ;;  %v4601_v21 = vld [vmem:[#allocation13 + $0xe4] sm:$0xf0]  ;;  %v4235_v22 = vor.u32 %v4602_v10, %v4232_v12  ;;  %v4599_v31 = vld [vmem:[#allocation13 + $0xd4] sm:$0xf0]  ;;  %v4150_v35 = vld [vmem:[#allocation13 + $0x50] sm:$0xf] }
 0x460   :  { %2566 = vmatpush.bf16.msrb.mxu3 %v4083_v16  ;;  %v4167_v16 = vor.u32 %v4587_v13, %v4166_v19  ;;  %v4223_v26 = vor.u32 %v4601_v21, %v4222_v20  ;;  %v4583_v37 = vld [vmem:[#allocation13 + $0x54] sm:$0xf0]  ;;  %v4206_v38 = vld [vmem:[#allocation13 + $0xc0] sm:$0xf]  ;;  %v4198_v41 = vld [vmem:[#allocation13 + $0xb0] sm:$0xf] }
 0x461   :  { %v4151_v40 = vor.u32 %v4583_v37, %v4150_v35  ;;  %v4595_v42 = vld [vmem:[#allocation13 + $0xb4] sm:$0xf0]  ;;  %v4142_v43 = vld [vmem:[#allocation13 + $0x40] sm:$0xf]  ;;  %v4581_v44 = vld [vmem:[#allocation13 + $0x44] sm:$0xf0] }
 0x462   :  { %2421 = vmatpush.bf16.msrb.mxu0 %v3947_v32  ;;  %v4227_v32 = vor.u32 %v4600_v24, %v4224_v25  ;;  %v4586_v48 = vld [vmem:[#allocation13 + $0x74] sm:$0xf]  ;;  %v4168_v50 = vld [vmem:[#allocation13 + $0x78] sm:$0xf0]  ;;  %v4134_v55 = vld [vmem:[#allocation13 + $0x30] sm:$0xf] }
 0x463   :  { %2434 = vmatpush.bf16.msrb.mxu1 %v4011_v33  ;;  %2554 = vmatpush.bf16.msrb.mxu2 %v4071_v34  ;;  %v4159_v33 = vor.u32 %v4585_v28, %v4158_v27  ;;  %v4215_v34 = vor.u32 %v4599_v31, %v4214_v29  ;;  %v4216_v52 = vld [vmem:[#allocation13 + $0xd8] sm:$0xf0]  ;;  %v4171_v53 = vor.u32 %v4586_v48, %v4168_v50  ;;  %v4579_v6 = vld [vmem:[#allocation13 + $0x34] sm:$0xf0]  ;;  %v4160_v57 = vld [vmem:[#allocation13 + $0x68] sm:$0xf0] }
 0x464   :  { %2567 = vmatpush.bf16.msrb.mxu3 %v4075_v39  ;;  %v4597_v39 = vld [vmem:[#allocation13 + $0xc4] sm:$0xf0]  ;;  %v4135_v62 = vor.u32 %v4579_v6, %v4134_v55  ;;  %v4208_v30 = vld [vmem:[#allocation13 + $0xc8] sm:$0xf0]  ;;  %v4126_v36 = vld [vmem:[#allocation13 + $0x20] sm:$0xf] }
 0x465   :  { %v4577_v4 = vld [vmem:[#allocation13 + $0x24] sm:$0xf0]  ;;  %v4174_v5 = vld [vmem:[#allocation13 + $0x80] sm:$0xf]  ;;  %v4582_v10 = vld [vmem:[#allocation13 + $0x54] sm:$0xf] }
 0x466   :  { %2422 = vmatpush.bf16.msrb.mxu0 %v3939_v45  ;;  %v4190_v45 = vld [vmem:[#allocation13 + $0xa0] sm:$0xf]  ;;  %v4589_v7 = vld [vmem:[#allocation13 + $0x84] sm:$0xf0]  ;;  %v4152_v12 = vld [vmem:[#allocation13 + $0x58] sm:$0xf0] }
 0x467   :  { %2435 = vmatpush.bf16.msrb.mxu1 %v4003_v46  ;;  %2555 = vmatpush.bf16.msrb.mxu2 %v4063_v47  ;;  %v4143_v46 = vor.u32 %v4581_v44, %v4142_v43  ;;  %v4593_v47 = vld [vmem:[#allocation13 + $0xa4] sm:$0xf0]  ;;  %v4155_v19 = vor.u32 %v4582_v10, %v4152_v12  ;;  %v4575_v20 = vld [vmem:[#allocation13 + $0x14] sm:$0xf0]  ;;  %v4144_v24 = vld [vmem:[#allocation13 + $0x48] sm:$0xf0] }
 0x468   :  { %2568 = vmatpush.bf16.msrb.mxu3 %v4067_v51  ;;  %v4191_v49 = vor.u32 %v4593_v47, %v4190_v45  ;;  %v4598_v51 = vld [vmem:[#allocation13 + $0xd4] sm:$0xf]  ;;  %v4619_v21 = vld [vmem:[#allocation15 + $0x78] sm:$0xff]  ;;  %v4592_v25 = vld [vmem:[#allocation13 + $0xa4] sm:$0xf] }
 0x469   :  { %v4219_v54 = vor.u32 %v4598_v51, %v4216_v52  ;;  %v4618_v29 = vld [vmem:[#allocation15 + $0x70] sm:$0xff]  ;;  %v4573_v31 = vld [vmem:[#allocation13 + $0x4] sm:$0xf0]  ;;  %v4184_v35 = vld [vmem:[#allocation13 + $0x98] sm:$0xf0] }
 0x46a   :  { %2423 = vmatpush.bf16.msrb.mxu0 %v3931_v59  ;;  %v4182_v59 = vld [vmem:[#allocation13 + $0x90] sm:$0xf]  ;;  %v4176_v43 = vld [vmem:[#allocation13 + $0x88] sm:$0xf0]  ;;  %v4616_v47 = vld [vmem:[#allocation15 + $0x60] sm:$0xff] }
 0x46b   :  { %2436 = vmatpush.bf16.msrb.mxu1 %v3995_v63  ;;  %2556 = vmatpush.bf16.msrb.mxu2 %v4055_v0  ;;  %v4591_v63 = vld [vmem:[#allocation13 + $0x94] sm:$0xf0]  ;;  %v4584_v0 = vld [vmem:[#allocation13 + $0x64] sm:$0xf]  ;;  %v4610_v44 = vld [vmem:[#allocation15 + $0x30] sm:$0xff] }
 0x46c   :  { %2569 = vmatpush.bf16.msrb.mxu3 %v4059_v60  ;;  %v4183_v1 = vor.u32 %v4591_v63, %v4182_v59  ;;  %v4163_v2 = vor.u32 %v4584_v0, %v4160_v57  ;;  %v4596_v60 = vld [vmem:[#allocation13 + $0xc4] sm:$0xf]  ;;  %v4574_v48 = vld [vmem:[#allocation13 + $0x14] sm:$0xf]  ;;  %v4609_v51 = vld [vmem:[#allocation15 + $0x28] sm:$0xff] }
 0x46d   :  { %v4211_v3 = vor.u32 %v4596_v60, %v4208_v30  ;;  %v4615_v52 = vld [vmem:[#allocation15 + $0x58] sm:$0xff]  ;;  %v2225_v55 = vld [vmem:[%s5061_s6] sm:$0x3]  ;;  %v4112_v59 = vld [vmem:[#allocation13 + $0x8] sm:$0xf0] }
 0x46e   :  { %2424 = vmatpush.bf16.msrb.mxu0 %v3923_v8  ;;  %v4127_v8 = vor.u32 %v4577_v4, %v4126_v36  ;;  %v4572_v6 = vld [vmem:[#allocation13 + $0x4] sm:$0xf]  ;;  %v4614_v0 = vld [vmem:[#allocation15 + $0x50] sm:$0xff]  ;;  %v2227_v57 = vperm.slane %v2225_v55, 0  ;;  %v4613_v60 = vld [vmem:[#allocation15 + $0x48] sm:$0xff] }
 0x46f   :  { %2437 = vmatpush.bf16.msrb.mxu1 %v3987_v14  ;;  %2557 = vmatpush.bf16.msrb.mxu2 %v4047_v15  ;;  %v4594_v14 = vld [vmem:[#allocation13 + $0xb4] sm:$0xf]  ;;  %v4175_v15 = vor.u32 %v4589_v7, %v4174_v5  ;;  %v4608_v63 = vld [vmem:[#allocation15 + $0x20] sm:$0xff]  ;;  %v4605_v12 = vld [vmem:[#allocation15 + $0x8] sm:$0xff] }
 0x470   :  { %2570 = vmatpush.bf16.msrb.mxu3 %v4051_v18  ;;  %v4200_v18 = vld [vmem:[#allocation13 + $0xb8] sm:$0xf0]  ;;  %v4606_v7 = vld [vmem:[#allocation15 + $0x10] sm:$0xff] }
 0x471   :  { %2425 = vmatmul.bf16.vlgmr.msrb.gmra.mxu0 %v5016_v9  ;;  %v4207_v9 = vor.u32 %v4597_v39, %v4206_v38  ;;  %v4203_v13 = vor.u32 %v4594_v14, %v4200_v18  ;;  %v4611_v38 = vld [vmem:[#allocation15 + $0x38] sm:$0xff] }
 0x472   :  { %2438 = vmatmul.bf16.vlgmr.msrb.gmra.mxu1 %v5020_v61  ;;  %2558 = vmatmul.bf16.vlgmr.msrb.gmra.mxu2 %v2447_v23  ;;  %v4199_v61 = vor.u32 %v4595_v42, %v4198_v41  ;;  %v4576_v41 = vld [vmem:[#allocation13 + $0x24] sm:$0xf]  ;;  %v4128_v42 = vld [vmem:[#allocation13 + $0x28] sm:$0xf0] }
 0x473   :  { %2785 = vmatpush.bf16.msra.mxu1 %v4231_v11  ;;  %2571 = vmatmul.bf16.vlgmr.msrb.gmra.mxu3 %v2447_v23  ;;  %v4118_v11 = vld [vmem:[#allocation13 + $0x10] sm:$0xf]  ;;  %v4580_v23 = vld [vmem:[#allocation13 + $0x44] sm:$0xf]  ;;  %v4131_v45 = vor.u32 %v4576_v41, %v4128_v42 }
 0x474   :  { %2811 = vmatpush.bf16.msra.mxu3 %v4235_v22  ;;  %2772 = vmatpush.bf16.msra.mxu0 %v4167_v16  ;;  %v4119_v22 = vor.u32 %v4575_v20, %v4118_v11  ;;  %v4192_v16 = vld [vmem:[#allocation13 + $0xa8] sm:$0xf0]  ;;  %v4147_v27 = vor.u32 %v4580_v23, %v4144_v24  ;;  %v4604_v11 = vld [vmem:[#allocation15] sm:$0xff] }
 0x475   :  { %2798 = vmatpush.bf16.msra.mxu2 %v4171_v53  ;;  %v4195_v28 = vor.u32 %v4592_v25, %v4192_v16  ;;  %v2464_v23 = vld [vmem:[%s5062_s7] sm:$0x3]  ;;  %v2443_v25 = vld [vmem:[#allocation4] sm:$0xff] }
 0x477   :  { %2786 = vmatpush.bf16.msra.mxu1 %v4223_v26  ;;  %v4110_v26 = vld [vmem:[#allocation13] sm:$0xf] }
 0x478   :  { %2812 = vmatpush.bf16.msra.mxu3 %v4227_v32  ;;  %2773 = vmatpush.bf16.msra.mxu0 %v4159_v33  ;;  %v4578_v32 = vld [vmem:[#allocation13 + $0x34] sm:$0xf]  ;;  %v4136_v33 = vld [vmem:[#allocation13 + $0x38] sm:$0xf0]  ;;  %v4111_v37 = vor.u32 %v4573_v31, %v4110_v26 }
 0x479   :  { %2799 = vmatpush.bf16.msra.mxu2 %v4163_v2  ;;  %v4139_v39 = vor.u32 %v4578_v32, %v4136_v33  ;;  %v4607_v2 = vld [vmem:[#allocation15 + $0x18] sm:$0xff] }
 0x47b   :  { %2787 = vmatpush.bf16.msra.mxu1 %v4215_v34  ;;  %v4590_v34 = vld [vmem:[#allocation13 + $0x94] sm:$0xf] }
 0x47c   :  { %2774 = vmatpush.bf16.msra.mxu0 %v4151_v40  ;;  %2813 = vmatpush.bf16.msra.mxu3 %v4219_v54  ;;  %v4187_v40 = vor.u32 %v4590_v34, %v4184_v35 }
 0x47d   :  { %2800 = vmatpush.bf16.msra.mxu2 %v4155_v19  ;;  %v2228_v19 = vperm.slane %v2225_v55, 1 }
 0x47f   :  { %2788 = vmatpush.bf16.msra.mxu1 %v4207_v9  ;;  %v4617_v9 = vld [vmem:[#allocation15 + $0x68] sm:$0xff] }
 0x480   :  { %2775 = vmatpush.bf16.msra.mxu0 %v4143_v46  ;;  %2814 = vmatpush.bf16.msra.mxu3 %v4211_v3 }
 0x481   :  { %2801 = vmatpush.bf16.msra.mxu2 %v4147_v27  ;;  %v2466_v27 = vperm.slane %v2464_v23, 0 }
 0x483   :  { %2789 = vmatpush.bf16.msra.mxu1 %v4199_v61  ;;  %v4588_v61 = vld [vmem:[#allocation13 + $0x84] sm:$0xf] }
 0x484   :  { %2776 = vmatpush.bf16.msra.mxu0 %v4135_v62  ;;  %2815 = vmatpush.bf16.msra.mxu3 %v4203_v13  ;;  %v4179_v46 = vor.u32 %v4588_v61, %v4176_v43  ;;  %v4115_v62 = vor.u32 %v4572_v6, %v4112_v59  ;;  %v2075_v13 = vld [vmem:[%s5060_s5] sm:$0x3] }
 0x485   :  { %2802 = vmatpush.bf16.msra.mxu2 %v4139_v39  ;;  %v2077_v24 = vperm.slane %v2075_v13, 0  ;;  %v2078_v16 = vperm.slane %v2075_v13, 1 }
 0x487   :  { %2790 = vmatpush.bf16.msra.mxu1 %v4191_v49  ;;  %v4120_v49 = vld [vmem:[#allocation13 + $0x18] sm:$0xf0] }
 0x488   :  { %2777 = vmatpush.bf16.msra.mxu0 %v4127_v8  ;;  %2816 = vmatpush.bf16.msra.mxu3 %v4195_v28  ;;  %v4123_v50 = vor.u32 %v4574_v48, %v4120_v49  ;;  %v4612_v8 = vld [vmem:[#allocation15 + $0x40] sm:$0xff] }
 0x489   :  { %2803 = vmatpush.bf16.msra.mxu2 %v4131_v45 }
 0x48b   :  { %2791 = vmatpush.bf16.msra.mxu1 %v4183_v1 }
 0x48c   :  { %2778 = vmatpush.bf16.msra.mxu0 %v4119_v22  ;;  %2817 = vmatpush.bf16.msra.mxu3 %v4187_v40 }
 0x48d   :  { %2804 = vmatpush.bf16.msra.mxu2 %v4123_v50 }
 0x48f   :  { %2792 = vmatpush.bf16.msra.mxu1 %v4175_v15 }
 0x490   :  { %2779 = vmatpush.bf16.msra.mxu0 %v4111_v37  ;;  %2818 = vmatpush.bf16.msra.mxu3 %v4179_v46 }
 0x491   :  { %2805 = vmatpush.bf16.msra.mxu2 %v4115_v62 }
 0x493   :  { %2979 = vmatpush.bf16.msrb.mxu1 %v4619_v21 }
 0x494   :  { %2966 = vmatpush.bf16.msrb.mxu0 %v4611_v38 }
 0x497   :  { %2980 = vmatpush.bf16.msrb.mxu1 %v4618_v29  ;;  %v2467_v29 = vperm.slane %v2464_v23, 1 }
 0x498   :  { %2967 = vmatpush.bf16.msrb.mxu0 %v4610_v44 }
 0x49b   :  { %2981 = vmatpush.bf16.msrb.mxu1 %v4617_v9 }
 0x49c   :  { %2968 = vmatpush.bf16.msrb.mxu0 %v4609_v51 }
 0x49f   :  { %2982 = vmatpush.bf16.msrb.mxu1 %v4616_v47 }
 0x4a0   :  { %2969 = vmatpush.bf16.msrb.mxu0 %v4608_v63 }
 0x4a3   :  { %2983 = vmatpush.bf16.msrb.mxu1 %v4615_v52 }
 0x4a4   :  { %2970 = vmatpush.bf16.msrb.mxu0 %v4607_v2 }
 0x4a7   :  { %2984 = vmatpush.bf16.msrb.mxu1 %v4614_v0 }
 0x4a8   :  { %2971 = vmatpush.bf16.msrb.mxu0 %v4606_v7 }
 0x4ab   :  { %2985 = vmatpush.bf16.msrb.mxu1 %v4613_v60 }
 0x4ac   :  { %2972 = vmatpush.bf16.msrb.mxu0 %v4605_v12 }
 0x4af   :  { %2986 = vmatpush.bf16.msrb.mxu1 %v4612_v8 }
 0x4b0   :  { %2973 = vmatpush.bf16.msrb.mxu0 %v4604_v11 }
 0x4ce   :  { %v2170_v53 = vpop.f32.mrf.mxu0 }
 0x4cf   :  { %v2183_v54 = vpop.f32.mrf.mxu1  ;;  %v2171_v31 = vadd.f32 %v2170_v53, %v2077_v24 }
 0x4d0   :  { %v2184_v32 = vadd.f32 %v2183_v54, %v2078_v16 }
 0x4d1   :  { %v2189_v9 = vsub.f32 %v2171_v31, %v5010_v56 }
 0x4d2   :  { %v2190_v42 = vsub.f32 %v2184_v32, %v5012_v58 }
 0x4d6   :  { %v2172_v30 = vpop.f32.mrf.mxu0 }
 0x4d7   :  { %v2400_v1 = vpop.f32.mrf.mxu2  ;;  %v2185_v4 = vpop.f32.mrf.mxu1 }
 0x4d8   :  { %v2401_v36 = vadd.f32 %v2400_v1, %v2227_v57  ;;  %v2413_v3 = vpop.f32.mrf.mxu3 }
 0x4da   :  { %v2414_v5 = vadd.f32 %v2413_v3, %v2401_v36 }
 0x4dc   :  { %v5034_v10 = vsub.f32 %v2414_v5, %v5024_v17 }
 0x4de   :  { %v2579_v14 = vpack.c.bf16 %v5034_v10, %v5034_v10  ;;  %v2992_v8 = vmul.f32 0.001953125, %v5034_v10 }
 0x4df   :  { %v2402_v15 = vpop.f32.mrf.mxu2 }
 0x4e0   :  { %v2415_v18 = vpop.f32.mrf.mxu3  ;;  %2793 = vmatmul.bf16.vlgmr.msra.gmra.mxu1 %v2579_v14  ;;  %2819 = vmatmul.bf16.vlgmr.msra.gmra.mxu3 %v2579_v14 }
 0x4ee   :  { %v2426_v20 = vpop.f32.mrf.mxu0 }
 0x4ef   :  { %v2427_v21 = vadd.f32 %v2426_v20, %v2228_v19  ;;  %v2439_v22 = vpop.f32.mrf.mxu1 }
 0x4f1   :  { %v2440_v26 = vadd.f32 %v2439_v22, %v2427_v21 }
 0x4f3   :  { %v2444_v28 = vsub.f32 %v2440_v26, %v2443_v25 }
 0x4f5   :  { %v2578_v33 = vpack.c.bf16 %v2444_v28, %v2444_v28  ;;  %v2559_v34 = vpop.f32.mrf.mxu2 }
 0x4f6   :  { %v2560_v35 = vadd.f32 %v2559_v34, %v2466_v27  ;;  %v2572_v37 = vpop.f32.mrf.mxu3  ;;  %v2428_v38 = vpop.f32.mrf.mxu0 }
 0x4f7   :  { %v2573_v39 = vadd.f32 %v2572_v37, %v2467_v29  ;;  %v2441_v40 = vpop.f32.mrf.mxu1  ;;  %2780 = vmatmul.bf16.vlgmr.msra.gmra.mxu0 %v2578_v33  ;;  %2806 = vmatmul.bf16.vlgmr.msra.gmra.mxu2 %v2578_v33 }
 0x4f8   :  { %v2576_v41 = vsub.f32 %v2560_v35, %v5010_v56 }
 0x4f9   :  { %v2577_v61 = vsub.f32 %v2573_v39, %v5012_v58 }
 0x4fa   :  { %v2824_v43 = vadd.f32 %v2576_v41, %v2189_v9  ;;  %v2836_v48 = vpack.c.bf16 %v2576_v41, %v2576_v41 }
 0x4fb   :  { %v2825_v44 = vadd.f32 %v2577_v61, %v2190_v42  ;;  %v2837_v45 = vpack.c.bf16 %v2577_v61, %v2577_v61 }
 0x4fc   :  { %v2826_v55 = vmul.f32 0.0009765625, %v2824_v43 }
 0x4fd   :  { %2987 = vmatmul.bf16.vlgmr.msrb.gmra.mxu1 %v2837_v45  ;;  %v2561_v46 = vpop.f32.mrf.mxu2  ;;  %v2827_v1 = vmul.f32 0.0009765625, %v2825_v44 }
 0x4fe   :  { %v2574_v47 = vpop.f32.mrf.mxu3 }
 0x507   :  { %2974 = vmatmul.bf16.vlgmr.msrb.gmra.mxu0 %v2836_v48 }
 0x55d   :  { %v2794_v49 = vpop.f32.mrf.mxu1 }
 0x563   :  { %v2820_v50 = vpop.f32.mrf.mxu3 }
 0x565   :  { %v2796_v51 = vpop.f32.mrf.mxu1 }
 0x56b   :  { %v2822_v52 = vpop.f32.mrf.mxu3 }
 0x574   :  { %v2781_v53 = vpop.f32.mrf.mxu0 }
 0x575   :  { %v2795_v54 = vadd.f32 %v2794_v49, %v2781_v53 }
 0x577   :  { %v2828_v6 = vsub.f32 %v2795_v54, %v2826_v55 }
 0x579   :  { %v2830_v59 = vmul.f32 0.001, %v2828_v6 }
 0x57a   :  { %v2807_v62 = vpop.f32.mrf.mxu2  ;;  %v2988_v63 = vpop.f32.mrf.mxu1 }
 0x57b   :  { %v2832_v0 = vsub.f32 %v5010_v56, %v2830_v59  ;;  %v2821_v57 = vadd.f32 %v2820_v50, %v2807_v62 }
 0x57c   :  { %v2783_v2 = vpop.f32.mrf.mxu0 }
 0x57d   :  { %2834 = vst [vmem:[#allocation2] sm:$0xff] %v2832_v0  ;;  %v2829_v60 = vsub.f32 %v2821_v57, %v2827_v1 }
 0x57f   :  { %v2831_v30 = vmul.f32 0.001, %v2829_v60 }
 0x581   :  { %v2833_v36 = vsub.f32 %v5012_v58, %v2831_v30 }
 0x582   :  { %v2809_v3 = vpop.f32.mrf.mxu2  ;;  %v2990_v4 = vpop.f32.mrf.mxu1 }
 0x583   :  { %2835 = vst [vmem:[#allocation2 + $0x8] sm:$0xff] %v2833_v36 }
 0x584   :  { %v2975_v5 = vpop.f32.mrf.mxu0 }
 0x585   :  { %v2989_v7 = vadd.f32 %v2988_v63, %v2975_v5 }
 0x587   :  { %v2993_v12 = vsub.f32 %v2989_v7, %v2992_v8 }
 0x589   :  { %v2995_v14 = vmul.f32 0.001, %v2993_v12 }
 0x58b   :  { %v2996_v15 = vsub.f32 %v5024_v17, %v2995_v14 }
 0x58c   :  { %v2977_v56 = vpop.f32.mrf.mxu0 }
 0x58d   :  { %2997 = vst [vmem:[#allocation16] sm:$0xff] %v2996_v15 }
 0x58e PF:  { %s3005_s14 = sshll.u32 %s5065_s10, 4  ;;  %s4860_s8 = smov [#allocation16]   ;;  %s3006_s14 = int_to_ptr.hbm [resolvable:$true] %s3005_s14 }
 0x58f   :  { %s3003_s15 = sshll.u32 %s4860_s8, 4  ;;  %s3004_s15 = int_to_ptr.vmem [resolvable:$true] %s3003_s15 }
 0x590   :  { %3008 = dma.vmem_to_hbm [thread:$0]  %s3004_s15, 128, %s3006_s14, [#allocation6]  }
 0x591   :  { %4847 = dma.done.wait [#allocation6], 128  }
 0x592   :  { %4848 = vsyncadd [#allocation6], 4294967168 }
 0x593   :  { %3013 = vsyncpa [#allocation5], 1 }
 0x594   :  { %3014 = vsyncpa [#allocation8], 1 }
 0x595   :  { %3015 = vsyncpa [#allocation11], 1 }
 0x596   :  { %3016 = vsyncpa [#allocation14], 1 }
 0x597   :  { %3017 = vsyncpa [#allocation6], 1 }

</bundles_post_ra>
